<compile_context>
chip_gen: v7x
topology: tpu7x:2x2x1
jax: 0.10.0
libtpu: 0.0.40
codegen_flags: <defaults>
</compile_context>

<pallas_src>
import functools
import math

import jax
import jax.numpy as jnp
import numpy as np
from jax.experimental import pallas as pl
from jax.experimental.pallas import tpu as pltpu


# ----------------------------- shared math helpers -----------------------------

def _layernorm(x, eps):
    # PyTorch LayerNorm: biased variance over the last dim.
    mu = jnp.mean(x, axis=-1, keepdims=True)
    var = jnp.mean((x - mu) ** 2, axis=-1, keepdims=True)
    return (x - mu) * jax.lax.rsqrt(var + eps)


def _erf_poly(x):
    # Abramowitz & Stegun 7.1.26 (max abs err ~1.5e-7); exp + a few VALU ops only.
    p = 0.3275911
    a1, a2, a3, a4, a5 = 0.254829592, -0.284496736, 1.421413741, -1.453152027, 1.061405429
    ax = jnp.abs(x)
    t = 1.0 / (1.0 + p * ax)
    poly = ((((a5 * t + a4) * t + a3) * t + a2) * t + a1) * t
    y = 1.0 - poly * jnp.exp(-ax * ax)
    return jnp.where(x >= 0, y, -y)


def _gelu_kernel(x):
    # erf-based GELU (PyTorch nn.GELU default), erf via short polynomial.
    return 0.5 * x * (1.0 + _erf_poly(x * 0.7071067811865476))


def _gelu_exact(x):
    return 0.5 * x * (1.0 + jax.lax.erf(x * 0.7071067811865476))


def _silu_kernel(x):
    # sigmoid via tanh (EUP) - numerically stable, exact up to f32 rounding.
    return x * (0.5 * (jnp.tanh(0.5 * x) + 1.0))


def _silu_exact(x):
    return x * jax.nn.sigmoid(x)


# ------------------------------ fused DiT kernel ------------------------------

def fused_dit_kernel(*refs, B, T, D, num_heads, num_layers):
    """Entire DiffusionTransformer forward (minus sinusoidal embed) in one kernel."""
    BT = B * T
    hd = D // num_heads
    f32 = jnp.float32

    it = iter(refs)
    nxt = lambda: next(it)

    sincos_ref = nxt()      # (B, D)   sinusoidal time embedding
    gcond_ref = nxt()       # (B, G)
    noisy_ref = nxt()       # (BT, output_dim)   flattened in wrapper
    pos_ref = nxt()         # (BT, D)            pre-broadcast in wrapper
    w_t1 = nxt(); b_t1 = nxt(); w_t2 = nxt(); b_t2 = nxt()     # time_embed MLP
    w_ct = nxt(); w_cg = nxt(); b_c = nxt()                    # cond_embed (split rows)
    w_in = nxt(); b_in = nxt()                                 # input_embed
    layer_refs = [tuple(nxt() for _ in range(10)) for _ in range(num_layers)]
    w_ao = nxt(); b_ao = nxt()                                 # adaLN_modulation_out (fused 2D)
    w_h1 = nxt(); b_h1 = nxt(); g_ln = nxt(); bt_ln = nxt()    # denoising head
    w_h2 = nxt(); b_h2 = nxt()                                 # padded to 128 lanes
    o_ref = nxt()                                              # (BT, 128)

    def dot(a, w):
        return jnp.dot(a, w, preferred_element_type=f32)

    # ---- conditioning path: time-embed MLP + cond embed (no concat: split weight rows) ----
    te = _gelu_kernel(dot(sincos_ref[...], w_t1[...]) + b_t1[...])
    te = dot(te, w_t2[...]) + b_t2[...]                                   # (B, D)
    c = dot(te, w_ct[...]) + dot(gcond_ref[...], w_cg[...]) + b_c[...]    # (B, D)
    c_silu = _silu_kernel(c)
    # Broadcast the conditioning ONCE to (BT, D): every adaLN dot below is then row-aligned
    # with the flat residual stream -> no per-layer broadcast / reshape of x.
    c_bt = jnp.broadcast_to(c_silu[:, None, :], (B, T, D)).reshape(BT, D)

    # ---- input embedding + positional embedding (both already flat (BT, ...)) ----
    x = dot(noisy_ref[...], w_in[...]) + b_in[...] + pos_ref[...]         # (BT, D)

    inv_sqrt_hd = 1.0 / math.sqrt(hd)

    # ---- DiT blocks (static Python loop; all weights VMEM-resident) ----
    for (w_ada, b_ada, w_qkv, b_qkv, w_o, b_o, w1, b1, w2, b2) in layer_refs:
        # Fused adaLN-Zero modulation: ONE (BT,D)x(D,6D) dot, slice the lane-dense result.
        mod = dot(c_bt, w_ada[...]) + b_ada[...]                          # (BT, 6D)
        shift_msa = mod[:, 0 * D:1 * D]
        scale_msa = mod[:, 1 * D:2 * D]
        gate_msa = mod[:, 2 * D:3 * D]
        shift_mlp = mod[:, 3 * D:4 * D]
        scale_mlp = mod[:, 4 * D:5 * D]
        gate_mlp = mod[:, 5 * D:6 * D]

        # ---- attention branch ----
        xn = _layernorm(x, 1e-6) * (1.0 + scale_msa) + shift_msa          # (BT, D)
        qkv = dot(xn, w_qkv[...]) + b_qkv[...]                            # ONE fused QKV dot
        q = qkv[:, 0 * D:1 * D]
        k = qkv[:, 1 * D:2 * D]
        v = qkv[:, 2 * D:3 * D]

        # Per-head score/softmax/context (tiny (T,hd) tiles; MXU push count identical to a
        # heads-batched einsum at hd < MXU tile, and avoids 4-D sublane transposes).
        ctx_heads = []
        for h in range(num_heads):
            qh = q[:, h * hd:(h + 1) * hd].reshape(B, T, hd)
            kh = k[:, h * hd:(h + 1) * hd].reshape(B, T, hd)
            vh = v[:, h * hd:(h + 1) * hd].reshape(B, T, hd)
            s = jnp.einsum("bqd,bkd->bqk", qh, kh,
                           preferred_element_type=f32) * inv_sqrt_hd      # (B, T, T)
            s = s - jnp.max(s, axis=-1, keepdims=True)
            p = jnp.exp(s)
            p = p * pl.reciprocal(jnp.sum(p, axis=-1, keepdims=True), approx=True)
            ah = jnp.einsum("bqk,bkd->bqd", p, vh,
                            preferred_element_type=f32)                   # (B, T, hd)
            ctx_heads.append(ah.reshape(BT, hd))
        ctx = jnp.concatenate(ctx_heads, axis=-1)                         # (BT, D)
        attn = dot(ctx, w_o[...]) + b_o[...]                              # ONE fused out-proj
        x = x + gate_msa * attn

        # ---- MLP branch ----
        xn2 = _layernorm(x, 1e-6) * (1.0 + scale_mlp) + shift_mlp
        h1 = _gelu_kernel(dot(xn2, w1[...]) + b1[...])
        mlp = dot(h1, w2[...]) + b2[...]
        x = x + gate_mlp * mlp

    # ---- final modulated norm + denoising head ----
    mod = dot(c_bt, w_ao[...]) + b_ao[...]                                # (BT, 2D) fused
    shift_out = mod[:, :D]
    scale_out = mod[:, D:]
    xn = _layernorm(x, 1e-6) * (1.0 + scale_out) + shift_out
    hh = _gelu_kernel(dot(xn, w_h1[...]) + b_h1[...])
    hh = _layernorm(hh, 1e-5) * g_ln[...] + bt_ln[...]
    out = dot(hh, w_h2[...]) + b_h2[...]                                  # (BT, 128) lane-dense
    o_ref[...] = out.astype(o_ref.dtype)


# ------------------------ parameter re-packing (once, host side) ------------------------

def pack_params(params, num_heads):
    """Re-layout weights so every kernel matmul / store is lane-dense."""
    del num_heads  # heads are handled via lane slices of the fused QKV result
    D = params["pos_embed"].shape[-1]

    g = [params["w_t1"], params["b_t1"], params["w_t2"], params["b_t2"],
         params["w_c"][:D, :], params["w_c"][D:, :], params["b_c"],
         params["w_in"], params["b_in"]]

    layers = [list(blk) for blk in params["blocks"]]

    w_ao, b_ao, w_h1, b_h1, g_ln, bt_ln, w_h2, b_h2 = params["final"]
    out_dim = w_h2.shape[-1]
    padded = max(128, ((out_dim + 127) // 128) * 128)      # lane-dense final store
    w_h2p = jnp.pad(w_h2, ((0, 0), (0, padded - out_dim)))
    b_h2p = jnp.pad(b_h2, ((0, 0), (0, padded - out_dim)))
    final = [w_ao, b_ao, w_h1, b_h1, g_ln, bt_ln, w_h2p, b_h2p]

    return {"globals": g, "layers": layers, "final": final,
            "pos": params["pos_embed"][0]}


# ----------------------------- full forward (thin JAX glue) -----------------------------

def diffusion_transformer_forward(noisy_input, timesteps, global_cond, packed,
                                  *, num_heads, output_dim):
    pos = packed["pos"]                       # (T, D)
    T, D = pos.shape
    B = noisy_input.shape[0]
    BT = B * T
    padded_out = packed["final"][-1].shape[-1]
    num_layers = len(packed["layers"])
    half = D // 2

    # DiffusionSinusoidalPosEmb (tiny; plain JAX outside the kernel)
    freq = jnp.exp(jnp.arange(half, dtype=jnp.float32) * (-math.log(10000.0) / (half - 1)))
    ang = timesteps.astype(jnp.float32)[:, None] * freq[None, :]
    sincos = jnp.concatenate([jnp.sin(ang), jnp.cos(ang)], axis=-1)       # (B, D)

    # HBM-side reshapes / broadcasts are free metadata; keep them out of the kernel.
    noisy_flat = noisy_input.astype(jnp.float32).reshape(BT, -1)          # (BT, out_dim)
    pos_bt = jnp.broadcast_to(pos[None], (B, T, D)).reshape(BT, D)        # (BT, D)

    flat = list(packed["globals"])
    for layer in packed["layers"]:
        flat += list(layer)
    flat += list(packed["final"])

    kernel = functools.partial(fused_dit_kernel, B=B, T=T, D=D,
                               num_heads=num_heads, num_layers=num_layers)
    n_in = 4 + len(flat)

    out_flat = pl.pallas_call(
        kernel,
        out_shape=jax.ShapeDtypeStruct((BT, padded_out), jnp.float32),
        in_specs=[pl.BlockSpec(memory_space=pltpu.MemorySpace.VMEM)] * n_in,
        out_specs=pl.BlockSpec(memory_space=pltpu.MemorySpace.VMEM),
        compiler_params=pltpu.CompilerParams(vmem_limit_bytes=32 * 1024 * 1024),
    )(sincos, global_cond.astype(jnp.float32), noisy_flat, pos_bt, *flat)

    return out_flat[:, :output_dim].reshape(B, T, output_dim)


# ----------------------------- pure-JAX reference (check) -----------------------------

def ref_forward(noisy_input, timesteps, global_cond, params, num_heads):
    P = jax.lax.Precision.HIGHEST
    mm = functools.partial(jnp.matmul, precision=P)

    D = params["pos_embed"].shape[-1]
    half = D // 2
    freq = jnp.exp(jnp.arange(half, dtype=jnp.float32) * (-math.log(10000.0) / (half - 1)))
    ang = timesteps.astype(jnp.float32)[:, None] * freq[None, :]
    sincos = jnp.concatenate([jnp.sin(ang), jnp.cos(ang)], axis=-1)
    te = mm(_gelu_exact(mm(sincos, params["w_t1"]) + params["b_t1"]), params["w_t2"]) + params["b_t2"]
    cond = jnp.concatenate([te, global_cond], axis=-1)
    c = mm(cond, params["w_c"]) + params["b_c"]
    x = mm(noisy_input, params["w_in"]) + params["b_in"] + params["pos_embed"]

    B, T, _ = x.shape
    hd = D // num_heads
    for (w_ada, b_ada, w_qkv, b_qkv, w_o, b_o, w1, b1, w2, b2) in params["blocks"]:
        mod = mm(_silu_exact(c), w_ada) + b_ada
        sh_msa, sc_msa, g_msa, sh_mlp, sc_mlp, g_mlp = jnp.split(mod, 6, axis=-1)
        xn = _layernorm(x, 1e-6) * (1 + sc_msa[:, None, :]) + sh_msa[:, None, :]
        qkv = mm(xn, w_qkv) + b_qkv
        q, k, v = jnp.split(qkv, 3, axis=-1)
        q = q.reshape(B, T, num_heads, hd).transpose(0, 2, 1, 3)
        k = k.reshape(B, T, num_heads, hd).transpose(0, 2, 1, 3)
        v = v.reshape(B, T, num_heads, hd).transpose(0, 2, 1, 3)
        s = jnp.einsum("bhqd,bhkd->bhqk", q, k, precision=P) / math.sqrt(hd)
        p = jax.nn.softmax(s, axis=-1)
        a = jnp.einsum("bhqk,bhkd->bhqd", p, v, precision=P)
        a = a.transpose(0, 2, 1, 3).reshape(B, T, D)
        a = mm(a, w_o) + b_o
        x = x + g_msa[:, None, :] * a
        xn2 = _layernorm(x, 1e-6) * (1 + sc_mlp[:, None, :]) + sh_mlp[:, None, :]
        mlp = mm(_gelu_exact(mm(xn2, w1) + b1), w2) + b2
        x = x + g_mlp[:, None, :] * mlp

    w_ao, b_ao, w_h1, b_h1, g_ln, bt_ln, w_h2, b_h2 = params["final"]
    mod = mm(_silu_exact(c), w_ao) + b_ao
    sh, sc = jnp.split(mod, 2, axis=-1)
    x = _layernorm(x, 1e-6) * (1 + sc[:, None, :]) + sh[:, None, :]
    h = _gelu_exact(mm(x, w_h1) + b_h1)
    h = _layernorm(h, 1e-5) * g_ln + bt_ln
    return mm(h, w_h2) + b_h2


# ----------------------------- deterministic parameter init -----------------------------

def init_params(key, D, T, num_heads, num_layers, global_cond_dim, output_dim, mlp_ratio=4.0):
    H = int(D * mlp_ratio)
    keys = iter(jax.random.split(key, 256))

    def w(shape, std=0.02):
        return std * jax.random.normal(next(keys), shape, dtype=jnp.float32)

    params = dict(
        w_t1=w((D, D)), b_t1=w((1, D)),
        w_t2=w((D, D)), b_t2=w((1, D)),
        w_in=w((output_dim, D)), b_in=w((1, D)),
        w_c=w((D + global_cond_dim, D)), b_c=w((1, D)),
        pos_embed=w((1, T, D)),
        blocks=[],
    )
    for _ in range(num_layers):
        params["blocks"].append((
            w((D, 6 * D)), w((1, 6 * D)),     # adaLN_modulation linear
            w((D, 3 * D)), w((1, 3 * D)),     # attn in_proj (q|k|v)
            w((D, D)), w((1, D)),             # attn out_proj
            w((D, H)), w((1, H)),             # mlp fc1
            w((H, D)), w((1, D)),             # mlp fc2
        ))
    params["final"] = (
        w((D, 2 * D)), w((1, 2 * D)),         # adaLN_modulation_out linear
        w((D, D)), w((1, D)),                 # head fc1
        1.0 + w((1, D)), w((1, D)),           # head LayerNorm gamma / beta
        w((D, output_dim)), w((1, output_dim)),  # head fc2
    )
    return params


# --------------------------------------- main ---------------------------------------

if __name__ == "__main__":
    B = 2                 # batch
    T = 8                 # horizon
    D = 64                # transformer_dim
    num_heads = 4
    num_layers = 2
    global_cond_dim = 32
    output_dim = 8        # action dim

    key = jax.random.PRNGKey(0)
    k_p, k_x, k_t, k_g = jax.random.split(key, 4)
    params = init_params(k_p, D, T, num_heads, num_layers, global_cond_dim, output_dim)
    packed = pack_params(params, num_heads)       # one-time weight re-layout

    noisy_input = jax.random.normal(k_x, (B, T, output_dim), dtype=jnp.float32)
    timesteps = jax.random.randint(k_t, (B,), 0, 1000).astype(jnp.float32)
    global_cond = jax.random.normal(k_g, (B, global_cond_dim), dtype=jnp.float32)

    fwd = jax.jit(functools.partial(diffusion_transformer_forward,
                                    num_heads=num_heads, output_dim=output_dim))
    out = fwd(noisy_input, timesteps, global_cond, packed)
    out = jax.block_until_ready(out)

    ref = ref_forward(noisy_input, timesteps, global_cond, params, num_heads)
    ref = jax.block_until_ready(ref)

    assert out.shape == (B, T, output_dim), out.shape
    err = float(jnp.max(jnp.abs(out - ref)))
    scale = float(jnp.max(jnp.abs(ref))) + 1e-8
    assert np.isfinite(err) and err / scale < 3e-2, f"mismatch: max|diff|={err}, scale={scale}"

    print("KERNEL_OK")
</pallas_src>

<mosaic_0001>
module attributes {stable_mosaic.version = 11 : i64} {
  func.func @fused_dit_kernel(%arg0: memref<2x64xf32, #tpu.memory_space<vmem>>, %arg1: memref<2x32xf32, #tpu.memory_space<vmem>>, %arg2: memref<16x8xf32, #tpu.memory_space<vmem>>, %arg3: memref<16x64xf32, #tpu.memory_space<vmem>>, %arg4: memref<64x64xf32, #tpu.memory_space<vmem>>, %arg5: memref<1x64xf32, #tpu.memory_space<vmem>>, %arg6: memref<64x64xf32, #tpu.memory_space<vmem>>, %arg7: memref<1x64xf32, #tpu.memory_space<vmem>>, %arg8: memref<64x64xf32, #tpu.memory_space<vmem>>, %arg9: memref<32x64xf32, #tpu.memory_space<vmem>>, %arg10: memref<1x64xf32, #tpu.memory_space<vmem>>, %arg11: memref<8x64xf32, #tpu.memory_space<vmem>>, %arg12: memref<1x64xf32, #tpu.memory_space<vmem>>, %arg13: memref<64x384xf32, #tpu.memory_space<vmem>>, %arg14: memref<1x384xf32, #tpu.memory_space<vmem>>, %arg15: memref<64x192xf32, #tpu.memory_space<vmem>>, %arg16: memref<1x192xf32, #tpu.memory_space<vmem>>, %arg17: memref<64x64xf32, #tpu.memory_space<vmem>>, %arg18: memref<1x64xf32, #tpu.memory_space<vmem>>, %arg19: memref<64x256xf32, #tpu.memory_space<vmem>>, %arg20: memref<1x256xf32, #tpu.memory_space<vmem>>, %arg21: memref<256x64xf32, #tpu.memory_space<vmem>>, %arg22: memref<1x64xf32, #tpu.memory_space<vmem>>, %arg23: memref<64x384xf32, #tpu.memory_space<vmem>>, %arg24: memref<1x384xf32, #tpu.memory_space<vmem>>, %arg25: memref<64x192xf32, #tpu.memory_space<vmem>>, %arg26: memref<1x192xf32, #tpu.memory_space<vmem>>, %arg27: memref<64x64xf32, #tpu.memory_space<vmem>>, %arg28: memref<1x64xf32, #tpu.memory_space<vmem>>, %arg29: memref<64x256xf32, #tpu.memory_space<vmem>>, %arg30: memref<1x256xf32, #tpu.memory_space<vmem>>, %arg31: memref<256x64xf32, #tpu.memory_space<vmem>>, %arg32: memref<1x64xf32, #tpu.memory_space<vmem>>, %arg33: memref<64x128xf32, #tpu.memory_space<vmem>>, %arg34: memref<1x128xf32, #tpu.memory_space<vmem>>, %arg35: memref<64x64xf32, #tpu.memory_space<vmem>>, %arg36: memref<1x64xf32, #tpu.memory_space<vmem>>, %arg37: memref<1x64xf32, #tpu.memory_space<vmem>>, %arg38: memref<1x64xf32, #tpu.memory_space<vmem>>, %arg39: memref<64x128xf32, #tpu.memory_space<vmem>>, %arg40: memref<1x128xf32, #tpu.memory_space<vmem>>, %arg41: memref<16x128xf32, #tpu.memory_space<vmem>>) attributes {dimension_semantics = [], scalar_prefetch = 0 : i64, scratch_operands = 0 : i64, tpu.core_type = #tpu.core_type<tc>} {
    %c0 = arith.constant 0 : index
    %c0_0 = arith.constant 0 : index
    %0 = vector.load %arg0[%c0, %c0_0] : memref<2x64xf32, #tpu.memory_space<vmem>>, vector<2x64xf32>
    %c0_1 = arith.constant 0 : index
    %c0_2 = arith.constant 0 : index
    %1 = vector.load %arg4[%c0_1, %c0_2] : memref<64x64xf32, #tpu.memory_space<vmem>>, vector<64x64xf32>
    %cst = arith.constant dense<0.000000e+00> : vector<2x64xf32>
    %2 = tpu.matmul %0, %1, %cst {dimension_numbers = #tpu.dot_dimension_numbers<[1], [0], [0], [1], [0, 0, 1, 1], [], []>} : vector<2x64xf32>, vector<64x64xf32>, vector<2x64xf32> -> vector<2x64xf32>
    %c0_3 = arith.constant 0 : index
    %c0_4 = arith.constant 0 : index
    %3 = vector.load %arg5[%c0_3, %c0_4] : memref<1x64xf32, #tpu.memory_space<vmem>>, vector<1x64xf32>
    %4 = vector.broadcast %3 : vector<1x64xf32> to vector<2x64xf32>
    %5 = arith.addf %2, %4 : vector<2x64xf32>
    %cst_5 = arith.constant 5.000000e-01 : f32
    %6 = vector.broadcast %cst_5 : f32 to vector<2x64xf32>
    %7 = arith.mulf %6, %5 : vector<2x64xf32>
    %cst_6 = arith.constant 0.707106769 : f32
    %8 = vector.broadcast %cst_6 : f32 to vector<2x64xf32>
    %9 = arith.mulf %5, %8 : vector<2x64xf32>
    %10 = math.absf %9 : vector<2x64xf32>
    %cst_7 = arith.constant 0.327591091 : f32
    %11 = vector.broadcast %cst_7 : f32 to vector<2x64xf32>
    %12 = arith.mulf %11, %10 : vector<2x64xf32>
    %cst_8 = arith.constant 1.000000e+00 : f32
    %13 = vector.broadcast %cst_8 : f32 to vector<2x64xf32>
    %14 = arith.addf %13, %12 : vector<2x64xf32>
    %cst_9 = arith.constant 1.000000e+00 : f32
    %15 = vector.broadcast %cst_9 : f32 to vector<2x64xf32>
    %16 = arith.divf %15, %14 : vector<2x64xf32>
    %cst_10 = arith.constant 1.06140542 : f32
    %17 = vector.broadcast %cst_10 : f32 to vector<2x64xf32>
    %18 = arith.mulf %17, %16 : vector<2x64xf32>
    %cst_11 = arith.constant -1.45315206 : f32
    %19 = vector.broadcast %cst_11 : f32 to vector<2x64xf32>
    %20 = arith.addf %18, %19 : vector<2x64xf32>
    %21 = arith.mulf %20, %16 : vector<2x64xf32>
    %cst_12 = arith.constant 1.42141378 : f32
    %22 = vector.broadcast %cst_12 : f32 to vector<2x64xf32>
    %23 = arith.addf %21, %22 : vector<2x64xf32>
    %24 = arith.mulf %23, %16 : vector<2x64xf32>
    %cst_13 = arith.constant -0.284496725 : f32
    %25 = vector.broadcast %cst_13 : f32 to vector<2x64xf32>
    %26 = arith.addf %24, %25 : vector<2x64xf32>
    %27 = arith.mulf %26, %16 : vector<2x64xf32>
    %cst_14 = arith.constant 0.254829586 : f32
    %28 = vector.broadcast %cst_14 : f32 to vector<2x64xf32>
    %29 = arith.addf %27, %28 : vector<2x64xf32>
    %30 = arith.mulf %29, %16 : vector<2x64xf32>
    %cst_15 = arith.constant 0.000000e+00 : f32
    %31 = vector.broadcast %cst_15 : f32 to vector<2x64xf32>
    %32 = arith.subf %31, %10 : vector<2x64xf32>
    %33 = arith.mulf %32, %10 : vector<2x64xf32>
    %34 = math.exp %33 : vector<2x64xf32>
    %35 = arith.mulf %30, %34 : vector<2x64xf32>
    %cst_16 = arith.constant 1.000000e+00 : f32
    %36 = vector.broadcast %cst_16 : f32 to vector<2x64xf32>
    %37 = arith.subf %36, %35 : vector<2x64xf32>
    %cst_17 = arith.constant 0.000000e+00 : f32
    %38 = vector.broadcast %cst_17 : f32 to vector<2x64xf32>
    %39 = arith.cmpf oge, %9, %38 : vector<2x64xf32>
    %cst_18 = arith.constant 0.000000e+00 : f32
    %40 = vector.broadcast %cst_18 : f32 to vector<2x64xf32>
    %41 = arith.subf %40, %37 : vector<2x64xf32>
    %42 = arith.select %39, %37, %41 : vector<2x64xi1>, vector<2x64xf32>
    %cst_19 = arith.constant 1.000000e+00 : f32
    %43 = vector.broadcast %cst_19 : f32 to vector<2x64xf32>
    %44 = arith.addf %43, %42 : vector<2x64xf32>
    %45 = arith.mulf %7, %44 : vector<2x64xf32>
    %c0_20 = arith.constant 0 : index
    %c0_21 = arith.constant 0 : index
    %46 = vector.load %arg6[%c0_20, %c0_21] : memref<64x64xf32, #tpu.memory_space<vmem>>, vector<64x64xf32>
    %cst_22 = arith.constant dense<0.000000e+00> : vector<2x64xf32>
    %47 = tpu.matmul %45, %46, %cst_22 {dimension_numbers = #tpu.dot_dimension_numbers<[1], [0], [0], [1], [0, 0, 1, 1], [], []>} : vector<2x64xf32>, vector<64x64xf32>, vector<2x64xf32> -> vector<2x64xf32>
    %c0_23 = arith.constant 0 : index
    %c0_24 = arith.constant 0 : index
    %48 = vector.load %arg7[%c0_23, %c0_24] : memref<1x64xf32, #tpu.memory_space<vmem>>, vector<1x64xf32>
    %49 = vector.broadcast %48 : vector<1x64xf32> to vector<2x64xf32>
    %50 = arith.addf %47, %49 : vector<2x64xf32>
    %c0_25 = arith.constant 0 : index
    %c0_26 = arith.constant 0 : index
    %51 = vector.load %arg8[%c0_25, %c0_26] : memref<64x64xf32, #tpu.memory_space<vmem>>, vector<64x64xf32>
    %cst_27 = arith.constant dense<0.000000e+00> : vector<2x64xf32>
    %52 = tpu.matmul %50, %51, %cst_27 {dimension_numbers = #tpu.dot_dimension_numbers<[1], [0], [0], [1], [0, 0, 1, 1], [], []>} : vector<2x64xf32>, vector<64x64xf32>, vector<2x64xf32> -> vector<2x64xf32>
    %c0_28 = arith.constant 0 : index
    %c0_29 = arith.constant 0 : index
    %53 = vector.load %arg1[%c0_28, %c0_29] : memref<2x32xf32, #tpu.memory_space<vmem>>, vector<2x32xf32>
    %c0_30 = arith.constant 0 : index
    %c0_31 = arith.constant 0 : index
    %54 = vector.load %arg9[%c0_30, %c0_31] : memref<32x64xf32, #tpu.memory_space<vmem>>, vector<32x64xf32>
    %cst_32 = arith.constant dense<0.000000e+00> : vector<2x64xf32>
    %55 = tpu.matmul %53, %54, %cst_32 {dimension_numbers = #tpu.dot_dimension_numbers<[1], [0], [0], [1], [0, 0, 1, 1], [], []>} : vector<2x32xf32>, vector<32x64xf32>, vector<2x64xf32> -> vector<2x64xf32>
    %56 = arith.addf %52, %55 : vector<2x64xf32>
    %c0_33 = arith.constant 0 : index
    %c0_34 = arith.constant 0 : index
    %57 = vector.load %arg10[%c0_33, %c0_34] : memref<1x64xf32, #tpu.memory_space<vmem>>, vector<1x64xf32>
    %58 = vector.broadcast %57 : vector<1x64xf32> to vector<2x64xf32>
    %59 = arith.addf %56, %58 : vector<2x64xf32>
    %cst_35 = arith.constant 5.000000e-01 : f32
    %60 = vector.broadcast %cst_35 : f32 to vector<2x64xf32>
    %61 = arith.mulf %60, %59 : vector<2x64xf32>
    %62 = math.tanh %61 : vector<2x64xf32>
    %cst_36 = arith.constant 1.000000e+00 : f32
    %63 = vector.broadcast %cst_36 : f32 to vector<2x64xf32>
    %64 = arith.addf %62, %63 : vector<2x64xf32>
    %cst_37 = arith.constant 5.000000e-01 : f32
    %65 = vector.broadcast %cst_37 : f32 to vector<2x64xf32>
    %66 = arith.mulf %65, %64 : vector<2x64xf32>
    %67 = arith.mulf %59, %66 : vector<2x64xf32>
    %68 = vector.shape_cast %67 : vector<2x64xf32> to vector<2x1x64xf32>
    %69 = vector.shape_cast %68 : vector<2x1x64xf32> to vector<2x1x64xf32>
    %70 = vector.broadcast %69 : vector<2x1x64xf32> to vector<2x8x64xf32>
    %71 = vector.shape_cast %70 : vector<2x8x64xf32> to vector<16x64xf32>
    %c0_38 = arith.constant 0 : index
    %c0_39 = arith.constant 0 : index
    %72 = vector.load %arg2[%c0_38, %c0_39] : memref<16x8xf32, #tpu.memory_space<vmem>>, vector<16x8xf32>
    %c0_40 = arith.constant 0 : index
    %c0_41 = arith.constant 0 : index
    %73 = vector.load %arg11[%c0_40, %c0_41] : memref<8x64xf32, #tpu.memory_space<vmem>>, vector<8x64xf32>
    %cst_42 = arith.constant dense<0.000000e+00> : vector<16x64xf32>
    %74 = tpu.matmul %72, %73, %cst_42 {dimension_numbers = #tpu.dot_dimension_numbers<[1], [0], [0], [1], [0, 0, 1, 1], [], []>} : vector<16x8xf32>, vector<8x64xf32>, vector<16x64xf32> -> vector<16x64xf32>
    %c0_43 = arith.constant 0 : index
    %c0_44 = arith.constant 0 : index
    %75 = vector.load %arg12[%c0_43, %c0_44] : memref<1x64xf32, #tpu.memory_space<vmem>>, vector<1x64xf32>
    %76 = vector.broadcast %75 : vector<1x64xf32> to vector<16x64xf32>
    %77 = arith.addf %74, %76 : vector<16x64xf32>
    %c0_45 = arith.constant 0 : index
    %c0_46 = arith.constant 0 : index
    %78 = vector.load %arg3[%c0_45, %c0_46] : memref<16x64xf32, #tpu.memory_space<vmem>>, vector<16x64xf32>
    %79 = arith.addf %77, %78 : vector<16x64xf32>
    %c0_47 = arith.constant 0 : index
    %c0_48 = arith.constant 0 : index
    %80 = vector.load %arg13[%c0_47, %c0_48] : memref<64x384xf32, #tpu.memory_space<vmem>>, vector<64x384xf32>
    %cst_49 = arith.constant dense<0.000000e+00> : vector<16x384xf32>
    %81 = tpu.matmul %71, %80, %cst_49 {dimension_numbers = #tpu.dot_dimension_numbers<[1], [0], [0], [1], [0, 0, 1, 1], [], []>} : vector<16x64xf32>, vector<64x384xf32>, vector<16x384xf32> -> vector<16x384xf32>
    %c0_50 = arith.constant 0 : index
    %c0_51 = arith.constant 0 : index
    %82 = vector.load %arg14[%c0_50, %c0_51] : memref<1x384xf32, #tpu.memory_space<vmem>>, vector<1x384xf32>
    %83 = vector.broadcast %82 : vector<1x384xf32> to vector<16x384xf32>
    %84 = arith.addf %81, %83 : vector<16x384xf32>
    %85 = vector.extract_strided_slice %84 {offsets = [0, 0], sizes = [16, 64], strides = [1, 1]} : vector<16x384xf32> to vector<16x64xf32>
    %86 = vector.extract_strided_slice %84 {offsets = [0, 64], sizes = [16, 64], strides = [1, 1]} : vector<16x384xf32> to vector<16x64xf32>
    %87 = vector.extract_strided_slice %84 {offsets = [0, 128], sizes = [16, 64], strides = [1, 1]} : vector<16x384xf32> to vector<16x64xf32>
    %88 = vector.extract_strided_slice %84 {offsets = [0, 192], sizes = [16, 64], strides = [1, 1]} : vector<16x384xf32> to vector<16x64xf32>
    %89 = vector.extract_strided_slice %84 {offsets = [0, 256], sizes = [16, 64], strides = [1, 1]} : vector<16x384xf32> to vector<16x64xf32>
    %90 = vector.extract_strided_slice %84 {offsets = [0, 320], sizes = [16, 64], strides = [1, 1]} : vector<16x384xf32> to vector<16x64xf32>
    %cst_52 = arith.constant dense<0.000000e+00> : vector<16xf32>
    %91 = vector.multi_reduction <add>, %79, %cst_52 [1] : vector<16x64xf32> to vector<16xf32>
    %92 = vector.shape_cast %91 : vector<16xf32> to vector<16x1xf32>
    %cst_53 = arith.constant 6.400000e+01 : f32
    %93 = vector.broadcast %cst_53 : f32 to vector<16x1xf32>
    %94 = arith.divf %92, %93 : vector<16x1xf32>
    %95 = vector.broadcast %94 : vector<16x1xf32> to vector<16x64xf32>
    %96 = arith.subf %79, %95 : vector<16x64xf32>
    %97 = arith.mulf %96, %96 : vector<16x64xf32>
    %cst_54 = arith.constant dense<0.000000e+00> : vector<16xf32>
    %98 = vector.multi_reduction <add>, %97, %cst_54 [1] : vector<16x64xf32> to vector<16xf32>
    %99 = vector.shape_cast %98 : vector<16xf32> to vector<16x1xf32>
    %cst_55 = arith.constant 6.400000e+01 : f32
    %100 = vector.broadcast %cst_55 : f32 to vector<16x1xf32>
    %101 = arith.divf %99, %100 : vector<16x1xf32>
    %102 = vector.broadcast %94 : vector<16x1xf32> to vector<16x64xf32>
    %103 = arith.subf %79, %102 : vector<16x64xf32>
    %cst_56 = arith.constant 9.99999997E-7 : f32
    %104 = vector.broadcast %cst_56 : f32 to vector<16x1xf32>
    %105 = arith.addf %101, %104 : vector<16x1xf32>
    %106 = math.rsqrt %105 : vector<16x1xf32>
    %107 = vector.broadcast %106 : vector<16x1xf32> to vector<16x64xf32>
    %108 = arith.mulf %103, %107 : vector<16x64xf32>
    %cst_57 = arith.constant 1.000000e+00 : f32
    %109 = vector.broadcast %cst_57 : f32 to vector<16x64xf32>
    %110 = arith.addf %109, %86 : vector<16x64xf32>
    %111 = arith.mulf %108, %110 : vector<16x64xf32>
    %112 = arith.addf %111, %85 : vector<16x64xf32>
    %c0_58 = arith.constant 0 : index
    %c0_59 = arith.constant 0 : index
    %113 = vector.load %arg15[%c0_58, %c0_59] : memref<64x192xf32, #tpu.memory_space<vmem>>, vector<64x192xf32>
    %cst_60 = arith.constant dense<0.000000e+00> : vector<16x192xf32>
    %114 = tpu.matmul %112, %113, %cst_60 {dimension_numbers = #tpu.dot_dimension_numbers<[1], [0], [0], [1], [0, 0, 1, 1], [], []>} : vector<16x64xf32>, vector<64x192xf32>, vector<16x192xf32> -> vector<16x192xf32>
    %c0_61 = arith.constant 0 : index
    %c0_62 = arith.constant 0 : index
    %115 = vector.load %arg16[%c0_61, %c0_62] : memref<1x192xf32, #tpu.memory_space<vmem>>, vector<1x192xf32>
    %116 = vector.broadcast %115 : vector<1x192xf32> to vector<16x192xf32>
    %117 = arith.addf %114, %116 : vector<16x192xf32>
    %118 = vector.extract_strided_slice %117 {offsets = [0, 0], sizes = [16, 64], strides = [1, 1]} : vector<16x192xf32> to vector<16x64xf32>
    %119 = vector.extract_strided_slice %117 {offsets = [0, 64], sizes = [16, 64], strides = [1, 1]} : vector<16x192xf32> to vector<16x64xf32>
    %120 = vector.extract_strided_slice %117 {offsets = [0, 128], sizes = [16, 64], strides = [1, 1]} : vector<16x192xf32> to vector<16x64xf32>
    %121 = vector.extract_strided_slice %118 {offsets = [0, 0], sizes = [16, 16], strides = [1, 1]} : vector<16x64xf32> to vector<16x16xf32>
    %122 = vector.shape_cast %121 : vector<16x16xf32> to vector<2x8x16xf32>
    %123 = vector.extract_strided_slice %119 {offsets = [0, 0], sizes = [16, 16], strides = [1, 1]} : vector<16x64xf32> to vector<16x16xf32>
    %124 = vector.shape_cast %123 : vector<16x16xf32> to vector<2x8x16xf32>
    %125 = vector.extract_strided_slice %120 {offsets = [0, 0], sizes = [16, 16], strides = [1, 1]} : vector<16x64xf32> to vector<16x16xf32>
    %126 = vector.shape_cast %125 : vector<16x16xf32> to vector<2x8x16xf32>
    "tpu.trace_start"() <{level = 10 : i32, message = "bqd,bkd->bqk"}> : () -> ()
    %cst_63 = arith.constant dense<0.000000e+00> : vector<2x8x8xf32>
    %127 = tpu.matmul %122, %124, %cst_63 {dimension_numbers = #tpu.dot_dimension_numbers<[2], [2], [1], [1], [0, 0, 0, 1, 1, 1], [0], [0]>} : vector<2x8x16xf32>, vector<2x8x16xf32>, vector<2x8x8xf32> -> vector<2x8x8xf32>
    "tpu.trace_stop"() : () -> ()
    %cst_64 = arith.constant 2.500000e-01 : f32
    %128 = vector.broadcast %cst_64 : f32 to vector<2x8x8xf32>
    %129 = arith.mulf %127, %128 : vector<2x8x8xf32>
    %cst_65 = arith.constant dense<0xFF800000> : vector<2x8xf32>
    %130 = vector.multi_reduction <maximumf>, %129, %cst_65 [2] : vector<2x8x8xf32> to vector<2x8xf32>
    %131 = vector.shape_cast %130 : vector<2x8xf32> to vector<2x8x1xf32>
    %132 = vector.broadcast %131 : vector<2x8x1xf32> to vector<2x8x8xf32>
    %133 = arith.subf %129, %132 : vector<2x8x8xf32>
    %134 = math.exp %133 : vector<2x8x8xf32>
    %cst_66 = arith.constant dense<0.000000e+00> : vector<2x8xf32>
    %135 = vector.multi_reduction <add>, %134, %cst_66 [2] : vector<2x8x8xf32> to vector<2x8xf32>
    %136 = vector.shape_cast %135 : vector<2x8xf32> to vector<2x8x1xf32>
    %137 = tpu.reciprocal %136 {approx = true} : vector<2x8x1xf32> -> vector<2x8x1xf32>
    %138 = vector.broadcast %137 : vector<2x8x1xf32> to vector<2x8x8xf32>
    %139 = arith.mulf %134, %138 : vector<2x8x8xf32>
    "tpu.trace_start"() <{level = 10 : i32, message = "bqk,bkd->bqd"}> : () -> ()
    %cst_67 = arith.constant dense<0.000000e+00> : vector<2x8x16xf32>
    %140 = tpu.matmul %139, %126, %cst_67 {dimension_numbers = #tpu.dot_dimension_numbers<[2], [1], [1], [2], [0, 0, 0, 1, 1, 2], [0], [0]>} : vector<2x8x8xf32>, vector<2x8x16xf32>, vector<2x8x16xf32> -> vector<2x8x16xf32>
    "tpu.trace_stop"() : () -> ()
    %141 = vector.shape_cast %140 : vector<2x8x16xf32> to vector<16x16xf32>
    %142 = vector.extract_strided_slice %118 {offsets = [0, 16], sizes = [16, 16], strides = [1, 1]} : vector<16x64xf32> to vector<16x16xf32>
    %143 = vector.shape_cast %142 : vector<16x16xf32> to vector<2x8x16xf32>
    %144 = vector.extract_strided_slice %119 {offsets = [0, 16], sizes = [16, 16], strides = [1, 1]} : vector<16x64xf32> to vector<16x16xf32>
    %145 = vector.shape_cast %144 : vector<16x16xf32> to vector<2x8x16xf32>
    %146 = vector.extract_strided_slice %120 {offsets = [0, 16], sizes = [16, 16], strides = [1, 1]} : vector<16x64xf32> to vector<16x16xf32>
    %147 = vector.shape_cast %146 : vector<16x16xf32> to vector<2x8x16xf32>
    "tpu.trace_start"() <{level = 10 : i32, message = "bqd,bkd->bqk"}> : () -> ()
    %cst_68 = arith.constant dense<0.000000e+00> : vector<2x8x8xf32>
    %148 = tpu.matmul %143, %145, %cst_68 {dimension_numbers = #tpu.dot_dimension_numbers<[2], [2], [1], [1], [0, 0, 0, 1, 1, 1], [0], [0]>} : vector<2x8x16xf32>, vector<2x8x16xf32>, vector<2x8x8xf32> -> vector<2x8x8xf32>
    "tpu.trace_stop"() : () -> ()
    %cst_69 = arith.constant 2.500000e-01 : f32
    %149 = vector.broadcast %cst_69 : f32 to vector<2x8x8xf32>
    %150 = arith.mulf %148, %149 : vector<2x8x8xf32>
    %cst_70 = arith.constant dense<0xFF800000> : vector<2x8xf32>
    %151 = vector.multi_reduction <maximumf>, %150, %cst_70 [2] : vector<2x8x8xf32> to vector<2x8xf32>
    %152 = vector.shape_cast %151 : vector<2x8xf32> to vector<2x8x1xf32>
    %153 = vector.broadcast %152 : vector<2x8x1xf32> to vector<2x8x8xf32>
    %154 = arith.subf %150, %153 : vector<2x8x8xf32>
    %155 = math.exp %154 : vector<2x8x8xf32>
    %cst_71 = arith.constant dense<0.000000e+00> : vector<2x8xf32>
    %156 = vector.multi_reduction <add>, %155, %cst_71 [2] : vector<2x8x8xf32> to vector<2x8xf32>
    %157 = vector.shape_cast %156 : vector<2x8xf32> to vector<2x8x1xf32>
    %158 = tpu.reciprocal %157 {approx = true} : vector<2x8x1xf32> -> vector<2x8x1xf32>
    %159 = vector.broadcast %158 : vector<2x8x1xf32> to vector<2x8x8xf32>
    %160 = arith.mulf %155, %159 : vector<2x8x8xf32>
    "tpu.trace_start"() <{level = 10 : i32, message = "bqk,bkd->bqd"}> : () -> ()
    %cst_72 = arith.constant dense<0.000000e+00> : vector<2x8x16xf32>
    %161 = tpu.matmul %160, %147, %cst_72 {dimension_numbers = #tpu.dot_dimension_numbers<[2], [1], [1], [2], [0, 0, 0, 1, 1, 2], [0], [0]>} : vector<2x8x8xf32>, vector<2x8x16xf32>, vector<2x8x16xf32> -> vector<2x8x16xf32>
    "tpu.trace_stop"() : () -> ()
    %162 = vector.shape_cast %161 : vector<2x8x16xf32> to vector<16x16xf32>
    %163 = vector.extract_strided_slice %118 {offsets = [0, 32], sizes = [16, 16], strides = [1, 1]} : vector<16x64xf32> to vector<16x16xf32>
    %164 = vector.shape_cast %163 : vector<16x16xf32> to vector<2x8x16xf32>
    %165 = vector.extract_strided_slice %119 {offsets = [0, 32], sizes = [16, 16], strides = [1, 1]} : vector<16x64xf32> to vector<16x16xf32>
    %166 = vector.shape_cast %165 : vector<16x16xf32> to vector<2x8x16xf32>
    %167 = vector.extract_strided_slice %120 {offsets = [0, 32], sizes = [16, 16], strides = [1, 1]} : vector<16x64xf32> to vector<16x16xf32>
    %168 = vector.shape_cast %167 : vector<16x16xf32> to vector<2x8x16xf32>
    "tpu.trace_start"() <{level = 10 : i32, message = "bqd,bkd->bqk"}> : () -> ()
    %cst_73 = arith.constant dense<0.000000e+00> : vector<2x8x8xf32>
    %169 = tpu.matmul %164, %166, %cst_73 {dimension_numbers = #tpu.dot_dimension_numbers<[2], [2], [1], [1], [0, 0, 0, 1, 1, 1], [0], [0]>} : vector<2x8x16xf32>, vector<2x8x16xf32>, vector<2x8x8xf32> -> vector<2x8x8xf32>
    "tpu.trace_stop"() : () -> ()
    %cst_74 = arith.constant 2.500000e-01 : f32
    %170 = vector.broadcast %cst_74 : f32 to vector<2x8x8xf32>
    %171 = arith.mulf %169, %170 : vector<2x8x8xf32>
    %cst_75 = arith.constant dense<0xFF800000> : vector<2x8xf32>
    %172 = vector.multi_reduction <maximumf>, %171, %cst_75 [2] : vector<2x8x8xf32> to vector<2x8xf32>
    %173 = vector.shape_cast %172 : vector<2x8xf32> to vector<2x8x1xf32>
    %174 = vector.broadcast %173 : vector<2x8x1xf32> to vector<2x8x8xf32>
    %175 = arith.subf %171, %174 : vector<2x8x8xf32>
    %176 = math.exp %175 : vector<2x8x8xf32>
    %cst_76 = arith.constant dense<0.000000e+00> : vector<2x8xf32>
    %177 = vector.multi_reduction <add>, %176, %cst_76 [2] : vector<2x8x8xf32> to vector<2x8xf32>
    %178 = vector.shape_cast %177 : vector<2x8xf32> to vector<2x8x1xf32>
    %179 = tpu.reciprocal %178 {approx = true} : vector<2x8x1xf32> -> vector<2x8x1xf32>
    %180 = vector.broadcast %179 : vector<2x8x1xf32> to vector<2x8x8xf32>
    %181 = arith.mulf %176, %180 : vector<2x8x8xf32>
    "tpu.trace_start"() <{level = 10 : i32, message = "bqk,bkd->bqd"}> : () -> ()
    %cst_77 = arith.constant dense<0.000000e+00> : vector<2x8x16xf32>
    %182 = tpu.matmul %181, %168, %cst_77 {dimension_numbers = #tpu.dot_dimension_numbers<[2], [1], [1], [2], [0, 0, 0, 1, 1, 2], [0], [0]>} : vector<2x8x8xf32>, vector<2x8x16xf32>, vector<2x8x16xf32> -> vector<2x8x16xf32>
    "tpu.trace_stop"() : () -> ()
    %183 = vector.shape_cast %182 : vector<2x8x16xf32> to vector<16x16xf32>
    %184 = vector.extract_strided_slice %118 {offsets = [0, 48], sizes = [16, 16], strides = [1, 1]} : vector<16x64xf32> to vector<16x16xf32>
    %185 = vector.shape_cast %184 : vector<16x16xf32> to vector<2x8x16xf32>
    %186 = vector.extract_strided_slice %119 {offsets = [0, 48], sizes = [16, 16], strides = [1, 1]} : vector<16x64xf32> to vector<16x16xf32>
    %187 = vector.shape_cast %186 : vector<16x16xf32> to vector<2x8x16xf32>
    %188 = vector.extract_strided_slice %120 {offsets = [0, 48], sizes = [16, 16], strides = [1, 1]} : vector<16x64xf32> to vector<16x16xf32>
    %189 = vector.shape_cast %188 : vector<16x16xf32> to vector<2x8x16xf32>
    "tpu.trace_start"() <{level = 10 : i32, message = "bqd,bkd->bqk"}> : () -> ()
    %cst_78 = arith.constant dense<0.000000e+00> : vector<2x8x8xf32>
    %190 = tpu.matmul %185, %187, %cst_78 {dimension_numbers = #tpu.dot_dimension_numbers<[2], [2], [1], [1], [0, 0, 0, 1, 1, 1], [0], [0]>} : vector<2x8x16xf32>, vector<2x8x16xf32>, vector<2x8x8xf32> -> vector<2x8x8xf32>
    "tpu.trace_stop"() : () -> ()
    %cst_79 = arith.constant 2.500000e-01 : f32
    %191 = vector.broadcast %cst_79 : f32 to vector<2x8x8xf32>
    %192 = arith.mulf %190, %191 : vector<2x8x8xf32>
    %cst_80 = arith.constant dense<0xFF800000> : vector<2x8xf32>
    %193 = vector.multi_reduction <maximumf>, %192, %cst_80 [2] : vector<2x8x8xf32> to vector<2x8xf32>
    %194 = vector.shape_cast %193 : vector<2x8xf32> to vector<2x8x1xf32>
    %195 = vector.broadcast %194 : vector<2x8x1xf32> to vector<2x8x8xf32>
    %196 = arith.subf %192, %195 : vector<2x8x8xf32>
    %197 = math.exp %196 : vector<2x8x8xf32>
    %cst_81 = arith.constant dense<0.000000e+00> : vector<2x8xf32>
    %198 = vector.multi_reduction <add>, %197, %cst_81 [2] : vector<2x8x8xf32> to vector<2x8xf32>
    %199 = vector.shape_cast %198 : vector<2x8xf32> to vector<2x8x1xf32>
    %200 = tpu.reciprocal %199 {approx = true} : vector<2x8x1xf32> -> vector<2x8x1xf32>
    %201 = vector.broadcast %200 : vector<2x8x1xf32> to vector<2x8x8xf32>
    %202 = arith.mulf %197, %201 : vector<2x8x8xf32>
    "tpu.trace_start"() <{level = 10 : i32, message = "bqk,bkd->bqd"}> : () -> ()
    %cst_82 = arith.constant dense<0.000000e+00> : vector<2x8x16xf32>
    %203 = tpu.matmul %202, %189, %cst_82 {dimension_numbers = #tpu.dot_dimension_numbers<[2], [1], [1], [2], [0, 0, 0, 1, 1, 2], [0], [0]>} : vector<2x8x8xf32>, vector<2x8x16xf32>, vector<2x8x16xf32> -> vector<2x8x16xf32>
    "tpu.trace_stop"() : () -> ()
    %204 = vector.shape_cast %203 : vector<2x8x16xf32> to vector<16x16xf32>
    %205 = tpu.concatenate %141, %162, %183, %204 in 1 : vector<16x16xf32>, vector<16x16xf32>, vector<16x16xf32>, vector<16x16xf32> -> vector<16x64xf32>
    %c0_83 = arith.constant 0 : index
    %c0_84 = arith.constant 0 : index
    %206 = vector.load %arg17[%c0_83, %c0_84] : memref<64x64xf32, #tpu.memory_space<vmem>>, vector<64x64xf32>
    %cst_85 = arith.constant dense<0.000000e+00> : vector<16x64xf32>
    %207 = tpu.matmul %205, %206, %cst_85 {dimension_numbers = #tpu.dot_dimension_numbers<[1], [0], [0], [1], [0, 0, 1, 1], [], []>} : vector<16x64xf32>, vector<64x64xf32>, vector<16x64xf32> -> vector<16x64xf32>
    %c0_86 = arith.constant 0 : index
    %c0_87 = arith.constant 0 : index
    %208 = vector.load %arg18[%c0_86, %c0_87] : memref<1x64xf32, #tpu.memory_space<vmem>>, vector<1x64xf32>
    %209 = vector.broadcast %208 : vector<1x64xf32> to vector<16x64xf32>
    %210 = arith.addf %207, %209 : vector<16x64xf32>
    %211 = arith.mulf %87, %210 : vector<16x64xf32>
    %212 = arith.addf %79, %211 : vector<16x64xf32>
    %cst_88 = arith.constant dense<0.000000e+00> : vector<16xf32>
    %213 = vector.multi_reduction <add>, %212, %cst_88 [1] : vector<16x64xf32> to vector<16xf32>
    %214 = vector.shape_cast %213 : vector<16xf32> to vector<16x1xf32>
    %cst_89 = arith.constant 6.400000e+01 : f32
    %215 = vector.broadcast %cst_89 : f32 to vector<16x1xf32>
    %216 = arith.divf %214, %215 : vector<16x1xf32>
    %217 = vector.broadcast %216 : vector<16x1xf32> to vector<16x64xf32>
    %218 = arith.subf %212, %217 : vector<16x64xf32>
    %219 = arith.mulf %218, %218 : vector<16x64xf32>
    %cst_90 = arith.constant dense<0.000000e+00> : vector<16xf32>
    %220 = vector.multi_reduction <add>, %219, %cst_90 [1] : vector<16x64xf32> to vector<16xf32>
    %221 = vector.shape_cast %220 : vector<16xf32> to vector<16x1xf32>
    %cst_91 = arith.constant 6.400000e+01 : f32
    %222 = vector.broadcast %cst_91 : f32 to vector<16x1xf32>
    %223 = arith.divf %221, %222 : vector<16x1xf32>
    %224 = vector.broadcast %216 : vector<16x1xf32> to vector<16x64xf32>
    %225 = arith.subf %212, %224 : vector<16x64xf32>
    %cst_92 = arith.constant 9.99999997E-7 : f32
    %226 = vector.broadcast %cst_92 : f32 to vector<16x1xf32>
    %227 = arith.addf %223, %226 : vector<16x1xf32>
    %228 = math.rsqrt %227 : vector<16x1xf32>
    %229 = vector.broadcast %228 : vector<16x1xf32> to vector<16x64xf32>
    %230 = arith.mulf %225, %229 : vector<16x64xf32>
    %cst_93 = arith.constant 1.000000e+00 : f32
    %231 = vector.broadcast %cst_93 : f32 to vector<16x64xf32>
    %232 = arith.addf %231, %89 : vector<16x64xf32>
    %233 = arith.mulf %230, %232 : vector<16x64xf32>
    %234 = arith.addf %233, %88 : vector<16x64xf32>
    %c0_94 = arith.constant 0 : index
    %c0_95 = arith.constant 0 : index
    %235 = vector.load %arg19[%c0_94, %c0_95] : memref<64x256xf32, #tpu.memory_space<vmem>>, vector<64x256xf32>
    %cst_96 = arith.constant dense<0.000000e+00> : vector<16x256xf32>
    %236 = tpu.matmul %234, %235, %cst_96 {dimension_numbers = #tpu.dot_dimension_numbers<[1], [0], [0], [1], [0, 0, 1, 1], [], []>} : vector<16x64xf32>, vector<64x256xf32>, vector<16x256xf32> -> vector<16x256xf32>
    %c0_97 = arith.constant 0 : index
    %c0_98 = arith.constant 0 : index
    %237 = vector.load %arg20[%c0_97, %c0_98] : memref<1x256xf32, #tpu.memory_space<vmem>>, vector<1x256xf32>
    %238 = vector.broadcast %237 : vector<1x256xf32> to vector<16x256xf32>
    %239 = arith.addf %236, %238 : vector<16x256xf32>
    %cst_99 = arith.constant 5.000000e-01 : f32
    %240 = vector.broadcast %cst_99 : f32 to vector<16x256xf32>
    %241 = arith.mulf %240, %239 : vector<16x256xf32>
    %cst_100 = arith.constant 0.707106769 : f32
    %242 = vector.broadcast %cst_100 : f32 to vector<16x256xf32>
    %243 = arith.mulf %239, %242 : vector<16x256xf32>
    %244 = math.absf %243 : vector<16x256xf32>
    %cst_101 = arith.constant 0.327591091 : f32
    %245 = vector.broadcast %cst_101 : f32 to vector<16x256xf32>
    %246 = arith.mulf %245, %244 : vector<16x256xf32>
    %cst_102 = arith.constant 1.000000e+00 : f32
    %247 = vector.broadcast %cst_102 : f32 to vector<16x256xf32>
    %248 = arith.addf %247, %246 : vector<16x256xf32>
    %cst_103 = arith.constant 1.000000e+00 : f32
    %249 = vector.broadcast %cst_103 : f32 to vector<16x256xf32>
    %250 = arith.divf %249, %248 : vector<16x256xf32>
    %cst_104 = arith.constant 1.06140542 : f32
    %251 = vector.broadcast %cst_104 : f32 to vector<16x256xf32>
    %252 = arith.mulf %251, %250 : vector<16x256xf32>
    %cst_105 = arith.constant -1.45315206 : f32
    %253 = vector.broadcast %cst_105 : f32 to vector<16x256xf32>
    %254 = arith.addf %252, %253 : vector<16x256xf32>
    %255 = arith.mulf %254, %250 : vector<16x256xf32>
    %cst_106 = arith.constant 1.42141378 : f32
    %256 = vector.broadcast %cst_106 : f32 to vector<16x256xf32>
    %257 = arith.addf %255, %256 : vector<16x256xf32>
    %258 = arith.mulf %257, %250 : vector<16x256xf32>
    %cst_107 = arith.constant -0.284496725 : f32
    %259 = vector.broadcast %cst_107 : f32 to vector<16x256xf32>
    %260 = arith.addf %258, %259 : vector<16x256xf32>
    %261 = arith.mulf %260, %250 : vector<16x256xf32>
    %cst_108 = arith.constant 0.254829586 : f32
    %262 = vector.broadcast %cst_108 : f32 to vector<16x256xf32>
    %263 = arith.addf %261, %262 : vector<16x256xf32>
    %264 = arith.mulf %263, %250 : vector<16x256xf32>
    %cst_109 = arith.constant 0.000000e+00 : f32
    %265 = vector.broadcast %cst_109 : f32 to vector<16x256xf32>
    %266 = arith.subf %265, %244 : vector<16x256xf32>
    %267 = arith.mulf %266, %244 : vector<16x256xf32>
    %268 = math.exp %267 : vector<16x256xf32>
    %269 = arith.mulf %264, %268 : vector<16x256xf32>
    %cst_110 = arith.constant 1.000000e+00 : f32
    %270 = vector.broadcast %cst_110 : f32 to vector<16x256xf32>
    %271 = arith.subf %270, %269 : vector<16x256xf32>
    %cst_111 = arith.constant 0.000000e+00 : f32
    %272 = vector.broadcast %cst_111 : f32 to vector<16x256xf32>
    %273 = arith.cmpf oge, %243, %272 : vector<16x256xf32>
    %cst_112 = arith.constant 0.000000e+00 : f32
    %274 = vector.broadcast %cst_112 : f32 to vector<16x256xf32>
    %275 = arith.subf %274, %271 : vector<16x256xf32>
    %276 = arith.select %273, %271, %275 : vector<16x256xi1>, vector<16x256xf32>
    %cst_113 = arith.constant 1.000000e+00 : f32
    %277 = vector.broadcast %cst_113 : f32 to vector<16x256xf32>
    %278 = arith.addf %277, %276 : vector<16x256xf32>
    %279 = arith.mulf %241, %278 : vector<16x256xf32>
    %c0_114 = arith.constant 0 : index
    %c0_115 = arith.constant 0 : index
    %280 = vector.load %arg21[%c0_114, %c0_115] : memref<256x64xf32, #tpu.memory_space<vmem>>, vector<256x64xf32>
    %cst_116 = arith.constant dense<0.000000e+00> : vector<16x64xf32>
    %281 = tpu.matmul %279, %280, %cst_116 {dimension_numbers = #tpu.dot_dimension_numbers<[1], [0], [0], [1], [0, 0, 1, 1], [], []>} : vector<16x256xf32>, vector<256x64xf32>, vector<16x64xf32> -> vector<16x64xf32>
    %c0_117 = arith.constant 0 : index
    %c0_118 = arith.constant 0 : index
    %282 = vector.load %arg22[%c0_117, %c0_118] : memref<1x64xf32, #tpu.memory_space<vmem>>, vector<1x64xf32>
    %283 = vector.broadcast %282 : vector<1x64xf32> to vector<16x64xf32>
    %284 = arith.addf %281, %283 : vector<16x64xf32>
    %285 = arith.mulf %90, %284 : vector<16x64xf32>
    %286 = arith.addf %212, %285 : vector<16x64xf32>
    %c0_119 = arith.constant 0 : index
    %c0_120 = arith.constant 0 : index
    %287 = vector.load %arg23[%c0_119, %c0_120] : memref<64x384xf32, #tpu.memory_space<vmem>>, vector<64x384xf32>
    %cst_121 = arith.constant dense<0.000000e+00> : vector<16x384xf32>
    %288 = tpu.matmul %71, %287, %cst_121 {dimension_numbers = #tpu.dot_dimension_numbers<[1], [0], [0], [1], [0, 0, 1, 1], [], []>} : vector<16x64xf32>, vector<64x384xf32>, vector<16x384xf32> -> vector<16x384xf32>
    %c0_122 = arith.constant 0 : index
    %c0_123 = arith.constant 0 : index
    %289 = vector.load %arg24[%c0_122, %c0_123] : memref<1x384xf32, #tpu.memory_space<vmem>>, vector<1x384xf32>
    %290 = vector.broadcast %289 : vector<1x384xf32> to vector<16x384xf32>
    %291 = arith.addf %288, %290 : vector<16x384xf32>
    %292 = vector.extract_strided_slice %291 {offsets = [0, 0], sizes = [16, 64], strides = [1, 1]} : vector<16x384xf32> to vector<16x64xf32>
    %293 = vector.extract_strided_slice %291 {offsets = [0, 64], sizes = [16, 64], strides = [1, 1]} : vector<16x384xf32> to vector<16x64xf32>
    %294 = vector.extract_strided_slice %291 {offsets = [0, 128], sizes = [16, 64], strides = [1, 1]} : vector<16x384xf32> to vector<16x64xf32>
    %295 = vector.extract_strided_slice %291 {offsets = [0, 192], sizes = [16, 64], strides = [1, 1]} : vector<16x384xf32> to vector<16x64xf32>
    %296 = vector.extract_strided_slice %291 {offsets = [0, 256], sizes = [16, 64], strides = [1, 1]} : vector<16x384xf32> to vector<16x64xf32>
    %297 = vector.extract_strided_slice %291 {offsets = [0, 320], sizes = [16, 64], strides = [1, 1]} : vector<16x384xf32> to vector<16x64xf32>
    %cst_124 = arith.constant dense<0.000000e+00> : vector<16xf32>
    %298 = vector.multi_reduction <add>, %286, %cst_124 [1] : vector<16x64xf32> to vector<16xf32>
    %299 = vector.shape_cast %298 : vector<16xf32> to vector<16x1xf32>
    %cst_125 = arith.constant 6.400000e+01 : f32
    %300 = vector.broadcast %cst_125 : f32 to vector<16x1xf32>
    %301 = arith.divf %299, %300 : vector<16x1xf32>
    %302 = vector.broadcast %301 : vector<16x1xf32> to vector<16x64xf32>
    %303 = arith.subf %286, %302 : vector<16x64xf32>
    %304 = arith.mulf %303, %303 : vector<16x64xf32>
    %cst_126 = arith.constant dense<0.000000e+00> : vector<16xf32>
    %305 = vector.multi_reduction <add>, %304, %cst_126 [1] : vector<16x64xf32> to vector<16xf32>
    %306 = vector.shape_cast %305 : vector<16xf32> to vector<16x1xf32>
    %cst_127 = arith.constant 6.400000e+01 : f32
    %307 = vector.broadcast %cst_127 : f32 to vector<16x1xf32>
    %308 = arith.divf %306, %307 : vector<16x1xf32>
    %309 = vector.broadcast %301 : vector<16x1xf32> to vector<16x64xf32>
    %310 = arith.subf %286, %309 : vector<16x64xf32>
    %cst_128 = arith.constant 9.99999997E-7 : f32
    %311 = vector.broadcast %cst_128 : f32 to vector<16x1xf32>
    %312 = arith.addf %308, %311 : vector<16x1xf32>
    %313 = math.rsqrt %312 : vector<16x1xf32>
    %314 = vector.broadcast %313 : vector<16x1xf32> to vector<16x64xf32>
    %315 = arith.mulf %310, %314 : vector<16x64xf32>
    %cst_129 = arith.constant 1.000000e+00 : f32
    %316 = vector.broadcast %cst_129 : f32 to vector<16x64xf32>
    %317 = arith.addf %316, %293 : vector<16x64xf32>
    %318 = arith.mulf %315, %317 : vector<16x64xf32>
    %319 = arith.addf %318, %292 : vector<16x64xf32>
    %c0_130 = arith.constant 0 : index
    %c0_131 = arith.constant 0 : index
    %320 = vector.load %arg25[%c0_130, %c0_131] : memref<64x192xf32, #tpu.memory_space<vmem>>, vector<64x192xf32>
    %cst_132 = arith.constant dense<0.000000e+00> : vector<16x192xf32>
    %321 = tpu.matmul %319, %320, %cst_132 {dimension_numbers = #tpu.dot_dimension_numbers<[1], [0], [0], [1], [0, 0, 1, 1], [], []>} : vector<16x64xf32>, vector<64x192xf32>, vector<16x192xf32> -> vector<16x192xf32>
    %c0_133 = arith.constant 0 : index
    %c0_134 = arith.constant 0 : index
    %322 = vector.load %arg26[%c0_133, %c0_134] : memref<1x192xf32, #tpu.memory_space<vmem>>, vector<1x192xf32>
    %323 = vector.broadcast %322 : vector<1x192xf32> to vector<16x192xf32>
    %324 = arith.addf %321, %323 : vector<16x192xf32>
    %325 = vector.extract_strided_slice %324 {offsets = [0, 0], sizes = [16, 64], strides = [1, 1]} : vector<16x192xf32> to vector<16x64xf32>
    %326 = vector.extract_strided_slice %324 {offsets = [0, 64], sizes = [16, 64], strides = [1, 1]} : vector<16x192xf32> to vector<16x64xf32>
    %327 = vector.extract_strided_slice %324 {offsets = [0, 128], sizes = [16, 64], strides = [1, 1]} : vector<16x192xf32> to vector<16x64xf32>
    %328 = vector.extract_strided_slice %325 {offsets = [0, 0], sizes = [16, 16], strides = [1, 1]} : vector<16x64xf32> to vector<16x16xf32>
    %329 = vector.shape_cast %328 : vector<16x16xf32> to vector<2x8x16xf32>
    %330 = vector.extract_strided_slice %326 {offsets = [0, 0], sizes = [16, 16], strides = [1, 1]} : vector<16x64xf32> to vector<16x16xf32>
    %331 = vector.shape_cast %330 : vector<16x16xf32> to vector<2x8x16xf32>
    %332 = vector.extract_strided_slice %327 {offsets = [0, 0], sizes = [16, 16], strides = [1, 1]} : vector<16x64xf32> to vector<16x16xf32>
    %333 = vector.shape_cast %332 : vector<16x16xf32> to vector<2x8x16xf32>
    "tpu.trace_start"() <{level = 10 : i32, message = "bqd,bkd->bqk"}> : () -> ()
    %cst_135 = arith.constant dense<0.000000e+00> : vector<2x8x8xf32>
    %334 = tpu.matmul %329, %331, %cst_135 {dimension_numbers = #tpu.dot_dimension_numbers<[2], [2], [1], [1], [0, 0, 0, 1, 1, 1], [0], [0]>} : vector<2x8x16xf32>, vector<2x8x16xf32>, vector<2x8x8xf32> -> vector<2x8x8xf32>
    "tpu.trace_stop"() : () -> ()
    %cst_136 = arith.constant 2.500000e-01 : f32
    %335 = vector.broadcast %cst_136 : f32 to vector<2x8x8xf32>
    %336 = arith.mulf %334, %335 : vector<2x8x8xf32>
    %cst_137 = arith.constant dense<0xFF800000> : vector<2x8xf32>
    %337 = vector.multi_reduction <maximumf>, %336, %cst_137 [2] : vector<2x8x8xf32> to vector<2x8xf32>
    %338 = vector.shape_cast %337 : vector<2x8xf32> to vector<2x8x1xf32>
    %339 = vector.broadcast %338 : vector<2x8x1xf32> to vector<2x8x8xf32>
    %340 = arith.subf %336, %339 : vector<2x8x8xf32>
    %341 = math.exp %340 : vector<2x8x8xf32>
    %cst_138 = arith.constant dense<0.000000e+00> : vector<2x8xf32>
    %342 = vector.multi_reduction <add>, %341, %cst_138 [2] : vector<2x8x8xf32> to vector<2x8xf32>
    %343 = vector.shape_cast %342 : vector<2x8xf32> to vector<2x8x1xf32>
    %344 = tpu.reciprocal %343 {approx = true} : vector<2x8x1xf32> -> vector<2x8x1xf32>
    %345 = vector.broadcast %344 : vector<2x8x1xf32> to vector<2x8x8xf32>
    %346 = arith.mulf %341, %345 : vector<2x8x8xf32>
    "tpu.trace_start"() <{level = 10 : i32, message = "bqk,bkd->bqd"}> : () -> ()
    %cst_139 = arith.constant dense<0.000000e+00> : vector<2x8x16xf32>
    %347 = tpu.matmul %346, %333, %cst_139 {dimension_numbers = #tpu.dot_dimension_numbers<[2], [1], [1], [2], [0, 0, 0, 1, 1, 2], [0], [0]>} : vector<2x8x8xf32>, vector<2x8x16xf32>, vector<2x8x16xf32> -> vector<2x8x16xf32>
    "tpu.trace_stop"() : () -> ()
    %348 = vector.shape_cast %347 : vector<2x8x16xf32> to vector<16x16xf32>
    %349 = vector.extract_strided_slice %325 {offsets = [0, 16], sizes = [16, 16], strides = [1, 1]} : vector<16x64xf32> to vector<16x16xf32>
    %350 = vector.shape_cast %349 : vector<16x16xf32> to vector<2x8x16xf32>
    %351 = vector.extract_strided_slice %326 {offsets = [0, 16], sizes = [16, 16], strides = [1, 1]} : vector<16x64xf32> to vector<16x16xf32>
    %352 = vector.shape_cast %351 : vector<16x16xf32> to vector<2x8x16xf32>
    %353 = vector.extract_strided_slice %327 {offsets = [0, 16], sizes = [16, 16], strides = [1, 1]} : vector<16x64xf32> to vector<16x16xf32>
    %354 = vector.shape_cast %353 : vector<16x16xf32> to vector<2x8x16xf32>
    "tpu.trace_start"() <{level = 10 : i32, message = "bqd,bkd->bqk"}> : () -> ()
    %cst_140 = arith.constant dense<0.000000e+00> : vector<2x8x8xf32>
    %355 = tpu.matmul %350, %352, %cst_140 {dimension_numbers = #tpu.dot_dimension_numbers<[2], [2], [1], [1], [0, 0, 0, 1, 1, 1], [0], [0]>} : vector<2x8x16xf32>, vector<2x8x16xf32>, vector<2x8x8xf32> -> vector<2x8x8xf32>
    "tpu.trace_stop"() : () -> ()
    %cst_141 = arith.constant 2.500000e-01 : f32
    %356 = vector.broadcast %cst_141 : f32 to vector<2x8x8xf32>
    %357 = arith.mulf %355, %356 : vector<2x8x8xf32>
    %cst_142 = arith.constant dense<0xFF800000> : vector<2x8xf32>
    %358 = vector.multi_reduction <maximumf>, %357, %cst_142 [2] : vector<2x8x8xf32> to vector<2x8xf32>
    %359 = vector.shape_cast %358 : vector<2x8xf32> to vector<2x8x1xf32>
    %360 = vector.broadcast %359 : vector<2x8x1xf32> to vector<2x8x8xf32>
    %361 = arith.subf %357, %360 : vector<2x8x8xf32>
    %362 = math.exp %361 : vector<2x8x8xf32>
    %cst_143 = arith.constant dense<0.000000e+00> : vector<2x8xf32>
    %363 = vector.multi_reduction <add>, %362, %cst_143 [2] : vector<2x8x8xf32> to vector<2x8xf32>
    %364 = vector.shape_cast %363 : vector<2x8xf32> to vector<2x8x1xf32>
    %365 = tpu.reciprocal %364 {approx = true} : vector<2x8x1xf32> -> vector<2x8x1xf32>
    %366 = vector.broadcast %365 : vector<2x8x1xf32> to vector<2x8x8xf32>
    %367 = arith.mulf %362, %366 : vector<2x8x8xf32>
    "tpu.trace_start"() <{level = 10 : i32, message = "bqk,bkd->bqd"}> : () -> ()
    %cst_144 = arith.constant dense<0.000000e+00> : vector<2x8x16xf32>
    %368 = tpu.matmul %367, %354, %cst_144 {dimension_numbers = #tpu.dot_dimension_numbers<[2], [1], [1], [2], [0, 0, 0, 1, 1, 2], [0], [0]>} : vector<2x8x8xf32>, vector<2x8x16xf32>, vector<2x8x16xf32> -> vector<2x8x16xf32>
    "tpu.trace_stop"() : () -> ()
    %369 = vector.shape_cast %368 : vector<2x8x16xf32> to vector<16x16xf32>
    %370 = vector.extract_strided_slice %325 {offsets = [0, 32], sizes = [16, 16], strides = [1, 1]} : vector<16x64xf32> to vector<16x16xf32>
    %371 = vector.shape_cast %370 : vector<16x16xf32> to vector<2x8x16xf32>
    %372 = vector.extract_strided_slice %326 {offsets = [0, 32], sizes = [16, 16], strides = [1, 1]} : vector<16x64xf32> to vector<16x16xf32>
    %373 = vector.shape_cast %372 : vector<16x16xf32> to vector<2x8x16xf32>
    %374 = vector.extract_strided_slice %327 {offsets = [0, 32], sizes = [16, 16], strides = [1, 1]} : vector<16x64xf32> to vector<16x16xf32>
    %375 = vector.shape_cast %374 : vector<16x16xf32> to vector<2x8x16xf32>
    "tpu.trace_start"() <{level = 10 : i32, message = "bqd,bkd->bqk"}> : () -> ()
    %cst_145 = arith.constant dense<0.000000e+00> : vector<2x8x8xf32>
    %376 = tpu.matmul %371, %373, %cst_145 {dimension_numbers = #tpu.dot_dimension_numbers<[2], [2], [1], [1], [0, 0, 0, 1, 1, 1], [0], [0]>} : vector<2x8x16xf32>, vector<2x8x16xf32>, vector<2x8x8xf32> -> vector<2x8x8xf32>
    "tpu.trace_stop"() : () -> ()
    %cst_146 = arith.constant 2.500000e-01 : f32
    %377 = vector.broadcast %cst_146 : f32 to vector<2x8x8xf32>
    %378 = arith.mulf %376, %377 : vector<2x8x8xf32>
    %cst_147 = arith.constant dense<0xFF800000> : vector<2x8xf32>
    %379 = vector.multi_reduction <maximumf>, %378, %cst_147 [2] : vector<2x8x8xf32> to vector<2x8xf32>
    %380 = vector.shape_cast %379 : vector<2x8xf32> to vector<2x8x1xf32>
    %381 = vector.broadcast %380 : vector<2x8x1xf32> to vector<2x8x8xf32>
    %382 = arith.subf %378, %381 : vector<2x8x8xf32>
    %383 = math.exp %382 : vector<2x8x8xf32>
    %cst_148 = arith.constant dense<0.000000e+00> : vector<2x8xf32>
    %384 = vector.multi_reduction <add>, %383, %cst_148 [2] : vector<2x8x8xf32> to vector<2x8xf32>
    %385 = vector.shape_cast %384 : vector<2x8xf32> to vector<2x8x1xf32>
    %386 = tpu.reciprocal %385 {approx = true} : vector<2x8x1xf32> -> vector<2x8x1xf32>
    %387 = vector.broadcast %386 : vector<2x8x1xf32> to vector<2x8x8xf32>
    %388 = arith.mulf %383, %387 : vector<2x8x8xf32>
    "tpu.trace_start"() <{level = 10 : i32, message = "bqk,bkd->bqd"}> : () -> ()
    %cst_149 = arith.constant dense<0.000000e+00> : vector<2x8x16xf32>
    %389 = tpu.matmul %388, %375, %cst_149 {dimension_numbers = #tpu.dot_dimension_numbers<[2], [1], [1], [2], [0, 0, 0, 1, 1, 2], [0], [0]>} : vector<2x8x8xf32>, vector<2x8x16xf32>, vector<2x8x16xf32> -> vector<2x8x16xf32>
    "tpu.trace_stop"() : () -> ()
    %390 = vector.shape_cast %389 : vector<2x8x16xf32> to vector<16x16xf32>
    %391 = vector.extract_strided_slice %325 {offsets = [0, 48], sizes = [16, 16], strides = [1, 1]} : vector<16x64xf32> to vector<16x16xf32>
    %392 = vector.shape_cast %391 : vector<16x16xf32> to vector<2x8x16xf32>
    %393 = vector.extract_strided_slice %326 {offsets = [0, 48], sizes = [16, 16], strides = [1, 1]} : vector<16x64xf32> to vector<16x16xf32>
    %394 = vector.shape_cast %393 : vector<16x16xf32> to vector<2x8x16xf32>
    %395 = vector.extract_strided_slice %327 {offsets = [0, 48], sizes = [16, 16], strides = [1, 1]} : vector<16x64xf32> to vector<16x16xf32>
    %396 = vector.shape_cast %395 : vector<16x16xf32> to vector<2x8x16xf32>
    "tpu.trace_start"() <{level = 10 : i32, message = "bqd,bkd->bqk"}> : () -> ()
    %cst_150 = arith.constant dense<0.000000e+00> : vector<2x8x8xf32>
    %397 = tpu.matmul %392, %394, %cst_150 {dimension_numbers = #tpu.dot_dimension_numbers<[2], [2], [1], [1], [0, 0, 0, 1, 1, 1], [0], [0]>} : vector<2x8x16xf32>, vector<2x8x16xf32>, vector<2x8x8xf32> -> vector<2x8x8xf32>
    "tpu.trace_stop"() : () -> ()
    %cst_151 = arith.constant 2.500000e-01 : f32
    %398 = vector.broadcast %cst_151 : f32 to vector<2x8x8xf32>
    %399 = arith.mulf %397, %398 : vector<2x8x8xf32>
    %cst_152 = arith.constant dense<0xFF800000> : vector<2x8xf32>
    %400 = vector.multi_reduction <maximumf>, %399, %cst_152 [2] : vector<2x8x8xf32> to vector<2x8xf32>
    %401 = vector.shape_cast %400 : vector<2x8xf32> to vector<2x8x1xf32>
    %402 = vector.broadcast %401 : vector<2x8x1xf32> to vector<2x8x8xf32>
    %403 = arith.subf %399, %402 : vector<2x8x8xf32>
    %404 = math.exp %403 : vector<2x8x8xf32>
    %cst_153 = arith.constant dense<0.000000e+00> : vector<2x8xf32>
    %405 = vector.multi_reduction <add>, %404, %cst_153 [2] : vector<2x8x8xf32> to vector<2x8xf32>
    %406 = vector.shape_cast %405 : vector<2x8xf32> to vector<2x8x1xf32>
    %407 = tpu.reciprocal %406 {approx = true} : vector<2x8x1xf32> -> vector<2x8x1xf32>
    %408 = vector.broadcast %407 : vector<2x8x1xf32> to vector<2x8x8xf32>
    %409 = arith.mulf %404, %408 : vector<2x8x8xf32>
    "tpu.trace_start"() <{level = 10 : i32, message = "bqk,bkd->bqd"}> : () -> ()
    %cst_154 = arith.constant dense<0.000000e+00> : vector<2x8x16xf32>
    %410 = tpu.matmul %409, %396, %cst_154 {dimension_numbers = #tpu.dot_dimension_numbers<[2], [1], [1], [2], [0, 0, 0, 1, 1, 2], [0], [0]>} : vector<2x8x8xf32>, vector<2x8x16xf32>, vector<2x8x16xf32> -> vector<2x8x16xf32>
    "tpu.trace_stop"() : () -> ()
    %411 = vector.shape_cast %410 : vector<2x8x16xf32> to vector<16x16xf32>
    %412 = tpu.concatenate %348, %369, %390, %411 in 1 : vector<16x16xf32>, vector<16x16xf32>, vector<16x16xf32>, vector<16x16xf32> -> vector<16x64xf32>
    %c0_155 = arith.constant 0 : index
    %c0_156 = arith.constant 0 : index
    %413 = vector.load %arg27[%c0_155, %c0_156] : memref<64x64xf32, #tpu.memory_space<vmem>>, vector<64x64xf32>
    %cst_157 = arith.constant dense<0.000000e+00> : vector<16x64xf32>
    %414 = tpu.matmul %412, %413, %cst_157 {dimension_numbers = #tpu.dot_dimension_numbers<[1], [0], [0], [1], [0, 0, 1, 1], [], []>} : vector<16x64xf32>, vector<64x64xf32>, vector<16x64xf32> -> vector<16x64xf32>
    %c0_158 = arith.constant 0 : index
    %c0_159 = arith.constant 0 : index
    %415 = vector.load %arg28[%c0_158, %c0_159] : memref<1x64xf32, #tpu.memory_space<vmem>>, vector<1x64xf32>
    %416 = vector.broadcast %415 : vector<1x64xf32> to vector<16x64xf32>
    %417 = arith.addf %414, %416 : vector<16x64xf32>
    %418 = arith.mulf %294, %417 : vector<16x64xf32>
    %419 = arith.addf %286, %418 : vector<16x64xf32>
    %cst_160 = arith.constant dense<0.000000e+00> : vector<16xf32>
    %420 = vector.multi_reduction <add>, %419, %cst_160 [1] : vector<16x64xf32> to vector<16xf32>
    %421 = vector.shape_cast %420 : vector<16xf32> to vector<16x1xf32>
    %cst_161 = arith.constant 6.400000e+01 : f32
    %422 = vector.broadcast %cst_161 : f32 to vector<16x1xf32>
    %423 = arith.divf %421, %422 : vector<16x1xf32>
    %424 = vector.broadcast %423 : vector<16x1xf32> to vector<16x64xf32>
    %425 = arith.subf %419, %424 : vector<16x64xf32>
    %426 = arith.mulf %425, %425 : vector<16x64xf32>
    %cst_162 = arith.constant dense<0.000000e+00> : vector<16xf32>
    %427 = vector.multi_reduction <add>, %426, %cst_162 [1] : vector<16x64xf32> to vector<16xf32>
    %428 = vector.shape_cast %427 : vector<16xf32> to vector<16x1xf32>
    %cst_163 = arith.constant 6.400000e+01 : f32
    %429 = vector.broadcast %cst_163 : f32 to vector<16x1xf32>
    %430 = arith.divf %428, %429 : vector<16x1xf32>
    %431 = vector.broadcast %423 : vector<16x1xf32> to vector<16x64xf32>
    %432 = arith.subf %419, %431 : vector<16x64xf32>
    %cst_164 = arith.constant 9.99999997E-7 : f32
    %433 = vector.broadcast %cst_164 : f32 to vector<16x1xf32>
    %434 = arith.addf %430, %433 : vector<16x1xf32>
    %435 = math.rsqrt %434 : vector<16x1xf32>
    %436 = vector.broadcast %435 : vector<16x1xf32> to vector<16x64xf32>
    %437 = arith.mulf %432, %436 : vector<16x64xf32>
    %cst_165 = arith.constant 1.000000e+00 : f32
    %438 = vector.broadcast %cst_165 : f32 to vector<16x64xf32>
    %439 = arith.addf %438, %296 : vector<16x64xf32>
    %440 = arith.mulf %437, %439 : vector<16x64xf32>
    %441 = arith.addf %440, %295 : vector<16x64xf32>
    %c0_166 = arith.constant 0 : index
    %c0_167 = arith.constant 0 : index
    %442 = vector.load %arg29[%c0_166, %c0_167] : memref<64x256xf32, #tpu.memory_space<vmem>>, vector<64x256xf32>
    %cst_168 = arith.constant dense<0.000000e+00> : vector<16x256xf32>
    %443 = tpu.matmul %441, %442, %cst_168 {dimension_numbers = #tpu.dot_dimension_numbers<[1], [0], [0], [1], [0, 0, 1, 1], [], []>} : vector<16x64xf32>, vector<64x256xf32>, vector<16x256xf32> -> vector<16x256xf32>
    %c0_169 = arith.constant 0 : index
    %c0_170 = arith.constant 0 : index
    %444 = vector.load %arg30[%c0_169, %c0_170] : memref<1x256xf32, #tpu.memory_space<vmem>>, vector<1x256xf32>
    %445 = vector.broadcast %444 : vector<1x256xf32> to vector<16x256xf32>
    %446 = arith.addf %443, %445 : vector<16x256xf32>
    %cst_171 = arith.constant 5.000000e-01 : f32
    %447 = vector.broadcast %cst_171 : f32 to vector<16x256xf32>
    %448 = arith.mulf %447, %446 : vector<16x256xf32>
    %cst_172 = arith.constant 0.707106769 : f32
    %449 = vector.broadcast %cst_172 : f32 to vector<16x256xf32>
    %450 = arith.mulf %446, %449 : vector<16x256xf32>
    %451 = math.absf %450 : vector<16x256xf32>
    %cst_173 = arith.constant 0.327591091 : f32
    %452 = vector.broadcast %cst_173 : f32 to vector<16x256xf32>
    %453 = arith.mulf %452, %451 : vector<16x256xf32>
    %cst_174 = arith.constant 1.000000e+00 : f32
    %454 = vector.broadcast %cst_174 : f32 to vector<16x256xf32>
    %455 = arith.addf %454, %453 : vector<16x256xf32>
    %cst_175 = arith.constant 1.000000e+00 : f32
    %456 = vector.broadcast %cst_175 : f32 to vector<16x256xf32>
    %457 = arith.divf %456, %455 : vector<16x256xf32>
    %cst_176 = arith.constant 1.06140542 : f32
    %458 = vector.broadcast %cst_176 : f32 to vector<16x256xf32>
    %459 = arith.mulf %458, %457 : vector<16x256xf32>
    %cst_177 = arith.constant -1.45315206 : f32
    %460 = vector.broadcast %cst_177 : f32 to vector<16x256xf32>
    %461 = arith.addf %459, %460 : vector<16x256xf32>
    %462 = arith.mulf %461, %457 : vector<16x256xf32>
    %cst_178 = arith.constant 1.42141378 : f32
    %463 = vector.broadcast %cst_178 : f32 to vector<16x256xf32>
    %464 = arith.addf %462, %463 : vector<16x256xf32>
    %465 = arith.mulf %464, %457 : vector<16x256xf32>
    %cst_179 = arith.constant -0.284496725 : f32
    %466 = vector.broadcast %cst_179 : f32 to vector<16x256xf32>
    %467 = arith.addf %465, %466 : vector<16x256xf32>
    %468 = arith.mulf %467, %457 : vector<16x256xf32>
    %cst_180 = arith.constant 0.254829586 : f32
    %469 = vector.broadcast %cst_180 : f32 to vector<16x256xf32>
    %470 = arith.addf %468, %469 : vector<16x256xf32>
    %471 = arith.mulf %470, %457 : vector<16x256xf32>
    %cst_181 = arith.constant 0.000000e+00 : f32
    %472 = vector.broadcast %cst_181 : f32 to vector<16x256xf32>
    %473 = arith.subf %472, %451 : vector<16x256xf32>
    %474 = arith.mulf %473, %451 : vector<16x256xf32>
    %475 = math.exp %474 : vector<16x256xf32>
    %476 = arith.mulf %471, %475 : vector<16x256xf32>
    %cst_182 = arith.constant 1.000000e+00 : f32
    %477 = vector.broadcast %cst_182 : f32 to vector<16x256xf32>
    %478 = arith.subf %477, %476 : vector<16x256xf32>
    %cst_183 = arith.constant 0.000000e+00 : f32
    %479 = vector.broadcast %cst_183 : f32 to vector<16x256xf32>
    %480 = arith.cmpf oge, %450, %479 : vector<16x256xf32>
    %cst_184 = arith.constant 0.000000e+00 : f32
    %481 = vector.broadcast %cst_184 : f32 to vector<16x256xf32>
    %482 = arith.subf %481, %478 : vector<16x256xf32>
    %483 = arith.select %480, %478, %482 : vector<16x256xi1>, vector<16x256xf32>
    %cst_185 = arith.constant 1.000000e+00 : f32
    %484 = vector.broadcast %cst_185 : f32 to vector<16x256xf32>
    %485 = arith.addf %484, %483 : vector<16x256xf32>
    %486 = arith.mulf %448, %485 : vector<16x256xf32>
    %c0_186 = arith.constant 0 : index
    %c0_187 = arith.constant 0 : index
    %487 = vector.load %arg31[%c0_186, %c0_187] : memref<256x64xf32, #tpu.memory_space<vmem>>, vector<256x64xf32>
    %cst_188 = arith.constant dense<0.000000e+00> : vector<16x64xf32>
    %488 = tpu.matmul %486, %487, %cst_188 {dimension_numbers = #tpu.dot_dimension_numbers<[1], [0], [0], [1], [0, 0, 1, 1], [], []>} : vector<16x256xf32>, vector<256x64xf32>, vector<16x64xf32> -> vector<16x64xf32>
    %c0_189 = arith.constant 0 : index
    %c0_190 = arith.constant 0 : index
    %489 = vector.load %arg32[%c0_189, %c0_190] : memref<1x64xf32, #tpu.memory_space<vmem>>, vector<1x64xf32>
    %490 = vector.broadcast %489 : vector<1x64xf32> to vector<16x64xf32>
    %491 = arith.addf %488, %490 : vector<16x64xf32>
    %492 = arith.mulf %297, %491 : vector<16x64xf32>
    %493 = arith.addf %419, %492 : vector<16x64xf32>
    %c0_191 = arith.constant 0 : index
    %c0_192 = arith.constant 0 : index
    %494 = vector.load %arg33[%c0_191, %c0_192] : memref<64x128xf32, #tpu.memory_space<vmem>>, vector<64x128xf32>
    %cst_193 = arith.constant dense<0.000000e+00> : vector<16x128xf32>
    %495 = tpu.matmul %71, %494, %cst_193 {dimension_numbers = #tpu.dot_dimension_numbers<[1], [0], [0], [1], [0, 0, 1, 1], [], []>} : vector<16x64xf32>, vector<64x128xf32>, vector<16x128xf32> -> vector<16x128xf32>
    %c0_194 = arith.constant 0 : index
    %c0_195 = arith.constant 0 : index
    %496 = vector.load %arg34[%c0_194, %c0_195] : memref<1x128xf32, #tpu.memory_space<vmem>>, vector<1x128xf32>
    %497 = vector.broadcast %496 : vector<1x128xf32> to vector<16x128xf32>
    %498 = arith.addf %495, %497 : vector<16x128xf32>
    %499 = vector.extract_strided_slice %498 {offsets = [0, 0], sizes = [16, 64], strides = [1, 1]} : vector<16x128xf32> to vector<16x64xf32>
    %500 = vector.extract_strided_slice %498 {offsets = [0, 64], sizes = [16, 64], strides = [1, 1]} : vector<16x128xf32> to vector<16x64xf32>
    %cst_196 = arith.constant dense<0.000000e+00> : vector<16xf32>
    %501 = vector.multi_reduction <add>, %493, %cst_196 [1] : vector<16x64xf32> to vector<16xf32>
    %502 = vector.shape_cast %501 : vector<16xf32> to vector<16x1xf32>
    %cst_197 = arith.constant 6.400000e+01 : f32
    %503 = vector.broadcast %cst_197 : f32 to vector<16x1xf32>
    %504 = arith.divf %502, %503 : vector<16x1xf32>
    %505 = vector.broadcast %504 : vector<16x1xf32> to vector<16x64xf32>
    %506 = arith.subf %493, %505 : vector<16x64xf32>
    %507 = arith.mulf %506, %506 : vector<16x64xf32>
    %cst_198 = arith.constant dense<0.000000e+00> : vector<16xf32>
    %508 = vector.multi_reduction <add>, %507, %cst_198 [1] : vector<16x64xf32> to vector<16xf32>
    %509 = vector.shape_cast %508 : vector<16xf32> to vector<16x1xf32>
    %cst_199 = arith.constant 6.400000e+01 : f32
    %510 = vector.broadcast %cst_199 : f32 to vector<16x1xf32>
    %511 = arith.divf %509, %510 : vector<16x1xf32>
    %512 = vector.broadcast %504 : vector<16x1xf32> to vector<16x64xf32>
    %513 = arith.subf %493, %512 : vector<16x64xf32>
    %cst_200 = arith.constant 9.99999997E-7 : f32
    %514 = vector.broadcast %cst_200 : f32 to vector<16x1xf32>
    %515 = arith.addf %511, %514 : vector<16x1xf32>
    %516 = math.rsqrt %515 : vector<16x1xf32>
    %517 = vector.broadcast %516 : vector<16x1xf32> to vector<16x64xf32>
    %518 = arith.mulf %513, %517 : vector<16x64xf32>
    %cst_201 = arith.constant 1.000000e+00 : f32
    %519 = vector.broadcast %cst_201 : f32 to vector<16x64xf32>
    %520 = arith.addf %519, %500 : vector<16x64xf32>
    %521 = arith.mulf %518, %520 : vector<16x64xf32>
    %522 = arith.addf %521, %499 : vector<16x64xf32>
    %c0_202 = arith.constant 0 : index
    %c0_203 = arith.constant 0 : index
    %523 = vector.load %arg35[%c0_202, %c0_203] : memref<64x64xf32, #tpu.memory_space<vmem>>, vector<64x64xf32>
    %cst_204 = arith.constant dense<0.000000e+00> : vector<16x64xf32>
    %524 = tpu.matmul %522, %523, %cst_204 {dimension_numbers = #tpu.dot_dimension_numbers<[1], [0], [0], [1], [0, 0, 1, 1], [], []>} : vector<16x64xf32>, vector<64x64xf32>, vector<16x64xf32> -> vector<16x64xf32>
    %c0_205 = arith.constant 0 : index
    %c0_206 = arith.constant 0 : index
    %525 = vector.load %arg36[%c0_205, %c0_206] : memref<1x64xf32, #tpu.memory_space<vmem>>, vector<1x64xf32>
    %526 = vector.broadcast %525 : vector<1x64xf32> to vector<16x64xf32>
    %527 = arith.addf %524, %526 : vector<16x64xf32>
    %cst_207 = arith.constant 5.000000e-01 : f32
    %528 = vector.broadcast %cst_207 : f32 to vector<16x64xf32>
    %529 = arith.mulf %528, %527 : vector<16x64xf32>
    %cst_208 = arith.constant 0.707106769 : f32
    %530 = vector.broadcast %cst_208 : f32 to vector<16x64xf32>
    %531 = arith.mulf %527, %530 : vector<16x64xf32>
    %532 = math.absf %531 : vector<16x64xf32>
    %cst_209 = arith.constant 0.327591091 : f32
    %533 = vector.broadcast %cst_209 : f32 to vector<16x64xf32>
    %534 = arith.mulf %533, %532 : vector<16x64xf32>
    %cst_210 = arith.constant 1.000000e+00 : f32
    %535 = vector.broadcast %cst_210 : f32 to vector<16x64xf32>
    %536 = arith.addf %535, %534 : vector<16x64xf32>
    %cst_211 = arith.constant 1.000000e+00 : f32
    %537 = vector.broadcast %cst_211 : f32 to vector<16x64xf32>
    %538 = arith.divf %537, %536 : vector<16x64xf32>
    %cst_212 = arith.constant 1.06140542 : f32
    %539 = vector.broadcast %cst_212 : f32 to vector<16x64xf32>
    %540 = arith.mulf %539, %538 : vector<16x64xf32>
    %cst_213 = arith.constant -1.45315206 : f32
    %541 = vector.broadcast %cst_213 : f32 to vector<16x64xf32>
    %542 = arith.addf %540, %541 : vector<16x64xf32>
    %543 = arith.mulf %542, %538 : vector<16x64xf32>
    %cst_214 = arith.constant 1.42141378 : f32
    %544 = vector.broadcast %cst_214 : f32 to vector<16x64xf32>
    %545 = arith.addf %543, %544 : vector<16x64xf32>
    %546 = arith.mulf %545, %538 : vector<16x64xf32>
    %cst_215 = arith.constant -0.284496725 : f32
    %547 = vector.broadcast %cst_215 : f32 to vector<16x64xf32>
    %548 = arith.addf %546, %547 : vector<16x64xf32>
    %549 = arith.mulf %548, %538 : vector<16x64xf32>
    %cst_216 = arith.constant 0.254829586 : f32
    %550 = vector.broadcast %cst_216 : f32 to vector<16x64xf32>
    %551 = arith.addf %549, %550 : vector<16x64xf32>
    %552 = arith.mulf %551, %538 : vector<16x64xf32>
    %cst_217 = arith.constant 0.000000e+00 : f32
    %553 = vector.broadcast %cst_217 : f32 to vector<16x64xf32>
    %554 = arith.subf %553, %532 : vector<16x64xf32>
    %555 = arith.mulf %554, %532 : vector<16x64xf32>
    %556 = math.exp %555 : vector<16x64xf32>
    %557 = arith.mulf %552, %556 : vector<16x64xf32>
    %cst_218 = arith.constant 1.000000e+00 : f32
    %558 = vector.broadcast %cst_218 : f32 to vector<16x64xf32>
    %559 = arith.subf %558, %557 : vector<16x64xf32>
    %cst_219 = arith.constant 0.000000e+00 : f32
    %560 = vector.broadcast %cst_219 : f32 to vector<16x64xf32>
    %561 = arith.cmpf oge, %531, %560 : vector<16x64xf32>
    %cst_220 = arith.constant 0.000000e+00 : f32
    %562 = vector.broadcast %cst_220 : f32 to vector<16x64xf32>
    %563 = arith.subf %562, %559 : vector<16x64xf32>
    %564 = arith.select %561, %559, %563 : vector<16x64xi1>, vector<16x64xf32>
    %cst_221 = arith.constant 1.000000e+00 : f32
    %565 = vector.broadcast %cst_221 : f32 to vector<16x64xf32>
    %566 = arith.addf %565, %564 : vector<16x64xf32>
    %567 = arith.mulf %529, %566 : vector<16x64xf32>
    %cst_222 = arith.constant dense<0.000000e+00> : vector<16xf32>
    %568 = vector.multi_reduction <add>, %567, %cst_222 [1] : vector<16x64xf32> to vector<16xf32>
    %569 = vector.shape_cast %568 : vector<16xf32> to vector<16x1xf32>
    %cst_223 = arith.constant 6.400000e+01 : f32
    %570 = vector.broadcast %cst_223 : f32 to vector<16x1xf32>
    %571 = arith.divf %569, %570 : vector<16x1xf32>
    %572 = vector.broadcast %571 : vector<16x1xf32> to vector<16x64xf32>
    %573 = arith.subf %567, %572 : vector<16x64xf32>
    %574 = arith.mulf %573, %573 : vector<16x64xf32>
    %cst_224 = arith.constant dense<0.000000e+00> : vector<16xf32>
    %575 = vector.multi_reduction <add>, %574, %cst_224 [1] : vector<16x64xf32> to vector<16xf32>
    %576 = vector.shape_cast %575 : vector<16xf32> to vector<16x1xf32>
    %cst_225 = arith.constant 6.400000e+01 : f32
    %577 = vector.broadcast %cst_225 : f32 to vector<16x1xf32>
    %578 = arith.divf %576, %577 : vector<16x1xf32>
    %579 = vector.broadcast %571 : vector<16x1xf32> to vector<16x64xf32>
    %580 = arith.subf %567, %579 : vector<16x64xf32>
    %cst_226 = arith.constant 9.99999974E-6 : f32
    %581 = vector.broadcast %cst_226 : f32 to vector<16x1xf32>
    %582 = arith.addf %578, %581 : vector<16x1xf32>
    %583 = math.rsqrt %582 : vector<16x1xf32>
    %584 = vector.broadcast %583 : vector<16x1xf32> to vector<16x64xf32>
    %585 = arith.mulf %580, %584 : vector<16x64xf32>
    %c0_227 = arith.constant 0 : index
    %c0_228 = arith.constant 0 : index
    %586 = vector.load %arg37[%c0_227, %c0_228] : memref<1x64xf32, #tpu.memory_space<vmem>>, vector<1x64xf32>
    %587 = vector.broadcast %586 : vector<1x64xf32> to vector<16x64xf32>
    %588 = arith.mulf %585, %587 : vector<16x64xf32>
    %c0_229 = arith.constant 0 : index
    %c0_230 = arith.constant 0 : index
    %589 = vector.load %arg38[%c0_229, %c0_230] : memref<1x64xf32, #tpu.memory_space<vmem>>, vector<1x64xf32>
    %590 = vector.broadcast %589 : vector<1x64xf32> to vector<16x64xf32>
    %591 = arith.addf %588, %590 : vector<16x64xf32>
    %c0_231 = arith.constant 0 : index
    %c0_232 = arith.constant 0 : index
    %592 = vector.load %arg39[%c0_231, %c0_232] : memref<64x128xf32, #tpu.memory_space<vmem>>, vector<64x128xf32>
    %cst_233 = arith.constant dense<0.000000e+00> : vector<16x128xf32>
    %593 = tpu.matmul %591, %592, %cst_233 {dimension_numbers = #tpu.dot_dimension_numbers<[1], [0], [0], [1], [0, 0, 1, 1], [], []>} : vector<16x64xf32>, vector<64x128xf32>, vector<16x128xf32> -> vector<16x128xf32>
    %c0_234 = arith.constant 0 : index
    %c0_235 = arith.constant 0 : index
    %594 = vector.load %arg40[%c0_234, %c0_235] : memref<1x128xf32, #tpu.memory_space<vmem>>, vector<1x128xf32>
    %595 = vector.broadcast %594 : vector<1x128xf32> to vector<16x128xf32>
    %596 = arith.addf %593, %595 : vector<16x128xf32>
    %c0_236 = arith.constant 0 : index
    %c0_237 = arith.constant 0 : index
    %597 = vector.load %arg41[%c0_236, %c0_237] : memref<16x128xf32, #tpu.memory_space<vmem>>, vector<16x128xf32>
    tpu.vector_store %arg41[%c0_236, %c0_237], %596 {strides = array<i32>} : memref<16x128xf32, #tpu.memory_space<vmem>>, vector<16x128xf32>,
    return
  }
}

</mosaic_0001>

<bundles_post_ra>
// kernel: diffusion_transformer_forward.1
= control target key start
LH: loop header
LB: loop body
LE: loop exit
PB: predicated region body
PF: predicated region fallthrough
CT: control target
= control target key end

     0   :  { %s7624_s6 = smov 1   ;;  %s7625_s10 = smov 2   ;;  %s8879_s0 = inlined_call_operand.smem [shape: u32[42], index: -1, kind: input, shape index: {}] }
   0x1   :  { %s7711_s5 = sld [smem:[%s8879_s0]]   ;;  %s7626_s14 = smov 3  }
   0x2   :  { %s7716_s9 = sld [smem:[%s8879_s0 + %s7624_s6]]   ;;  %s7627_s18 = smov 4  }
   0x3   :  { %s7721_s13 = sld [smem:[%s8879_s0 + %s7625_s10]]   ;;  %s7628_s22 = smov 5  }
   0x4   :  { %s7726_s17 = sld [smem:[%s8879_s0 + %s7626_s14]]   ;;  %s7629_s26 = smov 6  }
   0x5   :  { %s7731_s21 = sld [smem:[%s8879_s0 + %s7627_s18]]   ;;  %s7630_s30 = smov 7  }
   0x6   :  { %s7736_s25 = sld [smem:[%s8879_s0 + %s7628_s22]]   ;;  %s7631_s4 = smov 8  }
   0x7   :  { %8895 = sst [smem:[#allocation52_spill]] %s7711_s5  ;;  %s7632_s10 = smov 9  }
   0x8   :  { %8896 = sst [smem:[#allocation53_spill]] %s7716_s9  ;;  %s7633_s15 = smov 10  }
   0x9   :  { %8897 = sst [smem:[#allocation54_spill]] %s7721_s13  ;;  %s7634_s20 = smov 11  }
   0xa   :  { %8898 = sst [smem:[#allocation55_spill]] %s7726_s17  ;;  %s7636_s1 = smov 13  }
   0xb   :  { %s7741_s29 = sld [smem:[%s8879_s0 + %s7629_s26]]   ;;  %s7635_s26 = smov 12  }
   0xc   :  { %s7746_s3 = sld [smem:[%s8879_s0 + %s7630_s30]]   ;;  %s7637_s7 = smov 14  }
   0xd   :  { %s7751_s8 = sld [smem:[%s8879_s0 + %s7631_s4]]   ;;  %s7639_s22 = smov 16  }
   0xe   :  { %s7756_s14 = sld [smem:[%s8879_s0 + %s7632_s10]]   ;;  %s7640_s28 = smov 17  }
   0xf   :  { %s7761_s19 = sld [smem:[%s8879_s0 + %s7633_s15]]   ;;  %s7638_s15 = smov 15  }
  0x10   :  { %s7766_s24 = sld [smem:[%s8879_s0 + %s7634_s20]]  }
  0x11   :  { %s7771_s30 = sld [smem:[%s8879_s0 + %s7635_s26]]  }
  0x12   :  { %s7776_s6 = sld [smem:[%s8879_s0 + %s7636_s1]]  }
  0x13   :  { %s7781_s12 = sld [smem:[%s8879_s0 + %s7637_s7]]   ;;  %s7641_s7 = smov 18  }
  0x14   :  { %s7786_s20 = sld [smem:[%s8879_s0 + %s7638_s15]]   ;;  %s7642_s15 = smov 19  }
  0x15   :  { %s7791_s27 = sld [smem:[%s8879_s0 + %s7639_s22]]   ;;  %s7643_s22 = smov 20  }
  0x16   :  { %8899 = sst [smem:[#allocation56_spill]] %s7766_s24 }
  0x17   :  { %s7796_s4 = sld [smem:[%s8879_s0 + %s7640_s28]]   ;;  %s7644_s28 = smov 21  }
  0x18   :  { %8900 = sst [smem:[#allocation57_spill]] %s7776_s6 }
  0x19   :  { %8901 = sst [smem:[#allocation58_spill]] %s7781_s12 }
  0x1a   :  { %8902 = sst [smem:[#allocation59_spill]] %s7786_s20 }
  0x1b   :  { %8903 = sst [smem:[#allocation60_spill]] %s7791_s27 }
  0x1c   :  { %s7801_s12 = sld [smem:[%s8879_s0 + %s7641_s7]]   ;;  %s7645_s7 = smov 22  }
  0x1d   :  { %s7806_s20 = sld [smem:[%s8879_s0 + %s7642_s15]]   ;;  %s7646_s15 = smov 23  }
  0x1e   :  { %s7811_s6 = sld [smem:[%s8879_s0 + %s7643_s22]]   ;;  %s7647_s22 = smov 24  }
  0x1f   :  { %s7816_s17 = sld [smem:[%s8879_s0 + %s7644_s28]]   ;;  %s7648_s28 = smov 25  }
  0x20   :  { %s7821_s13 = sld [smem:[%s8879_s0 + %s7645_s7]]   ;;  %s7649_s7 = smov 26  }
  0x21   :  { %s7831_s9 = sld [smem:[%s8879_s0 + %s7647_s22]]   ;;  %s7651_s22 = smov 28  }
  0x22   :  { %8904 = sst [smem:[#allocation61_spill]] %s7801_s12 }
  0x23   :  { %8905 = sst [smem:[#allocation62_spill]] %s7806_s20 }
  0x24   :  { %s7826_s20 = sld [smem:[%s8879_s0 + %s7646_s15]]   ;;  %s7650_s15 = smov 27  }
  0x25   :  { %8906 = sst [smem:[#allocation63_spill]] %s7816_s17 }
  0x26   :  { %8907 = sst [smem:[#allocation64_spill]] %s7821_s13 }
  0x27   :  { %8909 = sst [smem:[#allocation66_spill]] %s7831_s9 }
  0x28   :  { %s7836_s17 = sld [smem:[%s8879_s0 + %s7648_s28]]   ;;  %s7652_s28 = smov 29  }
  0x29   :  { %s7841_s24 = sld [smem:[%s8879_s0 + %s7649_s7]]   ;;  %s7653_s7 = smov 30  }
  0x2a   :  { %8908 = sst [smem:[#allocation65_spill]] %s7826_s20 }
  0x2b   :  { %s7846_s20 = sld [smem:[%s8879_s0 + %s7650_s15]]   ;;  %s7654_s15 = smov 31  }
  0x2c   :  { %s7851_s9 = sld [smem:[%s8879_s0 + %s7651_s22]]   ;;  %s7655_s22 = smov 32  }
  0x2d   :  { %s7856_s5 = sld [smem:[%s8879_s0 + %s7652_s28]]   ;;  %s7656_s28 = smov 33  }
  0x2e   :  { %s7876_s13 = sld [smem:[%s8879_s0 + %s7656_s28]]   ;;  %s7660_s28 = smov 37  }
  0x2f   :  { %8910 = sst [smem:[#allocation67_spill]] %s7841_s24 }
  0x30   :  { %s7861_s24 = sld [smem:[%s8879_s0 + %s7653_s7]]   ;;  %s7657_s7 = smov 34  }
  0x31   :  { %8911 = sst [smem:[#allocation68_spill]] %s7846_s20 }
  0x32   :  { %8912 = sst [smem:[#allocation69_spill]] %s7851_s9 }
  0x33   :  { %s7866_s20 = sld [smem:[%s8879_s0 + %s7654_s15]]   ;;  %s7658_s15 = smov 35  }
  0x34   :  { %s7871_s9 = sld [smem:[%s8879_s0 + %s7655_s22]]   ;;  %s7659_s22 = smov 36  }
  0x35   :  { %8916 = sst [smem:[#allocation73_spill]] %s7876_s13 }
  0x36   :  { %8913 = sst [smem:[#allocation70_spill]] %s7861_s24 }
  0x37   :  { %s7881_s24 = sld [smem:[%s8879_s0 + %s7657_s7]]   ;;  %s7661_s7 = smov 38  }
  0x38   :  { %s7896_s13 = sld [smem:[%s8879_s0 + %s7660_s28]]   ;;  %s7664_s28 = smov 41  }
  0x39   :  { %8914 = sst [smem:[#allocation71_spill]] %s7866_s20 }
  0x3a   :  { %8915 = sst [smem:[#allocation72_spill]] %s7871_s9 }
  0x3b   :  { %s7886_s20 = sld [smem:[%s8879_s0 + %s7658_s15]]   ;;  %s7662_s15 = smov 39  }
  0x3c   :  { %s7891_s9 = sld [smem:[%s8879_s0 + %s7659_s22]]   ;;  %s7663_s22 = smov 40  }
  0x3d   :  { %s7901_s12 = sld [smem:[%s8879_s0 + %s7661_s7]]  }
  0x3e   :  { %8918 = sst [smem:[#allocation75_spill]] %s7896_s13 }
  0x3f   :  { %s7911_s27 = sld [smem:[%s8879_s0 + %s7663_s22]]  }
  0x40   :  { %s7916_s13 = sld [smem:[%s8879_s0 + %s7664_s28]]  }
  0x41   :  { %8917 = sst [smem:[#allocation74_spill]] %s7886_s20 }
  0x42   :  { %s7906_s20 = sld [smem:[%s8879_s0 + %s7662_s15]]  }
  0x43   :  { %88 = vsyncpa [#allocation3], 0 }
  0x44   :  { %89 = vsyncpa [#allocation5], 0 }
  0x45   :  { %90 = vsyncpa [#allocation8], 0 }
  0x46   :  { %91 = vsyncpa [#allocation11], 0 }
  0x47   :  { %92 = vsyncpa [#allocation14], 0 }
  0x48   :  { %93 = vsyncpa [#allocation17], 0 }
  0x49   :  { %94 = vsyncpa [#allocation20], 0 }
  0x4a   :  { %95 = vsyncpa [#allocation23], 0 }
  0x4b   :  { %96 = vsyncpa [#allocation26], 0 }
  0x4c   :  { %97 = vsyncpa [#allocation29], 0 }
  0x4d   :  { %98 = vsyncpa [#allocation32], 0 }
  0x4e   :  { %99 = vsyncpa [#allocation35], 0 }
  0x4f   :  { %100 = vsyncpa [#allocation38], 0  ;;  %s7665_s7 = smov [#allocation4]   ;;  %s7666_s0 = smov [#allocation7]  }
  0x50   :  { %s127_s10 = sshll.u32 %s7665_s7, 4  ;;  %s149_s11 = sshll.u32 %s7666_s0, 4  ;;  %s128_s10 = int_to_ptr.vmem [resolvable:$true] %s127_s10  ;;  %s150_s11 = int_to_ptr.vmem [resolvable:$true] %s149_s11 }
  0x51   :  { %s7070_s15 = scalar_lea.hbm %s7736_s25, 16 }
  0x52   :  { %p7071_p0 = scmp.ne.s32.totalorder %s7736_s25, %s7070_s15  ;;  %p7074_p1 = scmp.lt.u32.totalorder %s7070_s15, %s7736_s25 }
  0x54   :  { %p7076_p2 = pnand %p7074_p1, %p7071_p0 }
  0x56   :  { %7079 = shalt.err (!%p7076_p2)
}
  0x57   :  { %s7080_s16 = scalar_lea.vmem %s128_s10, 16  ;;  %s7084_s18 = scalar_lea.vmem %s128_s10, 32 }
  0x58   :  { %p7081_p3 = scmp.ne.s32.totalorder %s128_s10, %s7080_s16  ;;  %p7085_p4 = scmp.lt.s32.totalorder %s128_s10, %s128_s10 }
  0x59   :  { %p7086_p5 = scmp.lt.s32.totalorder %s7084_s18, %s7080_s16 }
  0x5b   :  { %p7087_p6 = por %p7086_p5, %p7085_p4 }
  0x5d   :  { %p7088_p7 = pnand %p7087_p6, %p7081_p3 }
  0x5f   :  { %7091 = shalt.err (!%p7088_p7)
}
  0x60   :  { %130 = dma.hbm_to_vmem [thread:$0]  %s7736_s25, 16, %s128_s10, [#allocation5]  }
  0x61   :  { %s7092_s22 = scalar_lea.hbm %s7746_s3, 16 }
  0x62   :  { %p7093_p8 = scmp.ne.s32.totalorder %s7746_s3, %s7092_s22  ;;  %p7096_p9 = scmp.lt.u32.totalorder %s7092_s22, %s7746_s3 }
  0x64   :  { %p7098_p10 = pnand %p7096_p9, %p7093_p8 }
  0x66   :  { %7101 = shalt.err (!%p7098_p10)
}
  0x67   :  { %s7102_s23 = scalar_lea.vmem %s150_s11, 16  ;;  %s7106_s26 = scalar_lea.vmem %s150_s11, 32 }
  0x68   :  { %p7103_p11 = scmp.ne.s32.totalorder %s150_s11, %s7102_s23  ;;  %p7107_p12 = scmp.lt.s32.totalorder %s150_s11, %s150_s11 }
  0x69   :  { %p7108_p13 = scmp.lt.s32.totalorder %s7106_s26, %s7102_s23 }
  0x6b   :  { %p7109_p0 = por %p7108_p13, %p7107_p12 }
  0x6d   :  { %p7110_p1 = pnand %p7109_p0, %p7103_p11 }
  0x6f   :  { %7113 = shalt.err (!%p7110_p1)
}
  0x70   :  { %152 = dma.hbm_to_vmem [thread:$0]  %s7746_s3, 16, %s150_s11, [#allocation8]  }
  0x71   :  { %s7667_s28 = smov [#allocation10]   ;;  %s7668_s1 = smov [#allocation13]  }
  0x72   :  { %s170_s25 = sshll.u32 %s7667_s28, 4  ;;  %s195_s2 = sshll.u32 %s7668_s1, 4  ;;  %s171_s25 = int_to_ptr.vmem [resolvable:$true] %s170_s25  ;;  %s7926_s2 = int_to_ptr.vmem [resolvable:$true] %s195_s2 }
  0x73   :  { %s7114_s7 = scalar_lea.hbm %s7756_s14, 512 }
  0x74   :  { %p7115_p2 = scmp.ne.s32.totalorder %s7756_s14, %s7114_s7  ;;  %p7118_p3 = scmp.lt.u32.totalorder %s7114_s7, %s7756_s14 }
  0x76   :  { %p7120_p4 = pnand %p7118_p3, %p7115_p2 }
  0x78   :  { %7123 = shalt.err (!%p7120_p4)
}
  0x79   :  { %s7124_s10 = scalar_lea.vmem %s171_s25, 512  ;;  %p7129_p6 = scmp.lt.s32.totalorder %s171_s25, %s171_s25 }
  0x7a   :  { %p7125_p5 = scmp.ne.s32.totalorder %s171_s25, %s7124_s10  ;;  %p7130_p7 = scmp.lt.s32.totalorder %s7124_s10, %s7124_s10 }
  0x7c   :  { %p7131_p8 = por %p7130_p7, %p7129_p6 }
  0x7e   :  { %p7132_p9 = pnand %p7131_p8, %p7125_p5 }
  0x80   :  { %7135 = shalt.err (!%p7132_p9)
}
  0x81   :  { %s7669_s3 = smov 128   ;;  %s7670_s0 = smov 8  }
  0x82   :  { %176 = dma.hbm_to_vmem [thread:$0]  %s7756_s14, 512, %s171_s25, [#allocation11], %s7669_s3, %s7669_s3, %s7670_s0  }
  0x83   :  { %s7136_s11 = scalar_lea.hbm %s7771_s30, 16 }
  0x84   :  { %p7137_p10 = scmp.ne.s32.totalorder %s7771_s30, %s7136_s11  ;;  %p7140_p11 = scmp.lt.u32.totalorder %s7136_s11, %s7771_s30 }
  0x86   :  { %p7142_p12 = pnand %p7140_p11, %p7137_p10 }
  0x88   :  { %7145 = shalt.err (!%p7142_p12)
}
  0x89   :  { %s7146_s15 = scalar_lea.vmem %s7926_s2, 16  ;;  %s7150_s16 = scalar_lea.vmem %s7926_s2, 32 }
  0x8a   :  { %p7147_p13 = scmp.ne.s32.totalorder %s7926_s2, %s7146_s15  ;;  %p7151_p0 = scmp.lt.s32.totalorder %s7926_s2, %s7926_s2 }
  0x8b   :  { %p7152_p1 = scmp.lt.s32.totalorder %s7150_s16, %s7146_s15 }
  0x8d   :  { %p7153_p2 = por %p7152_p1, %p7151_p0 }
  0x8f   :  { %p7154_p3 = pnand %p7153_p2, %p7147_p13 }
  0x91   :  { %7157 = shalt.err (!%p7154_p3)
}
  0x92   :  { %198 = dma.hbm_to_vmem [thread:$0]  %s7771_s30, 16, %s7926_s2, [#allocation14]  }
  0x93   :  { %s7671_s14 = smov [#allocation16]   ;;  %s7672_s22 = smov [#allocation19]  }
  0x94   :  { %s220_s18 = sshll.u32 %s7671_s14, 4  ;;  %s245_s23 = sshll.u32 %s7672_s22, 4  ;;  %s221_s18 = int_to_ptr.vmem [resolvable:$true] %s220_s18  ;;  %s246_s23 = int_to_ptr.vmem [resolvable:$true] %s245_s23 }
  0x95   :  { %s7158_s26 = scalar_lea.hbm %s7796_s4, 1024 }
  0x96   :  { %p7159_p4 = scmp.ne.s32.totalorder %s7796_s4, %s7158_s26  ;;  %p7162_p5 = scmp.lt.u32.totalorder %s7158_s26, %s7796_s4 }
  0x98   :  { %p7164_p6 = pnand %p7162_p5, %p7159_p4 }
  0x9a   :  { %7167 = shalt.err (!%p7164_p6)
}
  0x9b   :  { %s7168_s28 = scalar_lea.vmem %s221_s18, 1024  ;;  %p7173_p8 = scmp.lt.s32.totalorder %s221_s18, %s221_s18 }
  0x9c   :  { %p7169_p7 = scmp.ne.s32.totalorder %s221_s18, %s7168_s28  ;;  %p7174_p9 = scmp.lt.s32.totalorder %s7168_s28, %s7168_s28 }
  0x9e   :  { %p7175_p10 = por %p7174_p9, %p7173_p8 }
  0xa0   :  { %p7176_p11 = pnand %p7175_p10, %p7169_p7 }
  0xa2   :  { %7179 = shalt.err (!%p7176_p11)
}
  0xa3   :  { %226 = dma.hbm_to_vmem [thread:$0]  %s7796_s4, 1024, %s221_s18, [#allocation17], %s7669_s3, %s7669_s3, %s7670_s0  }
  0xa4   :  { %s7180_s30 = scalar_lea.hbm %s7811_s6, 32 }
  0xa5   :  { %p7181_p12 = scmp.ne.s32.totalorder %s7811_s6, %s7180_s30  ;;  %p7184_p13 = scmp.lt.u32.totalorder %s7180_s30, %s7811_s6 }
  0xa7   :  { %p7186_p0 = pnand %p7184_p13, %p7181_p12 }
  0xa9   :  { %7189 = shalt.err (!%p7186_p0)
}
  0xaa   :  { %s7190_s25 = scalar_lea.vmem %s246_s23, 32  ;;  %p7195_p2 = scmp.lt.s32.totalorder %s246_s23, %s246_s23 }
  0xab   :  { %p7191_p1 = scmp.ne.s32.totalorder %s246_s23, %s7190_s25  ;;  %p7196_p3 = scmp.lt.s32.totalorder %s7190_s25, %s7190_s25 }
  0xad   :  { %p7197_p4 = por %p7196_p3, %p7195_p2 }
  0xaf   :  { %p7198_p5 = pnand %p7197_p4, %p7191_p1 }
  0xb1   :  { %7201 = shalt.err (!%p7198_p5)
}
  0xb2   :  { %248 = dma.hbm_to_vmem [thread:$0]  %s7811_s6, 32, %s246_s23, [#allocation20]  }
  0xb3   :  { %s7673_s1 = smov [#allocation22]   ;;  %s7202_s4 = scalar_lea.hbm %s7836_s17, 2048 }
  0xb4   :  { %s270_s2 = sshll.u32 %s7673_s1, 4  ;;  %p7203_p6 = scmp.ne.s32.totalorder %s7836_s17, %s7202_s4  ;;  %s271_s2 = int_to_ptr.vmem [resolvable:$true] %s270_s2 }
  0xb5   :  { %p7206_p7 = scmp.lt.u32.totalorder %s7202_s4, %s7836_s17 }
  0xb7   :  { %p7208_p8 = pnand %p7206_p7, %p7203_p6 }
  0xb9   :  { %7211 = shalt.err (!%p7208_p8)
}
  0xba   :  { %s7212_s7 = scalar_lea.vmem %s271_s2, 2048  ;;  %p7217_p10 = scmp.lt.s32.totalorder %s271_s2, %s271_s2 }
  0xbb   :  { %p7213_p9 = scmp.ne.s32.totalorder %s271_s2, %s7212_s7  ;;  %p7218_p11 = scmp.lt.s32.totalorder %s7212_s7, %s7212_s7 }
  0xbd   :  { %p7219_p12 = por %p7218_p11, %p7217_p10 }
  0xbf   :  { %p7220_p13 = pnand %p7219_p12, %p7213_p9 }
  0xc1   :  { %7223 = shalt.err (!%p7220_p13)
}
  0xc2   :  { %s7674_s10 = smov 256   ;;  %s7675_s6 = smov 16  }
  0xc3   :  { %276 = dma.hbm_to_vmem [thread:$0]  %s7836_s17, 2048, %s271_s2, [#allocation23], %s7674_s10, %s7674_s10, %s7675_s6  }
  0xc4   :  { %s7676_s11 = smov [#allocation25]   ;;  %s7677_s16 = smov [#allocation28]  }
  0xc5   :  { %s298_s15 = sshll.u32 %s7676_s11, 4  ;;  %s329_s14 = sshll.u32 %s7677_s16, 4  ;;  %s299_s15 = int_to_ptr.vmem [resolvable:$true] %s298_s15  ;;  %s330_s14 = int_to_ptr.vmem [resolvable:$true] %s329_s14 }
  0xc6   :  { %s7224_s18 = scalar_lea.hbm %s7856_s5, 2048 }
  0xc7   :  { %p7225_p0 = scmp.ne.s32.totalorder %s7856_s5, %s7224_s18  ;;  %p7228_p1 = scmp.lt.u32.totalorder %s7224_s18, %s7856_s5 }
  0xc9   :  { %p7230_p2 = pnand %p7228_p1, %p7225_p0 }
  0xcb   :  { %7233 = shalt.err (!%p7230_p2)
}
  0xcc   :  { %s7234_s22 = scalar_lea.vmem %s299_s15, 2048  ;;  %p7239_p4 = scmp.lt.s32.totalorder %s299_s15, %s299_s15 }
  0xcd   :  { %p7235_p3 = scmp.ne.s32.totalorder %s299_s15, %s7234_s22  ;;  %p7240_p5 = scmp.lt.s32.totalorder %s7234_s22, %s7234_s22 }
  0xcf   :  { %p7241_p6 = por %p7240_p5, %p7239_p4 }
  0xd1   :  { %p7242_p7 = pnand %p7241_p6, %p7235_p3 }
  0xd3   :  { %7245 = shalt.err (!%p7242_p7)
}
  0xd4   :  { %304 = dma.hbm_to_vmem [thread:$0]  %s7856_s5, 2048, %s299_s15, [#allocation26], %s7674_s10, %s7674_s10, %s7675_s6  }
  0xd5   :  { %s7246_s17 = scalar_lea.hbm %s7881_s24, 16 }
  0xd6   :  { %p7247_p8 = scmp.ne.s32.totalorder %s7881_s24, %s7246_s17  ;;  %p7250_p9 = scmp.lt.u32.totalorder %s7246_s17, %s7881_s24 }
  0xd8   :  { %p7252_p10 = pnand %p7250_p9, %p7247_p8 }
  0xda   :  { %7255 = shalt.err (!%p7252_p10)
}
  0xdb   :  { %s7256_s23 = scalar_lea.vmem %s330_s14, 16  ;;  %s7260_s26 = scalar_lea.vmem %s330_s14, 32 }
  0xdc   :  { %p7257_p11 = scmp.ne.s32.totalorder %s330_s14, %s7256_s23  ;;  %p7261_p12 = scmp.lt.s32.totalorder %s330_s14, %s330_s14 }
  0xdd   :  { %p7262_p13 = scmp.lt.s32.totalorder %s7260_s26, %s7256_s23 }
  0xdf   :  { %p7263_p0 = por %p7262_p13, %p7261_p12 }
  0xe1   :  { %p7264_p1 = pnand %p7263_p0, %p7257_p11 }
  0xe3   :  { %7267 = shalt.err (!%p7264_p1)
}
  0xe4   :  { %332 = dma.hbm_to_vmem [thread:$0]  %s7881_s24, 16, %s330_s14, [#allocation29]  }
  0xe5   :  { %s7678_s5 = smov [#allocation31]   ;;  %s7679_s30 = smov [#allocation34]  }
  0xe6   :  { %s351_s28 = sshll.u32 %s7678_s5, 4  ;;  %s371_s25 = sshll.u32 %s7679_s30, 4  ;;  %s352_s28 = int_to_ptr.vmem [resolvable:$true] %s351_s28  ;;  %s372_s25 = int_to_ptr.vmem [resolvable:$true] %s371_s25 }
  0xe7   :  { %s7268_s1 = scalar_lea.hbm %s7891_s9, 16 }
  0xe8   :  { %p7269_p2 = scmp.ne.s32.totalorder %s7891_s9, %s7268_s1  ;;  %p7272_p3 = scmp.lt.u32.totalorder %s7268_s1, %s7891_s9 }
  0xea   :  { %p7274_p4 = pnand %p7272_p3, %p7269_p2 }
  0xec   :  { %7277 = shalt.err (!%p7274_p4)
}
  0xed   :  { %s7278_s2 = scalar_lea.vmem %s352_s28, 16  ;;  %s7282_s4 = scalar_lea.vmem %s352_s28, 32 }
  0xee   :  { %p7279_p5 = scmp.ne.s32.totalorder %s352_s28, %s7278_s2  ;;  %p7283_p6 = scmp.lt.s32.totalorder %s352_s28, %s352_s28 }
  0xef   :  { %p7284_p7 = scmp.lt.s32.totalorder %s7282_s4, %s7278_s2 }
  0xf1   :  { %p7285_p8 = por %p7284_p7, %p7283_p6 }
  0xf3   :  { %p7286_p9 = pnand %p7285_p8, %p7279_p5 }
  0xf5   :  { %7289 = shalt.err (!%p7286_p9)
}
  0xf6   :  { %354 = dma.hbm_to_vmem [thread:$0]  %s7891_s9, 16, %s352_s28, [#allocation32]  }
  0xf7   :  { %s7290_s24 = scalar_lea.hbm %s7901_s12, 16 }
  0xf8   :  { %p7291_p10 = scmp.ne.s32.totalorder %s7901_s12, %s7290_s24  ;;  %p7294_p11 = scmp.lt.u32.totalorder %s7290_s24, %s7901_s12 }
  0xfa   :  { %p7296_p12 = pnand %p7294_p11, %p7291_p10 }
  0xfc   :  { %7299 = shalt.err (!%p7296_p12)
}
  0xfd   :  { %s7300_s7 = scalar_lea.vmem %s372_s25, 16  ;;  %s7304_s10 = scalar_lea.vmem %s372_s25, 32 }
  0xfe   :  { %p7301_p13 = scmp.ne.s32.totalorder %s372_s25, %s7300_s7  ;;  %p7305_p0 = scmp.lt.s32.totalorder %s372_s25, %s372_s25 }
  0xff   :  { %p7306_p1 = scmp.lt.s32.totalorder %s7304_s10, %s7300_s7 }
 0x101   :  { %p7307_p2 = por %p7306_p1, %p7305_p0 }
 0x103   :  { %p7308_p3 = pnand %p7307_p2, %p7301_p13 }
 0x105   :  { %7311 = shalt.err (!%p7308_p3)
}
 0x106   :  { %374 = dma.hbm_to_vmem [thread:$0]  %s7901_s12, 16, %s372_s25, [#allocation35]  }
 0x107   :  { %s7680_s9 = smov [#allocation2]   ;;  %s7681_s15 = smov [#allocation6]  }
 0x108   :  { %s114_s11 = sshll.u32 %s7680_s9, 4  ;;  %s136_s16 = sshll.u32 %s7681_s15, 4  ;;  %s115_s11 = int_to_ptr.vmem [resolvable:$true] %s114_s11  ;;  %s137_s16 = int_to_ptr.vmem [resolvable:$true] %s136_s16 }
 0x109   :  { %s7312_s14 = scalar_lea.hbm %s7731_s21, 1024 }
 0x10a   :  { %p7313_p4 = scmp.ne.s32.totalorder %s7731_s21, %s7312_s14  ;;  %p7316_p5 = scmp.lt.u32.totalorder %s7312_s14, %s7731_s21 }
 0x10c   :  { %p7318_p6 = pnand %p7316_p5, %p7313_p4 }
 0x10e   :  { %7321 = shalt.err (!%p7318_p6)
}
 0x10f   :  { %s7322_s18 = scalar_lea.vmem %s115_s11, 1024  ;;  %p7327_p8 = scmp.lt.s32.totalorder %s115_s11, %s115_s11 }
 0x110   :  { %p7323_p7 = scmp.ne.s32.totalorder %s115_s11, %s7322_s18  ;;  %p7328_p9 = scmp.lt.s32.totalorder %s7322_s18, %s7322_s18 }
 0x112   :  { %p7329_p10 = por %p7328_p9, %p7327_p8 }
 0x114   :  { %p7330_p11 = pnand %p7329_p10, %p7323_p7 }
 0x116   :  { %7333 = shalt.err (!%p7330_p11)
}
 0x117   :  { %120 = dma.hbm_to_vmem [thread:$0]  %s7731_s21, 1024, %s115_s11, [#allocation3], %s7669_s3, %s7669_s3, %s7670_s0  }
 0x118   :  { %s7334_s12 = scalar_lea.hbm %s7741_s29, 1024 }
 0x119   :  { %p7335_p12 = scmp.ne.s32.totalorder %s7741_s29, %s7334_s12  ;;  %p7338_p13 = scmp.lt.u32.totalorder %s7334_s12, %s7741_s29 }
 0x11b   :  { %p7340_p0 = pnand %p7338_p13, %p7335_p12 }
 0x11d   :  { %7343 = shalt.err (!%p7340_p0)
}
 0x11e   :  { %s7344_s22 = scalar_lea.vmem %s137_s16, 1024  ;;  %p7349_p2 = scmp.lt.s32.totalorder %s137_s16, %s137_s16 }
 0x11f   :  { %p7345_p1 = scmp.ne.s32.totalorder %s137_s16, %s7344_s22  ;;  %p7350_p3 = scmp.lt.s32.totalorder %s7344_s22, %s7344_s22 }
 0x121   :  { %p7351_p4 = por %p7350_p3, %p7349_p2 }
 0x123   :  { %p7352_p5 = pnand %p7351_p4, %p7345_p1 }
 0x125   :  { %7355 = shalt.err (!%p7352_p5)
}
 0x126   :  { %142 = dma.hbm_to_vmem [thread:$0]  %s7741_s29, 1024, %s137_s16, [#allocation5], %s7669_s3, %s7669_s3, %s7670_s0  }
 0x127   :  { %s7682_s21 = smov [#allocation9]   ;;  %s7683_s23 = smov [#allocation12]  }
 0x128   :  { %s158_s17 = sshll.u32 %s7682_s21, 4  ;;  %s183_s26 = sshll.u32 %s7683_s23, 4  ;;  %s159_s17 = int_to_ptr.vmem [resolvable:$true] %s158_s17  ;;  %s184_s26 = int_to_ptr.vmem [resolvable:$true] %s183_s26 }
 0x129   :  { %s7356_s5 = scalar_lea.hbm %s7751_s8, 1024 }
 0x12a   :  { %p7357_p6 = scmp.ne.s32.totalorder %s7751_s8, %s7356_s5  ;;  %p7360_p7 = scmp.lt.u32.totalorder %s7356_s5, %s7751_s8 }
 0x12c   :  { %p7362_p8 = pnand %p7360_p7, %p7357_p6 }
 0x12e   :  { %7365 = shalt.err (!%p7362_p8)
}
 0x12f   :  { %s7366_s28 = scalar_lea.vmem %s159_s17, 1024  ;;  %p7371_p10 = scmp.lt.s32.totalorder %s159_s17, %s159_s17 }
 0x130   :  { %p7367_p9 = scmp.ne.s32.totalorder %s159_s17, %s7366_s28  ;;  %p7372_p11 = scmp.lt.s32.totalorder %s7366_s28, %s7366_s28 }
 0x132   :  { %p7373_p12 = por %p7372_p11, %p7371_p10 }
 0x134   :  { %p7374_p13 = pnand %p7373_p12, %p7367_p9 }
 0x136   :  { %7377 = shalt.err (!%p7374_p13)
}
 0x137   :  { %164 = dma.hbm_to_vmem [thread:$0]  %s7751_s8, 1024, %s159_s17, [#allocation8], %s7669_s3, %s7669_s3, %s7670_s0  }
 0x138   :  { %s7378_s29 = scalar_lea.hbm %s7761_s19, 16 }
 0x139   :  { %p7379_p0 = scmp.ne.s32.totalorder %s7761_s19, %s7378_s29  ;;  %p7382_p1 = scmp.lt.u32.totalorder %s7378_s29, %s7761_s19 }
 0x13b   :  { %p7384_p2 = pnand %p7382_p1, %p7379_p0 }
 0x13d   :  { %7387 = shalt.err (!%p7384_p2)
}
 0x13e   :  { %s7388_s30 = scalar_lea.vmem %s184_s26, 16  ;;  %s7392_s25 = scalar_lea.vmem %s184_s26, 32 }
 0x13f   :  { %p7389_p3 = scmp.ne.s32.totalorder %s184_s26, %s7388_s30  ;;  %p7393_p4 = scmp.lt.s32.totalorder %s184_s26, %s184_s26 }
 0x140   :  { %p7394_p5 = scmp.lt.s32.totalorder %s7392_s25, %s7388_s30 }
 0x142   :  { %p7395_p6 = por %p7394_p5, %p7393_p4 }
 0x144   :  { %p7396_p7 = pnand %p7395_p6, %p7389_p3 }
 0x146   :  { %7399 = shalt.err (!%p7396_p7)
}
 0x147   :  { %s8919_s1 = sld [smem:[#allocation60_spill]]  ;;  %s7684_s8 = smov [#allocation15]  }
 0x148   :  { %186 = dma.hbm_to_vmem [thread:$0]  %s7761_s19, 16, %s184_s26, [#allocation11]  }
 0x149   :  { %s211_s2 = sshll.u32 %s7684_s8, 4  ;;  %s7685_s4 = smov [#allocation18]   ;;  %s212_s2 = int_to_ptr.vmem [resolvable:$true] %s211_s2 }
 0x14a   :  { %s233_s24 = sshll.u32 %s7685_s4, 4  ;;  %s234_s24 = int_to_ptr.vmem [resolvable:$true] %s233_s24 }
 0x14d   :  { %s7400_s7 = scalar_lea.hbm %s8919_s1, 32 }
 0x14e   :  { %p7401_p8 = scmp.ne.s32.totalorder %s8919_s1, %s7400_s7  ;;  %p7404_p9 = scmp.lt.u32.totalorder %s7400_s7, %s8919_s1 }
 0x150   :  { %p7406_p10 = pnand %p7404_p9, %p7401_p8 }
 0x152   :  { %7409 = shalt.err (!%p7406_p10)
}
 0x153   :  { %s7410_s10 = scalar_lea.vmem %s212_s2, 32  ;;  %p7415_p12 = scmp.lt.s32.totalorder %s212_s2, %s212_s2 }
 0x154   :  { %p7411_p11 = scmp.ne.s32.totalorder %s212_s2, %s7410_s10  ;;  %p7416_p13 = scmp.lt.s32.totalorder %s7410_s10, %s7410_s10 }
 0x156   :  { %p7417_p0 = por %p7416_p13, %p7415_p12 }
 0x158   :  { %p7418_p1 = pnand %p7417_p0, %p7411_p11 }
 0x15a   :  { %7421 = shalt.err (!%p7418_p1)
}
 0x15b   :  { %s8920_s9 = sld [smem:[#allocation61_spill]] }
 0x15c   :  { %214 = dma.hbm_to_vmem [thread:$0]  %s8919_s1, 32, %s212_s2, [#allocation14]  }
 0x161   :  { %s7422_s19 = scalar_lea.hbm %s8920_s9, 16 }
 0x162   :  { %p7423_p2 = scmp.ne.s32.totalorder %s8920_s9, %s7422_s19  ;;  %p7426_p3 = scmp.lt.u32.totalorder %s7422_s19, %s8920_s9 }
 0x164   :  { %p7428_p4 = pnand %p7426_p3, %p7423_p2 }
 0x166   :  { %7431 = shalt.err (!%p7428_p4)
}
 0x167   :  { %s7432_s11 = scalar_lea.vmem %s234_s24, 16  ;;  %s7436_s15 = scalar_lea.vmem %s234_s24, 32 }
 0x168   :  { %p7433_p5 = scmp.ne.s32.totalorder %s234_s24, %s7432_s11  ;;  %p7437_p6 = scmp.lt.s32.totalorder %s234_s24, %s234_s24 }
 0x169   :  { %p7438_p7 = scmp.lt.s32.totalorder %s7436_s15, %s7432_s11 }
 0x16b   :  { %p7439_p8 = por %p7438_p7, %p7437_p6 }
 0x16d   :  { %p7440_p9 = pnand %p7439_p8, %p7433_p5 }
 0x16f   :  { %7443 = shalt.err (!%p7440_p9)
}
 0x170   :  { %s8921_s16 = sld [smem:[#allocation64_spill]]  ;;  %s7686_s14 = smov [#allocation21]  }
 0x171   :  { %236 = dma.hbm_to_vmem [thread:$0]  %s8920_s9, 16, %s234_s24, [#allocation17]  }
 0x172   :  { %s257_s18 = sshll.u32 %s7686_s14, 4  ;;  %s7687_s12 = smov [#allocation24]   ;;  %s258_s18 = int_to_ptr.vmem [resolvable:$true] %s257_s18 }
 0x173   :  { %s284_s22 = sshll.u32 %s7687_s12, 4  ;;  %s285_s22 = int_to_ptr.vmem [resolvable:$true] %s284_s22 }
 0x176   :  { %s7444_s21 = scalar_lea.hbm %s8921_s16, 16 }
 0x177   :  { %p7445_p10 = scmp.ne.s32.totalorder %s8921_s16, %s7444_s21  ;;  %p7448_p11 = scmp.lt.u32.totalorder %s7444_s21, %s8921_s16 }
 0x179   :  { %p7450_p12 = pnand %p7448_p11, %p7445_p10 }
 0x17b   :  { %7453 = shalt.err (!%p7450_p12)
}
 0x17c   :  { %s7454_s17 = scalar_lea.vmem %s258_s18, 16  ;;  %s7458_s23 = scalar_lea.vmem %s258_s18, 32 }
 0x17d   :  { %p7455_p13 = scmp.ne.s32.totalorder %s258_s18, %s7454_s17  ;;  %p7459_p0 = scmp.lt.s32.totalorder %s258_s18, %s258_s18 }
 0x17e   :  { %p7460_p1 = scmp.lt.s32.totalorder %s7458_s23, %s7454_s17 }
 0x180   :  { %p7461_p2 = por %p7460_p1, %p7459_p0 }
 0x182   :  { %p7462_p3 = pnand %p7461_p2, %p7455_p13 }
 0x184   :  { %7465 = shalt.err (!%p7462_p3)
}
 0x185   :  { %s8922_s26 = sld [smem:[#allocation68_spill]] }
 0x186   :  { %260 = dma.hbm_to_vmem [thread:$0]  %s8921_s16, 16, %s258_s18, [#allocation20]  }
 0x18b   :  { %s7466_s5 = scalar_lea.hbm %s8922_s26, 1024 }
 0x18c   :  { %p7467_p4 = scmp.ne.s32.totalorder %s8922_s26, %s7466_s5  ;;  %p7470_p5 = scmp.lt.u32.totalorder %s7466_s5, %s8922_s26 }
 0x18e   :  { %p7472_p6 = pnand %p7470_p5, %p7467_p4 }
 0x190   :  { %7475 = shalt.err (!%p7472_p6)
}
 0x191   :  { %s7476_s28 = scalar_lea.vmem %s285_s22, 1024  ;;  %p7481_p8 = scmp.lt.s32.totalorder %s285_s22, %s285_s22 }
 0x192   :  { %p7477_p7 = scmp.ne.s32.totalorder %s285_s22, %s7476_s28  ;;  %p7482_p9 = scmp.lt.s32.totalorder %s7476_s28, %s7476_s28 }
 0x194   :  { %p7483_p10 = por %p7482_p9, %p7481_p8 }
 0x196   :  { %p7484_p11 = pnand %p7483_p10, %p7477_p7 }
 0x198   :  { %7487 = shalt.err (!%p7484_p11)
}
 0x199   :  { %s8923_s29 = sld [smem:[#allocation73_spill]]  ;;  %s7688_s30 = smov [#allocation27]  }
 0x19a   :  { %290 = dma.hbm_to_vmem [thread:$0]  %s8922_s26, 1024, %s285_s22, [#allocation23], %s7669_s3, %s7669_s3, %s7670_s0  }
 0x19b   :  { %s316_s25 = sshll.u32 %s7688_s30, 4  ;;  %s7689_s1 = smov [#allocation30]   ;;  %s317_s25 = int_to_ptr.vmem [resolvable:$true] %s316_s25 }
 0x19c   :  { %s338_s8 = sshll.u32 %s7689_s1, 4  ;;  %s339_s8 = int_to_ptr.vmem [resolvable:$true] %s338_s8 }
 0x19f   :  { %s7488_s2 = scalar_lea.hbm %s8923_s29, 1024 }
 0x1a0   :  { %p7489_p12 = scmp.ne.s32.totalorder %s8923_s29, %s7488_s2  ;;  %p7492_p13 = scmp.lt.u32.totalorder %s7488_s2, %s8923_s29 }
 0x1a2   :  { %p7494_p0 = pnand %p7492_p13, %p7489_p12 }
 0x1a4   :  { %7497 = shalt.err (!%p7494_p0)
}
 0x1a5   :  { %s7498_s4 = scalar_lea.vmem %s317_s25, 1024  ;;  %p7503_p2 = scmp.lt.s32.totalorder %s317_s25, %s317_s25 }
 0x1a6   :  { %p7499_p1 = scmp.ne.s32.totalorder %s317_s25, %s7498_s4  ;;  %p7504_p3 = scmp.lt.s32.totalorder %s7498_s4, %s7498_s4 }
 0x1a8   :  { %p7505_p4 = por %p7504_p3, %p7503_p2 }
 0x1aa   :  { %p7506_p5 = pnand %p7505_p4, %p7499_p1 }
 0x1ac   :  { %7509 = shalt.err (!%p7506_p5)
}
 0x1ad   :  { %s8924_s24 = sld [smem:[#allocation74_spill]] }
 0x1ae   :  { %322 = dma.hbm_to_vmem [thread:$0]  %s8923_s29, 1024, %s317_s25, [#allocation26], %s7669_s3, %s7669_s3, %s7670_s0  }
 0x1b3   :  { %s7510_s7 = scalar_lea.hbm %s8924_s24, 1024 }
 0x1b4   :  { %p7511_p6 = scmp.ne.s32.totalorder %s8924_s24, %s7510_s7  ;;  %p7514_p7 = scmp.lt.u32.totalorder %s7510_s7, %s8924_s24 }
 0x1b6   :  { %p7516_p8 = pnand %p7514_p7, %p7511_p6 }
 0x1b8   :  { %7519 = shalt.err (!%p7516_p8)
}
 0x1b9   :  { %s7520_s10 = scalar_lea.vmem %s339_s8, 1024  ;;  %p7525_p10 = scmp.lt.s32.totalorder %s339_s8, %s339_s8 }
 0x1ba   :  { %p7521_p9 = scmp.ne.s32.totalorder %s339_s8, %s7520_s10  ;;  %p7526_p11 = scmp.lt.s32.totalorder %s7520_s10, %s7520_s10 }
 0x1bc   :  { %p7527_p12 = por %p7526_p11, %p7525_p10 }
 0x1be   :  { %p7528_p13 = pnand %p7527_p12, %p7521_p9 }
 0x1c0   :  { %7531 = shalt.err (!%p7528_p13)
}
 0x1c1   :  { %s8925_s9 = sld [smem:[#allocation75_spill]]  ;;  %s7690_s19 = smov [#allocation33]  }
 0x1c2   :  { %344 = dma.hbm_to_vmem [thread:$0]  %s8924_s24, 1024, %s339_s8, [#allocation29], %s7669_s3, %s7669_s3, %s7670_s0  }
 0x1c3   :  { %s361_s11 = sshll.u32 %s7690_s19, 4  ;;  %s7691_s15 = smov [#allocation36]   ;;  %s362_s11 = int_to_ptr.vmem [resolvable:$true] %s361_s11 }
 0x1c4   :  { %s380_s16 = sshll.u32 %s7691_s15, 4  ;;  %s381_s16 = int_to_ptr.vmem [resolvable:$true] %s380_s16 }
 0x1c7   :  { %s7532_s14 = scalar_lea.hbm %s8925_s9, 16 }
 0x1c8   :  { %p7533_p0 = scmp.ne.s32.totalorder %s8925_s9, %s7532_s14  ;;  %p7536_p1 = scmp.lt.u32.totalorder %s7532_s14, %s8925_s9 }
 0x1ca   :  { %p7538_p2 = pnand %p7536_p1, %p7533_p0 }
 0x1cc   :  { %7541 = shalt.err (!%p7538_p2)
}
 0x1cd   :  { %s7542_s18 = scalar_lea.vmem %s362_s11, 16  ;;  %s7546_s12 = scalar_lea.vmem %s362_s11, 32 }
 0x1ce   :  { %p7543_p3 = scmp.ne.s32.totalorder %s362_s11, %s7542_s18  ;;  %p7547_p4 = scmp.lt.s32.totalorder %s362_s11, %s362_s11 }
 0x1cf   :  { %p7548_p5 = scmp.lt.s32.totalorder %s7546_s12, %s7542_s18 }
 0x1d1   :  { %p7549_p6 = por %p7548_p5, %p7547_p4 }
 0x1d3   :  { %p7550_p7 = pnand %p7549_p6, %p7543_p3 }
 0x1d5   :  { %7553 = shalt.err (!%p7550_p7)
}
 0x1d6   :  { %364 = dma.hbm_to_vmem [thread:$0]  %s8925_s9, 16, %s362_s11, [#allocation32]  }
 0x1d7   :  { %s7554_s22 = scalar_lea.hbm %s7906_s20, 1024 }
 0x1d8   :  { %p7555_p8 = scmp.ne.s32.totalorder %s7906_s20, %s7554_s22  ;;  %p7558_p9 = scmp.lt.u32.totalorder %s7554_s22, %s7906_s20 }
 0x1da   :  { %p7560_p10 = pnand %p7558_p9, %p7555_p8 }
 0x1dc   :  { %7563 = shalt.err (!%p7560_p10)
}
 0x1dd   :  { %s7564_s21 = scalar_lea.vmem %s381_s16, 1024  ;;  %p7569_p12 = scmp.lt.s32.totalorder %s381_s16, %s381_s16 }
 0x1de   :  { %p7565_p11 = scmp.ne.s32.totalorder %s381_s16, %s7564_s21  ;;  %p7570_p13 = scmp.lt.s32.totalorder %s7564_s21, %s7564_s21 }
 0x1e0   :  { %p7571_p0 = por %p7570_p13, %p7569_p12 }
 0x1e2   :  { %p7572_p1 = pnand %p7571_p0, %p7565_p11 }
 0x1e4   :  { %7575 = shalt.err (!%p7572_p1)
}
 0x1e5   :  { %386 = dma.hbm_to_vmem [thread:$0]  %s7906_s20, 1024, %s381_s16, [#allocation35], %s7669_s3, %s7669_s3, %s7670_s0  }
 0x1e6   :  { %s7692_s17 = smov [#allocation37]   ;;  %s7576_s26 = scalar_lea.hbm %s7911_s27, 16 }
 0x1e7   :  { %s393_s23 = sshll.u32 %s7692_s17, 4  ;;  %p7577_p2 = scmp.ne.s32.totalorder %s7911_s27, %s7576_s26  ;;  %s394_s23 = int_to_ptr.vmem [resolvable:$true] %s393_s23 }
 0x1e8   :  { %p7580_p3 = scmp.lt.u32.totalorder %s7576_s26, %s7911_s27 }
 0x1ea   :  { %p7582_p4 = pnand %p7580_p3, %p7577_p2 }
 0x1ec   :  { %7585 = shalt.err (!%p7582_p4)
}
 0x1ed   :  { %s7586_s5 = scalar_lea.vmem %s394_s23, 16  ;;  %s7590_s28 = scalar_lea.vmem %s394_s23, 32 }
 0x1ee   :  { %p7587_p5 = scmp.ne.s32.totalorder %s394_s23, %s7586_s5  ;;  %p7591_p6 = scmp.lt.s32.totalorder %s394_s23, %s394_s23 }
 0x1ef   :  { %p7592_p7 = scmp.lt.s32.totalorder %s7590_s28, %s7586_s5 }
 0x1f1   :  { %p7593_p8 = por %p7592_p7, %p7591_p6 }
 0x1f3   :  { %p7594_p9 = pnand %p7593_p8, %p7587_p5 }
 0x1f5   :  { %7597 = shalt.err (!%p7594_p9)
}
 0x1f6   :  { %396 = dma.hbm_to_vmem [thread:$0]  %s7911_s27, 16, %s394_s23, [#allocation38]  }
 0x1f7   :  { %7598 = dma.done.wait [#allocation3], 1024  }
 0x1f8   :  { %7599 = vsyncadd [#allocation3], 4294966272 }
 0x1f9   :  { %7600 = dma.done.wait [#allocation5], 1040  }
 0x1fa   :  { %7601 = vsyncadd [#allocation5], 4294966256 }
 0x1fb   :  { %7602 = dma.done.wait [#allocation8], 1040  }
 0x1fc   :  { %7603 = vsyncadd [#allocation8], 4294966256 }
 0x1fd   :  { %7604 = dma.done.wait [#allocation11], 528  }
 0x1fe   :  { %7605 = vsyncadd [#allocation11], 4294966768 }
 0x1ff   :  { %7606 = dma.done.wait [#allocation14], 48  }
 0x200   :  { %7607 = vsyncadd [#allocation14], 4294967248 }
 0x201   :  { %7608 = dma.done.wait [#allocation17], 1040  }
 0x202   :  { %7609 = vsyncadd [#allocation17], 4294966256 }
 0x203   :  { %7610 = dma.done.wait [#allocation20], 48  }
 0x204   :  { %7611 = vsyncadd [#allocation20], 4294967248 }
 0x205   :  { %7612 = dma.done.wait [#allocation23], 3072  }
 0x206   :  { %7613 = vsyncadd [#allocation23], 4294964224 }
 0x207   :  { %7614 = dma.done.wait [#allocation26], 3072  }
 0x208   :  { %7615 = vsyncadd [#allocation26], 4294964224 }
 0x209   :  { %7616 = dma.done.wait [#allocation29], 1040  }
 0x20a   :  { %7617 = vsyncadd [#allocation29], 4294966256 }
 0x20b   :  { %7618 = dma.done.wait [#allocation32], 32  }
 0x20c   :  { %7619 = vsyncadd [#allocation32], 4294967264 }
 0x20d   :  { %7620 = dma.done.wait [#allocation35], 1040  }
 0x20e   :  { %7621 = vsyncadd [#allocation35], 4294966256 }
 0x20f   :  { %7622 = dma.done.wait [#allocation38], 16  }
 0x210   :  { %7623 = vsyncadd [#allocation38], 4294967280  ;;  %v7693_v0 = vmov 0.0|0.0   ;;  %vm7694_vm0 = vmmov 0   ;;  %v7695_v1 = vmov 0.0   ;;  %v470_v2 = vld [vmem:[#allocation2] sm:$0xff] }
 0x211   :  { %6543 = vmatprep.subr.bf16.mxu0 %v7693_v0  ;;  %6193 = vmatprep.mubr.msk.f32.mxu0 %vm7694_vm0, %v7695_v1  ;;  %v471_v3 = vld [vmem:[#allocation2 + $0x8] sm:$0xff]  ;;  %v472_v4 = vld [vmem:[#allocation2 + $0x10] sm:$0xff]  ;;  %v473_v6 = vld [vmem:[#allocation2 + $0x18] sm:$0xff]  ;;  %s8926_s20 = sld [smem:[#allocation52_spill]]  ;;  %s8927_s27 = sld [smem:[#allocation56_spill]]  ;;  %vm485_vm1 = vcmask 523264  }
 0x212   :  { %6555 = vmatprep.subr.bf16.mxu1 %v7693_v0  ;;  %6212 = vmatprep.mubr.msk.f32.mxu1 %vm7694_vm0, %v7695_v1  ;;  %v6544_v5 = vpack.c.bf16 %v471_v3, %v470_v2  ;;  %v6547_v7 = vpack.c.bf16 %v473_v6, %v472_v4  ;;  %v474_v8 = vld [vmem:[#allocation2 + $0x20] sm:$0xff]  ;;  %v475_v9 = vld [vmem:[#allocation2 + $0x28] sm:$0xff]  ;;  %v476_v11 = vld [vmem:[#allocation2 + $0x30] sm:$0xff]  ;;  %s8928_s3 = sld [smem:[#allocation53_spill]]  ;;  %s8929_s0 = sld [smem:[#allocation54_spill]]  ;;  %vm687_vm2 = vcmask 261120  }
 0x213   :  { %v6550_v10 = vpack.c.bf16 %v475_v9, %v474_v8  ;;  %v477_v12 = vld [vmem:[#allocation2 + $0x38] sm:$0xff]  ;;  %v683_v14 = vld [vmem:[#allocation10] sm:$0xff]  ;;  %v684_v15 = vld [vmem:[#allocation10 + $0x8] sm:$0xff]  ;;  %vm888_vm3 = vcmask 64512   ;;  %s8930_s29 = sld [smem:[#allocation55_spill]]  ;;  %s8931_s30 = sld [smem:[#allocation57_spill]] }
 0x214   :  { %6545 = vmatpush3.bf16.msra.mxu0 %v6544_v5  ;;  %v6553_v13 = vpack.c.bf16 %v477_v12, %v476_v11  ;;  %v6568_v17 = vpack.c.bf16 %v684_v15, %v683_v14  ;;  %v685_v18 = vld [vmem:[#allocation10 + $0x10] sm:$0xff]  ;;  %v686_v19 = vld [vmem:[#allocation10 + $0x18] sm:$0xff]  ;;  %v587_v26 = vld [vmem:[#allocation6 + $0x8] sm:$0xff]  ;;  %s8932_s25 = sld [smem:[#allocation59_spill]]  ;;  %s8933_s1 = sld [smem:[#allocation58_spill]]  ;;  %vm1326_vm5 = vcmask 130048  }
 0x215   :  { %6546 = vmatprep.subr.bf16.mxu0 %v7693_v0  ;;  %v6571_v20 = vpack.c.bf16 %v686_v19, %v685_v18  ;;  %v586_v25 = vld [vmem:[#allocation6] sm:$0xff]  ;;  %v588_v28 = vld [vmem:[#allocation6 + $0x10] sm:$0xff]  ;;  %v589_v29 = vld [vmem:[#allocation6 + $0x18] sm:$0xff]  ;;  %s7697_s8 = smov 64   ;;  %s7698_s2 = smov 48   ;;  %vm2674_vm6 = vcmask 392192  }
 0x216   :  { %v6556_v27 = vpack.c.bf16 %v587_v26, %v586_v25  ;;  %v6559_v30 = vpack.c.bf16 %v589_v29, %v588_v28  ;;  %v590_v31 = vld [vmem:[#allocation6 + $0x20] sm:$0xff]  ;;  %v591_v32 = vld [vmem:[#allocation6 + $0x28] sm:$0xff]  ;;  %v592_v34 = vld [vmem:[#allocation6 + $0x30] sm:$0xff]  ;;  %s7699_s4 = smov 112   ;;  %s7700_s24 = smov 32  }
 0x217   :  { %v469_v16 = vld [vmem:[%s8926_s20] sm:$0x3]  ;;  %v6562_v33 = vpack.c.bf16 %v591_v32, %v590_v31  ;;  %v674_v2 = vld [vmem:[#allocation9] sm:$0xff]  ;;  %v675_v3 = vld [vmem:[#allocation9 + $0x8] sm:$0xff]  ;;  %s7701_s7 = smov 96   ;;  %s7702_s10 = smov 80  }
 0x218   :  { %6548 = vmatpush3.bf16.msra.mxu0 %v6547_v7  ;;  %v880_v21 = vld [vmem:[%s8927_s27] sm:$0xff]  ;;  %v879_v24 = vld [vmem:[%s8929_s0 + $0x8] sm:$0xff]  ;;  %6557 = vmatpush3.bf16.msra.mxu1 %v6556_v27  ;;  %v6574_v7 = vpack.c.bf16 %v675_v3, %v674_v2  ;;  %v676_v9 = vld [vmem:[#allocation9 + $0x10] sm:$0xff]  ;;  %s8934_s9 = sld [smem:[#allocation62_spill]]  ;;  %s8935_s19 = sld [smem:[#allocation65_spill]] }
 0x219   :  { %6549 = vmatprep.subr.bf16.mxu0 %v7693_v0  ;;  %v682_v22 = vld [vmem:[%s8928_s3] sm:$0x3]  ;;  %6558 = vmatprep.subr.bf16.mxu1 %v7693_v0  ;;  %v678_v12 = vld [vmem:[#allocation9 + $0x20] sm:$0xff]  ;;  %v989_v3 = vld [vmem:[%s8931_s30 + $0x78] sm:$0xff]  ;;  %s8936_s11 = sld [smem:[#allocation63_spill]]  ;;  %s8937_s15 = sld [smem:[#allocation66_spill]] }
 0x21a   :  { %v878_v23 = vld [vmem:[%s8929_s0] sm:$0xff]  ;;  %v971_v18 = vld [vmem:[%s8930_s29 + $0x8] sm:$0xff]  ;;  %s8938_s16 = sld [smem:[#allocation67_spill]]  ;;  %s8940_s14 = sld [smem:[#allocation71_spill]] }
 0x21b   :  { %v593_v35 = vld [vmem:[#allocation6 + $0x38] sm:$0xff]  ;;  %v5846_v15 = vld [vmem:[#allocation13] ss:$0 sm:$0xff]  ;;  %s8941_s18 = sld [smem:[#allocation70_spill]]  ;;  %s8942_s12 = sld [smem:[#allocation72_spill]] }
 0x21c   :  { %6551 = vmatpush3.bf16.msra.mxu0 %v6550_v10  ;;  %6560 = vmatpush3.bf16.msra.mxu1 %v6559_v30  ;;  %v6565_v36 = vpack.c.bf16 %v593_v35, %v592_v34  ;;  %v5839_v37 = vld [vmem:[#allocation4] ss:$0 sm:$0xff] }
 0x21d   :  { %6552 = vmatprep.subr.bf16.mxu0 %v7693_v0  ;;  %6561 = vmatprep.subr.bf16.mxu1 %v7693_v0  ;;  %v677_v10 = vld [vmem:[#allocation9 + $0x18] sm:$0xff] }
 0x21e   :  { %v6577_v11 = vpack.c.bf16 %v677_v10, %v676_v9  ;;  %v681_v26 = vld [vmem:[#allocation9 + $0x38] sm:$0xff]  ;;  %v996_v9 = vld [vmem:[%s8931_s30 + $0xb0] sm:$0xff] }
 0x21f   :  { %v986_v2 = vld [vmem:[%s8931_s30 + $0x60] sm:$0xff] }
 0x220   :  { %6554 = vmatpush3.bf16.msra.mxu0 %v6553_v13  ;;  %6563 = vmatpush3.bf16.msra.mxu1 %v6562_v33  ;;  %v679_v13 = vld [vmem:[#allocation9 + $0x28] sm:$0xff] }
 0x221   :  { %6567 = vmatprep.subr.bf16.mxu0 %v7693_v0  ;;  %6564 = vmatprep.subr.bf16.mxu1 %v7693_v0  ;;  %v6580_v14 = vpack.c.bf16 %v679_v13, %v678_v12  ;;  %v995_v12 = vld [vmem:[%s8931_s30 + $0xa8] sm:$0xff] }
 0x223   :  { %6194 = vmatmul.mubr.msk.f32.vlgmr.msra.gmra.mrb[0].mxu0 %vm485_vm1, %v469_v16 }
 0x224   :  { %6569 = vmatpush3.bf16.msra.mxu0 %v6568_v17  ;;  %6223 = vmatprep.mubr.msk.f32.mxu0 %vm7694_vm0, %v7695_v1 }
 0x225   :  { %6570 = vmatprep.subr.bf16.mxu0 %v7693_v0  ;;  %6566 = vmatpush3.bf16.msra.mxu1 %v6565_v36 }
 0x226   :  { %6573 = vmatprep.subr.bf16.mxu1 %v7693_v0 }
 0x228   :  { %6572 = vmatpush3.bf16.msra.mxu0 %v6571_v20  ;;  %v970_v20 = vld [vmem:[%s8930_s29] sm:$0xff] }
 0x229   :  { %6245 = vmatprep.subr.mxu0 %v880_v21 }
 0x22b   :  { %6224 = vmatmul.mubr.msk.f32.vlgmr.msra.gmra.mrb[2].mxu0 %vm687_vm2, %v682_v22 }
 0x22c   :  { %6246 = vmatpush3.msra.mxu0 %v880_v21  ;;  %6247 = vmatprep.mubr.msk.f32.mxu0 %vm888_vm3, %v878_v23 }
 0x22f   :  { %6248 = vmatmul.mubr.msk.f32.vlgmr.msra.gmra.mrb[4].mxu0 %vm888_vm3, %v879_v24 }
 0x230   :  { %1083 = vmatprep.mubr.f32.mxu0 %v7695_v1 }
 0x2f6   :  { %v555_v38 = vpop.f32.mrb[0].mxu0 }
 0x2f7   :  { %v556_v39 = vadd.f32 %v5839_v37, %v555_v38  ;;  %v6195_v40 = vpop.f32.mrb[1].mxu0  ;;  %v5841_v38 = vld [vmem:[#allocation7] ss:$0 sm:$0xff] }
 0x2f9   :  { %v560_v41 = vmul.f32 0.70710677, %v556_v39  ;;  %v559_v5 = vmul.f32 0.5, %v556_v39 }
 0x2fb   :  { %v561_v42 = vand.u32 2147483647, %v560_v41  ;;  %vm581_vm4 = vcmp.ge.f32.partialorder %v560_v41, 0.0 }
 0x2fd   :  { %v562_v43 = vmul.f32 0.3275911, %v561_v42  ;;  %v575_v47 = vsub.f32 0.0, %v561_v42 }
 0x2fe   :  { %v8078_v44 = vpop.f32.mrb[2].mxu0 }
 0x2ff   :  { %v563_v45 = vadd.f32 1.0, %v562_v43  ;;  %v6225_v46 = vpop.f32.mrb[3].mxu0  ;;  %v576_v49 = vmul.f32 %v575_v47, %v561_v42  ;;  %v975_v42 = vld [vmem:[%s8931_s30 + $0x8] sm:$0xff]  ;;  %v978_v43 = vld [vmem:[%s8931_s30 + $0x20] sm:$0xff]  ;;  %v977_v47 = vld [vmem:[%s8931_s30 + $0x18] sm:$0xff] }
 0x300   :  { %v974_v46 = vld [vmem:[%s8931_s30] sm:$0xff] }
 0x301   :  { %6936 = vrcp.f32 %v563_v45  ;;  %v577_v52 = vmul.f32 1.442695, %v576_v49  ;;  %v6585_v45 = vpack.c.bf16 %v978_v43, %v975_v42  ;;  %v976_v49 = vld [vmem:[%s8931_s30 + $0x10] sm:$0xff]  ;;  %v1213_v42 = vld [vmem:[%s8932_s25 + $0x8] sm:$0xff]  ;;  %v1215_v43 = vld [vmem:[%s8932_s25 + $0x18] sm:$0xff] }
 0x302   :  { %v6249_v16 = vpop.f32.mrb[4].mxu0 }
 0x303   :  { %6938 = vpow2.f32 %v577_v52  ;;  %v967_v17 = vadd.f32 %v6249_v16, %v5846_v15  ;;  %v961_v19 = vpop.f32.mrb[5].mxu0  ;;  %6586 = vmatprep.subr.bf16.mxu0 %v6585_v45  ;;  %v981_v52 = vld [vmem:[%s8931_s30 + $0x38] sm:$0xff]  ;;  %v1212_v45 = vld [vmem:[%s8932_s25] sm:$0xff] }
 0x304   :  { %v962_v21 = vadd.f32 %v5846_v15, %v961_v19  ;;  %v997_v15 = vld [vmem:[%s8931_s30 + $0xb8] sm:$0xff] }
 0x305   :  { %v8088_v22 = vadd.f32 %v971_v18, %v967_v17  ;;  %v5845_v18 = vld [vmem:[#allocation12] ss:$0 sm:$0xff] }
 0x306   :  { %v8090_v23 = vadd.f32 %v970_v20, %v962_v21 }
 0x307   :  { %v1174_v25 = vsel %vm485_vm1, %v8088_v22, 0.0 }
 0x308   :  { %v1171_v24 = vsel %vm485_vm1, %v8090_v23, 0.0 }
 0x309   :  { %1172 = vadd.xlane.f32.xlu0 %v1171_v24 }
 0x30b   :  { %v6937_v48 = vpop.eup %6936 }
 0x30c   :  { %v566_v50 = vmul.f32 1.0614054, %v6937_v48 }
 0x30d   :  { %v6939_v60 = vpop.eup %6938  ;;  %1175 = vadd.xlane.f32.xlu0 %v1174_v25  ;;  %v7696_v25 = vmov 1966171168  }
 0x30e   :  { %v567_v51 = vadd.f32 -1.4531521, %v566_v50  ;;  %v979_v50 = vld [vmem:[%s8931_s30 + $0x28] sm:$0xff] }
 0x310   :  { %v568_v53 = vmul.f32 %v6937_v48, %v567_v51  ;;  %v6601_v51 = vpack.c.bf16 %v979_v50, %v976_v49  ;;  %v1219_v49 = vld [vmem:[%s8932_s25 + $0x38] sm:$0xff] }
 0x312   :  { %v569_v54 = vadd.f32 1.4214138, %v568_v53  ;;  %v984_v53 = vld [vmem:[%s8931_s30 + $0x50] sm:$0xff] }
 0x314   :  { %v570_v55 = vmul.f32 %v6937_v48, %v569_v54  ;;  %v6589_v54 = vpack.c.bf16 %v984_v53, %v981_v52  ;;  %v1216_v52 = vld [vmem:[%s8932_s25 + $0x20] sm:$0xff]  ;;  %v1218_v53 = vld [vmem:[%s8932_s25 + $0x30] sm:$0xff] }
 0x316   :  { %v571_v56 = vadd.f32 -0.28449672, %v570_v55  ;;  %v980_v55 = vld [vmem:[%s8931_s30 + $0x30] sm:$0xff] }
 0x318   :  { %v572_v57 = vmul.f32 %v6937_v48, %v571_v56  ;;  %v983_v56 = vld [vmem:[%s8931_s30 + $0x48] sm:$0xff] }
 0x31a   :  { %v573_v58 = vadd.f32 0.2548296, %v572_v57  ;;  %v6591_v57 = vpack.c.bf16 %v983_v56, %v980_v55  ;;  %v1223_v55 = vld [vmem:[%s8932_s25 + $0x58] sm:$0xff]  ;;  %v6623_v56 = vpack.c.bf16 %v1218_v53, %v1216_v52 }
 0x31c   :  { %v574_v59 = vmul.f32 %v6937_v48, %v573_v58  ;;  %v6587_v48 = vpack.c.bf16 %v977_v47, %v974_v46  ;;  %v982_v58 = vld [vmem:[%s8931_s30 + $0x40] sm:$0xff]  ;;  %v6617_v46 = vpack.c.bf16 %v1215_v43, %v1213_v42  ;;  %v1214_v47 = vld [vmem:[%s8932_s25 + $0x10] sm:$0xff] }
 0x31d   :  { %v6619_v50 = vpack.c.bf16 %v1214_v47, %v1212_v45 }
 0x31e   :  { %v579_v61 = vmul.f32 %v6939_v60, %v574_v59  ;;  %6588 = vmatpush1.bf16.msra.mxu0 %v6587_v48  ;;  %v985_v59 = vld [vmem:[%s8931_s30 + $0x58] sm:$0xff]  ;;  %v1217_v48 = vld [vmem:[%s8932_s25 + $0x28] sm:$0xff] }
 0x31f   :  { %6590 = vmatprep.subr.bf16.mxu0 %v6589_v54  ;;  %v6605_v60 = vpack.c.bf16 %v985_v59, %v982_v58  ;;  %v1221_v54 = vld [vmem:[%s8932_s25 + $0x48] sm:$0xff]  ;;  %v1220_v58 = vld [vmem:[%s8932_s25 + $0x40] sm:$0xff]  ;;  %v1222_v59 = vld [vmem:[%s8932_s25 + $0x50] sm:$0xff] }
 0x320   :  { %v580_v62 = vsub.f32 1.0, %v579_v61  ;;  %v987_v61 = vld [vmem:[%s8931_s30 + $0x68] sm:$0xff] }
 0x322   :  { %v582_v63 = vsub.f32 0.0, %v580_v62  ;;  %6592 = vmatpush1.bf16.msra.mxu0 %v6591_v57  ;;  %v6625_v57 = vpack.c.bf16 %v1223_v55, %v1221_v54 }
 0x324   :  { %v583_v4 = vsel %vm581_vm4, %v580_v62, %v582_v63  ;;  %v990_v62 = vld [vmem:[%s8931_s30 + $0x80] sm:$0xff] }
 0x325   :  { %v584_v6 = vadd.f32 1.0, %v583_v4  ;;  %v6593_v63 = vpack.c.bf16 %v990_v62, %v987_v61  ;;  %v6595_v4 = vpack.c.bf16 %v989_v3, %v986_v2  ;;  %v1225_v61 = vld [vmem:[%s8932_s25 + $0x68] sm:$0xff]  ;;  %v1227_v62 = vld [vmem:[%s8932_s25 + $0x78] sm:$0xff]  ;;  %v1224_v2 = vld [vmem:[%s8932_s25 + $0x60] sm:$0xff] }
 0x326   :  { %v1226_v3 = vld [vmem:[%s8932_s25 + $0x70] sm:$0xff] }
 0x327   :  { %v585_v8 = vmul.f32 %v584_v6, %v559_v5  ;;  %v988_v5 = vld [vmem:[%s8931_s30 + $0x70] sm:$0xff]  ;;  %v991_v6 = vld [vmem:[%s8931_s30 + $0x88] sm:$0xff]  ;;  %6594 = vmatprep.subr.bf16.mxu0 %v6593_v63  ;;  %v6629_v63 = vpack.c.bf16 %v1227_v62, %v1225_v61 }
 0x328   :  { %6596 = vmatpush1.bf16.msra.mxu0 %v6595_v4  ;;  %v6631_v4 = vpack.c.bf16 %v1226_v3, %v1224_v2 }
 0x329   :  { %6213 = vmatmul.mubr.msk.f32.vlgmr.msra.gmra.mrb[0].mxu1 %vm485_vm1, %v585_v8  ;;  %v993_v8 = vld [vmem:[%s8931_s30 + $0x98] sm:$0xff] }
 0x32a   :  { %6575 = vmatpush3.bf16.msra.mxu1 %v6574_v7  ;;  %6242 = vmatprep.mubr.msk.f32.mxu1 %vm7694_vm0, %v7695_v1  ;;  %v6609_v7 = vpack.c.bf16 %v991_v6, %v988_v5  ;;  %v6597_v10 = vpack.c.bf16 %v996_v9, %v993_v8  ;;  %v8176_v5 = vld [vmem:[%s8933_s1] sm:$0x7] }
 0x32b   :  { %6576 = vmatprep.subr.bf16.mxu1 %v7693_v0 }
 0x32c   :  { %6598 = vmatprep.subr.bf16.mxu0 %v6597_v10 }
 0x32e   :  { %6578 = vmatpush3.bf16.msra.mxu1 %v6577_v11  ;;  %v992_v11 = vld [vmem:[%s8931_s30 + $0x90] sm:$0xff] }
 0x32f   :  { %6579 = vmatprep.subr.bf16.mxu1 %v7693_v0  ;;  %v6599_v13 = vpack.c.bf16 %v995_v12, %v992_v11 }
 0x331   :  { %6600 = vmatpush1.bf16.msra.mxu0 %v6599_v13 }
 0x332   :  { %6581 = vmatpush3.bf16.msra.mxu1 %v6580_v14  ;;  %v994_v14 = vld [vmem:[%s8931_s30 + $0xa0] sm:$0xff]  ;;  %6618 = vmatprep.subr.bf16.mxu0 %v6617_v46 }
 0x333   :  { %6582 = vmatprep.subr.bf16.mxu1 %v7693_v0  ;;  %v680_v0 = vld [vmem:[#allocation9 + $0x30] sm:$0xff]  ;;  %v6613_v16 = vpack.c.bf16 %v997_v15, %v994_v14 }
 0x334   :  { %v6583_v27 = vpack.c.bf16 %v681_v26, %v680_v0  ;;  %v849_v0 = vunpack.c.l.s4 %v7696_v25  ;;  %v851_v26 = vlaneseq }
 0x336   :  { %6584 = vmatpush3.bf16.msra.mxu1 %v6583_v27  ;;  %v850_v27 = vunpack.c.0.s8 %v849_v0 }
 0x337   :  { %6602 = vmatprep.subr.bf16.mxu1 %v6601_v51 }
 0x396   :  { %v1173_v28 = vpop.xlane.xlu0 %1172 }
 0x397   :  { %v1178_v29 = vmul.f32 0.015625, %v1173_v28  ;;  %v8135_v28 = vshrl.u32 %v851_v26, 7 }
 0x399   :  { %v8097_v30 = vsub.f32 %v8090_v23, %v1178_v29 }
 0x39a   :  { %v1176_v31 = vpop.xlane.xlu0 %1175 }
 0x39b   :  { %v1179_v32 = vmul.f32 0.015625, %v1176_v31  ;;  %v1182_v33 = vmul.f32 %v8097_v30, %v8097_v30 }
 0x39d   :  { %v8102_v34 = vsub.f32 %v8088_v22, %v1179_v32  ;;  %v1184_v35 = vsel %vm485_vm1, %v1182_v33, 0.0  ;;  %v853_v33 = vsub.s32 %v850_v27, %v8135_v28 }
 0x39e   :  { %1185 = vadd.xlane.f32.xlu1 %v1184_v35 }
 0x39f   :  { %v1183_v36 = vmul.f32 %v8102_v34, %v8102_v34 }
 0x3a1   :  { %v1187_v37 = vsel %vm485_vm1, %v1183_v36, 0.0 }
 0x3a2   :  { %1188 = vadd.xlane.f32.xlu1 %v1187_v37 }
 0x3fc   :  { %v670_v39 = vpop.f32.mrb[0].mxu1 }
 0x3fd   :  { %v671_v40 = vadd.f32 %v5841_v38, %v670_v39  ;;  %v6214_v41 = vpop.f32.mrb[1].mxu1 }
 0x3ff   :  { %6243 = vmatmul.mubr.msk.f32.vlgmr.msra.gmra.mrb[2].mxu1 %vm485_vm1, %v671_v40 }
 0x400   :  { %6604 = vmatpush3.bf16.msra.mxu1 %v6601_v51  ;;  %v6621_v51 = vpack.c.bf16 %v1219_v49, %v1217_v48 }
 0x401   :  { %6606 = vmatprep.subr.bf16.mxu1 %v6605_v60 }
 0x404   :  { %6608 = vmatpush3.bf16.msra.mxu1 %v6605_v60  ;;  %v6627_v60 = vpack.c.bf16 %v1222_v59, %v1220_v58 }
 0x405   :  { %6610 = vmatprep.subr.bf16.mxu1 %v6609_v7 }
 0x408   :  { %6612 = vmatpush3.bf16.msra.mxu1 %v6609_v7 }
 0x409   :  { %6614 = vmatprep.subr.bf16.mxu1 %v6613_v16 }
 0x40c   :  { %6616 = vmatpush3.bf16.msra.mxu1 %v6613_v16 }
 0x40d   :  { %6274 = vmatprep.subr.mxu1 %v7695_v1 }
 0x4d2   :  { %v830_v17 = vpop.f32.mrb[2].mxu1 }
 0x4d3   :  { %v831_v19 = vadd.f32 %v830_v17, %v8078_v44  ;;  %v6244_v20 = vpop.f32.mrb[3].mxu1  ;;  %v8139_v44 = vsub.s32 0, %v8135_v28  ;;  %v1186_v17 = vpop.xlane.xlu1 %1185 }
 0x4d5   :  { %v841_v21 = vadd.f32 %v5845_v18, %v831_v19  ;;  %v1003_v6 = vrot.slane %v8176_v5, %v8139_v44  ;;  %v1190_v18 = vmul.f32 0.015625, %v1186_v17 }
 0x4d7   :  { %v842_v24 = vmul.f32 0.5, %v841_v21  ;;  %v1189_v19 = vpop.xlane.xlu1 %1188  ;;  %v1192_v20 = vadd.f32 1e-06, %v1190_v18 }
 0x4d9   :  { %6940 = vtanh.f32 %v842_v24 }
 0x4da   :  { %6942 = vrsqrt.f32 %v1192_v20 }
 0x4e3   :  { %v6941_v29 = vpop.eup %6940 }
 0x4e4   :  { %v844_v31 = vadd.f32 1.0, %v6941_v29  ;;  %v6943_v25 = vpop.eup %6942 }
 0x4e5   :  { %v1196_v0 = vmul.f32 %v6943_v25, %v8097_v30 }
 0x4e6   :  { %v845_v32 = vmul.f32 0.5, %v844_v31 }
 0x4e8   :  { %v846_v35 = vmul.f32 %v845_v32, %v841_v21  ;;  %v1191_v21 = vmul.f32 0.015625, %v1189_v19 }
 0x4ea   :  { %v854_v36 = vrot.slane %v846_v35, %v853_v33  ;;  %v1193_v24 = vadd.f32 1e-06, %v1191_v21 }
 0x4ec   :  { %v855_v37 = vcombine.high %v854_v36, %v854_v36  ;;  %v862_v38 = vrot.slane %v854_v36, %v853_v33  ;;  %6944 = vrsqrt.f32 %v1193_v24 }
 0x4ee   :  { %v869_v39 = vrot.slane %v855_v37, %v853_v33  ;;  %v8142_v40 = vrot.slane %v862_v38, %v8139_v44  ;;  %v1228_v37 = vld [vmem:[#allocation15] sm:$0x3] }
 0x4ef   :  { %v1233_v30 = vrot.slane %v1228_v37, %v8139_v44 }
 0x4f0   :  { %5849 = vmatmul.mubr.msk.f32.vlgmr.msra.gmra.mrb[6].mxu0 %vm485_vm1, %v8142_v40  ;;  %6266 = vmatprep.mubr.msk.f32.mxu1 %vm485_vm1, %v8142_v40  ;;  %v8149_v41 = vrot.slane %v869_v39, %v8139_v44 }
 0x4f1   :  { %1089 = vmatprep.mubr.f32.mxu0 %v7695_v1  ;;  %6620 = vmatpush1.bf16.msra.mxu0 %v6619_v50 }
 0x4f2   :  { %6267 = vmatmul.mubr.msk.f32.vlgmr.msra.gmra.mrb[4].mxu1 %vm485_vm1, %v8149_v41  ;;  %6622 = vmatprep.subr.bf16.mxu0 %v6621_v51 }
 0x4f3   :  { %6276 = vmatprep.mubr.msk.f32.mxu1 %vm7694_vm0, %v7695_v1 }
 0x4f4   :  { %5850 = vmatmul.mubr.msk.f32.gmra.mrb[8].mxu0 %vm485_vm1, %v8149_v41 }
 0x4f5   :  { %1310 = vmatprep.mubr.f32.mxu0 %v7695_v1  ;;  %6624 = vmatpush1.bf16.msra.mxu0 %v6623_v56 }
 0x4f6   :  { %6626 = vmatprep.subr.bf16.mxu0 %v6625_v57  ;;  %v6945_v26 = vpop.eup %6944 }
 0x4f7   :  { %v1197_v32 = vmul.f32 %v6945_v26, %v8102_v34  ;;  %v8202_v34 = vsub.s32 1, %v8135_v28 }
 0x4f9   :  { %6628 = vmatpush1.bf16.msra.mxu0 %v6627_v60  ;;  %v1237_v43 = vrot.slane %v1228_v37, %v8202_v34 }
 0x4fa   :  { %6630 = vmatprep.subr.bf16.mxu0 %v6629_v63 }
 0x4fd   :  { %6632 = vmatpush1.bf16.msra.mxu0 %v6631_v4 }
 0x4fe   :  { %6269 = vmatprep.subr.mxu0 %v7695_v1 }
 0x5c3   :  { %v1085_v7 = vpop.f32.mrb[6].mxu0 }
 0x5c4   :  { %v1086_v8 = vadd.f32 %v1085_v7, %v1003_v6  ;;  %v8181_v9 = vpop.f32.mrb[7].mxu0 }
 0x5c5   :  { %v8183_v10 = vpop.f32.mrb[4].mxu1 }
 0x5c6   :  { %v1198_v11 = vadd.f32 1.0, %v1086_v8  ;;  %v8185_v12 = vpop.f32.mrb[5].mxu1 }
 0x5c7   :  { %v1091_v13 = vpop.f32.mrb[8].mxu0 }
 0x5c8   :  { %v1092_v14 = vadd.f32 %v1091_v13, %v1003_v6  ;;  %v8187_v15 = vpop.f32.mrb[9].mxu0  ;;  %1202 = vrot.lane.b32.xlu0 %v1198_v11, %s7697_s8 }
 0x5ca   :  { %v1199_v16 = vadd.f32 1.0, %v1092_v14 }
 0x5cc   :  { %1204 = vrot.lane.b32.xlu1 %v1199_v16, %s7697_s8 }
 0x63a   :  { %v1203_v27 = vpop.permute.xlu0 %1202 }
 0x63b   :  { %v1208_v29 = vmul.f32 %v1203_v27, %v1196_v0 }
 0x63d   :  { %v1210_v31 = vadd.f32 %v1208_v29, %v1086_v8 }
 0x63e   :  { %v1205_v33 = vpop.permute.xlu1 %1204 }
 0x63f   :  { %v1209_v35 = vmul.f32 %v1205_v33, %v1197_v32  ;;  %5853 = vmatmul.mubr.msk.f32.vlgmr.msra.gmra.mrb[10].mxu0 %vm485_vm1, %v1210_v31 }
 0x640   :  { %1316 = vmatprep.mubr.f32.mxu0 %v7695_v1 }
 0x641   :  { %v1211_v36 = vadd.f32 %v1209_v35, %v1092_v14 }
 0x643   :  { %5854 = vmatmul.mubr.msk.f32.gmra.mrb[12].mxu0 %vm485_vm1, %v1211_v36 }
 0x644   :  { %6271 = vmatprep.mubr.msk.f32.mxu0 %vm7694_vm0, %v7695_v1 }
 0x712   :  { %v1312_v38 = vpop.f32.mrb[10].mxu0 }
 0x713   :  { %v8199_v39 = vadd.f32 %v1312_v38, %v1233_v30  ;;  %v1314_v42 = vpop.f32.mrb[11].mxu0 }
 0x714   :  { %v8221_v51 = vadd.f32 %v1314_v42, %v1237_v43 }
 0x715   :  { %1324 = vrot.lane.b32.xlu1 %v8199_v39, %s7697_s8 }
 0x716   :  { %v1318_v45 = vpop.f32.mrb[12].mxu0 }
 0x717   :  { %v8207_v46 = vadd.f32 %v1318_v45, %v1233_v30  ;;  %v1320_v47 = vpop.f32.mrb[13].mxu0 }
 0x718   :  { %v8209_v48 = vadd.f32 %v1320_v47, %v1237_v43 }
 0x719   :  { %1402 = vrot.lane.b32.xlu1 %v8207_v46, %s7697_s8 }
 0x787   :  { %v1325_v49 = vpop.permute.xlu1 %1324 }
 0x788   :  { %6270 = vmatpush3.xpose.msk.msra.mxu0 %vm1326_vm5, %v1325_v49 }
 0x789   :  { %6289 = vmatprep.subr.mxu0 %v7695_v1 }
 0x78b   :  { %6272 = vmatmul.mubr.msk.f32.vlgmr.msra.gmra.mrb[14].mxu0 %vm1326_vm5, %v8199_v39  ;;  %v1403_v50 = vpop.permute.xlu1 %1402 }
 0x78c   :  { %6275 = vmatpush3.xpose.msk.msra.mxu1 %vm1326_vm5, %v1403_v50  ;;  %6291 = vmatprep.mubr.msk.f32.mxu0 %vm7694_vm0, %v7695_v1 }
 0x78d   :  { %6279 = vmatprep.subr.mxu1 %v7695_v1 }
 0x78f   :  { %6277 = vmatmul.mubr.msk.f32.vlgmr.msra.gmra.mrb[6].mxu1 %vm1326_vm5, %v8207_v46 }
 0x790   :  { %6280 = vmatpush3.msra.mxu1 %v8221_v51  ;;  %6281 = vmatprep.mubr.msk.f32.mxu1 %vm7694_vm0, %v7695_v1 }
 0x791   :  { %6284 = vmatprep.subr.mxu1 %v7695_v1 }
 0x85e   :  { %v1397_v52 = vpop.f32.mrb[14].mxu0 }
 0x85f   :  { %v1478_v53 = vmul.f32 0.25, %v1397_v52  ;;  %v6273_v54 = vpop.f32.mrb[15].mxu0 }
 0x861   :  { %v1480_v55 = vsel %vm888_vm3, %v1478_v53, -inf }
 0x862   :  { %1481 = vmax.xlane.f32.xlu0 %v1480_v55  ;;  %v1474_v56 = vpop.f32.mrb[6].mxu1 }
 0x863   :  { %v1479_v57 = vmul.f32 0.25, %v1474_v56  ;;  %v6278_v58 = vpop.f32.mrb[7].mxu1 }
 0x865   :  { %v1483_v59 = vsel %vm888_vm3, %v1479_v57, -inf }
 0x866   :  { %1484 = vmax.xlane.f32.xlu1 %v1483_v59 }
 0x877   :  { %1728 = vrot.lane.b32.xlu1 %v8207_v46, %s7698_s2 }
 0x87b   :  { %1648 = vrot.lane.b32.xlu1 %v8199_v39, %s7699_s4 }
 0x87f   :  { %1726 = vrot.lane.b32.xlu1 %v8207_v46, %s7699_s4 }
 0x8ef   :  { %v1482_v60 = vpop.xlane.xlu0 %1481 }
 0x8f0   :  { %v1486_v61 = vsub.f32 %v1478_v53, %v1482_v60 }
 0x8f2   :  { %v1488_v62 = vmul.f32 1.442695, %v1486_v61 }
 0x8f3   :  { %v1485_v63 = vpop.xlane.xlu1 %1484 }
 0x8f4   :  { %6946 = vpow2.f32 %v1488_v62  ;;  %v1487_v2 = vsub.f32 %v1479_v57, %v1485_v63 }
 0x8f6   :  { %v1490_v3 = vmul.f32 1.442695, %v1487_v2 }
 0x8f7   :  { %v1729_v14 = vpop.permute.xlu1 %1728 }
 0x8f8   :  { %6948 = vpow2.f32 %v1490_v3 }
 0x8fb   :  { %v1649_v18 = vpop.permute.xlu1 %1648 }
 0x8fe   :  { %v6947_v4 = vpop.eup %6946 }
 0x8ff   :  { %v1492_v6 = vsel %vm888_vm3, %v6947_v4, 0.0  ;;  %v1727_v24 = vpop.permute.xlu1 %1726 }
 0x900   :  { %1493 = vadd.xlane.f32.xlu0 %v1492_v6 }
 0x902   :  { %v6949_v7 = vpop.eup %6948 }
 0x903   :  { %v1495_v8 = vsel %vm888_vm3, %v6949_v7, 0.0 }
 0x904   :  { %1496 = vadd.xlane.f32.xlu0 %v1495_v8 }
 0x91a   :  { %1650 = vrot.lane.b32.xlu0 %v8199_v39, %s7698_s2 }
 0x98d   :  { %v1494_v11 = vpop.xlane.xlu0 %1493 }
 0x98e   :  { %6950 = vrcp.f32 %v1494_v11 }
 0x991   :  { %v1497_v13 = vpop.xlane.xlu0 %1496 }
 0x992   :  { %6952 = vrcp.f32 %v1497_v13 }
 0x995   :  { %v1651_v16 = vpop.permute.xlu0 %1650 }
 0x996   :  { %6290 = vmatpush3.xpose.msk.msra.mxu0 %vm1326_vm5, %v1651_v16 }
 0x997   :  { %6299 = vmatprep.subr.mxu0 %v7695_v1 }
 0x998   :  { %v6951_v17 = vpop.eup %6950 }
 0x999   :  { %6292 = vmatmul.mubr.msk.f32.vlgmr.msra.gmra.mrb[16].mxu0 %vm1326_vm5, %v1649_v18  ;;  %v1500_v19 = vmul.f32 %v6951_v17, %v6947_v4 }
 0x99a   :  { %6301 = vmatprep.mubr.msk.f32.mxu0 %vm7694_vm0, %v7695_v1 }
 0x99b   :  { %6282 = vmatmul.mubr.msk.f32.vlgmr.msra.gmra.mrb[8].mxu1 %vm888_vm3, %v1500_v19 }
 0x99c   :  { %v6953_v20 = vpop.eup %6952  ;;  %6285 = vmatpush3.msra.mxu1 %v8209_v48  ;;  %6286 = vmatprep.mubr.msk.f32.mxu1 %vm7694_vm0, %v7695_v1 }
 0x99d   :  { %v1501_v21 = vmul.f32 %v6953_v20, %v6949_v7  ;;  %6294 = vmatprep.subr.mxu1 %v7695_v1 }
 0x99f   :  { %6287 = vmatmul.mubr.msk.f32.vlgmr.msra.gmra.mrb[10].mxu1 %vm888_vm3, %v1501_v21 }
 0x9a0   :  { %6296 = vmatprep.mubr.msk.f32.mxu1 %vm7694_vm0, %v7695_v1 }
 0x9a3   :  { %6295 = vmatpush3.xpose.msk.msra.mxu1 %vm1326_vm5, %v1729_v14 }
 0x9a4   :  { %6304 = vmatprep.subr.mxu1 %v7695_v1 }
 0x9a6   :  { %6297 = vmatmul.mubr.msk.f32.vlgmr.msra.gmra.mrb[12].mxu1 %vm1326_vm5, %v1727_v24 }
 0x9a7   :  { %6306 = vmatprep.mubr.msk.f32.mxu1 %vm7694_vm0, %v7695_v1 }
 0xa6c   :  { %v1722_v25 = vpop.f32.mrb[16].mxu0 }
 0xa6d   :  { %v1804_v0 = vmul.f32 0.25, %v1722_v25  ;;  %v6293_v26 = vpop.f32.mrb[17].mxu0 }
 0xa6e   :  { %v8259_v27 = vpop.f32.mrb[8].mxu1 }
 0xa6f   :  { %v6283_v29 = vpop.f32.mrb[9].mxu1  ;;  %v1806_v31 = vsel %vm888_vm3, %v1804_v0, -inf }
 0xa70   :  { %1807 = vmax.xlane.f32.xlu0 %v1806_v31 }
 0xa72   :  { %v8262_v32 = vpop.f32.mrb[10].mxu1 }
 0xa73   :  { %v6288_v33 = vpop.f32.mrb[11].mxu1 }
 0xa79   :  { %v1800_v35 = vpop.f32.mrb[12].mxu1 }
 0xa7a   :  { %v1805_v36 = vmul.f32 0.25, %v1800_v35  ;;  %v6298_v37 = vpop.f32.mrb[13].mxu1 }
 0xa7c   :  { %v1809_v30 = vsel %vm888_vm3, %v1805_v36, -inf }
 0xa7d   :  { %1810 = vmax.xlane.f32.xlu1 %v1809_v30 }
 0xa8e   :  { %1906 = vrot.lane.b32.xlu1 %v8209_v48, %s7699_s4 }
 0xa92   :  { %1984 = vrot.lane.b32.xlu1 %v8199_v39, %s7700_s24 }
 0xa96   :  { %2062 = vrot.lane.b32.xlu1 %v8207_v46, %s7700_s24 }
 0xa9a   :  { %2060 = vrot.lane.b32.xlu1 %v8207_v46, %s7701_s7 }
 0xafd   :  { %v1808_v38 = vpop.xlane.xlu0 %1807 }
 0xafe   :  { %v1812_v42 = vsub.f32 %v1804_v0, %v1808_v38 }
 0xb00   :  { %v1814_v43 = vmul.f32 1.442695, %v1812_v42 }
 0xb02   :  { %6954 = vpow2.f32 %v1814_v43 }
 0xb0a   :  { %v1811_v45 = vpop.xlane.xlu1 %1810 }
 0xb0b   :  { %v1813_v52 = vsub.f32 %v1805_v36, %v1811_v45 }
 0xb0c   :  { %v6955_v47 = vpop.eup %6954 }
 0xb0d   :  { %v1818_v49 = vsel %vm888_vm3, %v6955_v47, 0.0  ;;  %v1816_v53 = vmul.f32 1.442695, %v1813_v52 }
 0xb0e   :  { %v1907_v50 = vpop.permute.xlu1 %1906  ;;  %1819 = vadd.xlane.f32.xlu0 %v1818_v49 }
 0xb0f   :  { %6305 = vmatpush3.msra.mxu1 %v1907_v50  ;;  %6956 = vpow2.f32 %v1816_v53 }
 0xb10   :  { %6314 = vmatprep.subr.mxu1 %v7695_v1 }
 0xb12   :  { %v1985_v60 = vpop.permute.xlu1 %1984 }
 0xb16   :  { %v2063_v2 = vpop.permute.xlu1 %2062 }
 0xb19   :  { %v6957_v54 = vpop.eup %6956 }
 0xb1a   :  { %v1821_v55 = vsel %vm888_vm3, %v6957_v54, 0.0  ;;  %v2061_v4 = vpop.permute.xlu1 %2060 }
 0xb24   :  { %1829 = vrot.lane.b32.xlu0 %v8221_v51, %s7699_s4 }
 0xb43   :  { %1822 = vadd.xlane.f32.xlu0 %v1821_v55 }
 0xb59   :  { %1982 = vrot.lane.b32.xlu0 %v8199_v39, %s7701_s7 }
 0xb9b   :  { %v1820_v56 = vpop.xlane.xlu0 %1819 }
 0xb9c   :  { %6958 = vrcp.f32 %v1820_v56 }
 0xb9f   :  { %v1830_v57 = vpop.permute.xlu0 %1829 }
 0xba0   :  { %6300 = vmatpush3.msra.mxu0 %v1830_v57 }
 0xba1   :  { %6309 = vmatprep.subr.mxu0 %v7695_v1 }
 0xba6   :  { %v6959_v58 = vpop.eup %6958 }
 0xba7   :  { %v1826_v59 = vmul.f32 %v6959_v58, %v6955_v47 }
 0xba9   :  { %6302 = vmatmul.mubr.msk.f32.vlgmr.msra.gmra.mrb[18].mxu0 %vm888_vm3, %v1826_v59 }
 0xbaa   :  { %6310 = vmatpush3.xpose.msk.msra.mxu0 %vm1326_vm5, %v1985_v60  ;;  %6311 = vmatprep.mubr.msk.f32.mxu0 %vm7694_vm0, %v7695_v1 }
 0xbab   :  { %6319 = vmatprep.subr.mxu0 %v7695_v1 }
 0xbd0   :  { %v1823_v61 = vpop.xlane.xlu0 %1822 }
 0xbd1   :  { %6960 = vrcp.f32 %v1823_v61 }
 0xbd4   :  { %v1983_v62 = vpop.permute.xlu0 %1982 }
 0xbd5   :  { %6312 = vmatmul.mubr.msk.f32.vlgmr.msra.gmra.mrb[20].mxu0 %vm1326_vm5, %v1983_v62 }
 0xbd6   :  { %6321 = vmatprep.mubr.msk.f32.mxu0 %vm7694_vm0, %v7695_v1 }
 0xbdb   :  { %v6961_v63 = vpop.eup %6960 }
 0xbdc   :  { %v1827_v3 = vmul.f32 %v6961_v63, %v6957_v54 }
 0xbde   :  { %6307 = vmatmul.mubr.msk.f32.vlgmr.msra.gmra.mrb[14].mxu1 %vm888_vm3, %v1827_v3 }
 0xbdf   :  { %6315 = vmatpush3.xpose.msk.msra.mxu1 %vm1326_vm5, %v2063_v2  ;;  %6316 = vmatprep.mubr.msk.f32.mxu1 %vm7694_vm0, %v7695_v1 }
 0xbe0   :  { %6324 = vmatprep.subr.mxu1 %v7695_v1 }
 0xbe2   :  { %6317 = vmatmul.mubr.msk.f32.vlgmr.msra.gmra.mrb[16].mxu1 %vm1326_vm5, %v2061_v4 }
 0xbe3   :  { %6326 = vmatprep.mubr.msk.f32.mxu1 %vm7694_vm0, %v7695_v1 }
 0xc7c   :  { %v8297_v6 = vpop.f32.mrb[18].mxu0 }
 0xc7d   :  { %v6303_v7 = vpop.f32.mrb[19].mxu0 }
 0xca8   :  { %v2056_v8 = vpop.f32.mrb[20].mxu0 }
 0xca9   :  { %v2138_v11 = vmul.f32 0.25, %v2056_v8  ;;  %v6313_v13 = vpop.f32.mrb[21].mxu0 }
 0xcab   :  { %v2140_v14 = vsel %vm888_vm3, %v2138_v11, -inf }
 0xcac   :  { %2141 = vmax.xlane.f32.xlu0 %v2140_v14 }
 0xcb1   :  { %v8300_v16 = vpop.f32.mrb[14].mxu1 }
 0xcb2   :  { %v6308_v17 = vpop.f32.mrb[15].mxu1 }
 0xcb5   :  { %v2134_v18 = vpop.f32.mrb[16].mxu1 }
 0xcb6   :  { %v2139_v19 = vmul.f32 0.25, %v2134_v18  ;;  %v6318_v20 = vpop.f32.mrb[17].mxu1 }
 0xcb8   :  { %v2143_v21 = vsel %vm888_vm3, %v2139_v19, -inf }
 0xcb9   :  { %2144 = vmax.xlane.f32.xlu1 %v2143_v21 }
 0xcca   :  { %2238 = vrot.lane.b32.xlu1 %v8209_v48, %s7701_s7 }
 0xcce   :  { %2316 = vrot.lane.b32.xlu1 %v8199_v39, %s7675_s6 }
 0xcd2   :  { %2394 = vrot.lane.b32.xlu1 %v8207_v46, %s7675_s6 }
 0xcd6   :  { %2392 = vrot.lane.b32.xlu1 %v8207_v46, %s7702_s10 }
 0xd39   :  { %v2142_v24 = vpop.xlane.xlu0 %2141 }
 0xd3a   :  { %v2146_v25 = vsub.f32 %v2138_v11, %v2142_v24 }
 0xd3c   :  { %v2148_v0 = vmul.f32 1.442695, %v2146_v25 }
 0xd3e   :  { %6962 = vpow2.f32 %v2148_v0 }
 0xd46   :  { %v2145_v26 = vpop.xlane.xlu1 %2144 }
 0xd47   :  { %v2147_v35 = vsub.f32 %v2139_v19, %v2145_v26 }
 0xd48   :  { %v6963_v29 = vpop.eup %6962 }
 0xd49   :  { %v2152_v31 = vsel %vm888_vm3, %v6963_v29, 0.0  ;;  %v2150_v36 = vmul.f32 1.442695, %v2147_v35  ;;  %v2680_v35 = vld [vmem:[#allocation16 + $0x18] sm:$0xff] }
 0xd4a   :  { %2153 = vadd.xlane.f32.xlu0 %v2152_v31  ;;  %v2239_v33 = vpop.permute.xlu1 %2238  ;;  %v2679_v31 = vld [vmem:[#allocation16 + $0x10] sm:$0xff] }
 0xd4b   :  { %6325 = vmatpush3.msra.mxu1 %v2239_v33  ;;  %6964 = vpow2.f32 %v2150_v36  ;;  %v6637_v36 = vpack.c.bf16 %v2680_v35, %v2679_v31  ;;  %v2824_v35 = vld [vmem:[%s8934_s9 + $0x38] sm:$0xff] }
 0xd4c   :  { %6334 = vmatprep.subr.mxu1 %v7695_v1 }
 0xd4e   :  { %v2317_v45 = vpop.permute.xlu1 %2316 }
 0xd52   :  { %v2395_v50 = vpop.permute.xlu1 %2394 }
 0xd55   :  { %v6965_v46 = vpop.eup %6964 }
 0xd56   :  { %v2155_v37 = vsel %vm888_vm3, %v6965_v46, 0.0  ;;  %v2393_v53 = vpop.permute.xlu1 %2392 }
 0xd60   :  { %2162 = vrot.lane.b32.xlu0 %v8221_v51, %s7701_s7 }
 0xd7f   :  { %2156 = vadd.xlane.f32.xlu0 %v2155_v37  ;;  %v2682_v37 = vld [vmem:[#allocation16 + $0x28] sm:$0xff] }
 0xd95   :  { %2314 = vrot.lane.b32.xlu0 %v8199_v39, %s7702_s10 }
 0xdd7   :  { %v2154_v30 = vpop.xlane.xlu0 %2153 }
 0xdd8   :  { %6966 = vrcp.f32 %v2154_v30 }
 0xddb   :  { %v2163_v38 = vpop.permute.xlu0 %2162 }
 0xddc   :  { %6320 = vmatpush3.msra.mxu0 %v2163_v38  ;;  %v2683_v38 = vld [vmem:[#allocation16 + $0x30] sm:$0xff] }
 0xddd   :  { %6329 = vmatprep.subr.mxu0 %v7695_v1 }
 0xde2   :  { %v6967_v42 = vpop.eup %6966 }
 0xde3   :  { %v2160_v43 = vmul.f32 %v6967_v42, %v6963_v29  ;;  %v2677_v29 = vld [vmem:[#allocation16] sm:$0xff]  ;;  %v2684_v42 = vld [vmem:[#allocation16 + $0x38] sm:$0xff] }
 0xde5   :  { %6322 = vmatmul.mubr.msk.f32.vlgmr.msra.gmra.mrb[22].mxu0 %vm888_vm3, %v2160_v43  ;;  %v6645_v43 = vpack.c.bf16 %v2684_v42, %v2683_v38  ;;  %v2826_v38 = vld [vmem:[%s8934_s9 + $0x48] sm:$0xff]  ;;  %v2828_v42 = vld [vmem:[%s8934_s9 + $0x58] sm:$0xff] }
 0xde6   :  { %6330 = vmatpush3.xpose.msk.msra.mxu0 %vm1326_vm5, %v2317_v45  ;;  %6331 = vmatprep.mubr.msk.f32.mxu0 %vm7694_vm0, %v7695_v1 }
 0xde7   :  { %6339 = vmatprep.subr.mxu0 %v7695_v1 }
 0xe0c   :  { %v2157_v47 = vpop.xlane.xlu0 %2156 }
 0xe0d   :  { %6968 = vrcp.f32 %v2157_v47 }
 0xe10   :  { %v2315_v39 = vpop.permute.xlu0 %2314 }
 0xe11   :  { %6332 = vmatmul.mubr.msk.f32.vlgmr.msra.gmra.mrb[24].mxu0 %vm1326_vm5, %v2315_v39 }
 0xe12   :  { %6341 = vmatprep.mubr.msk.f32.mxu0 %vm7694_vm0, %v7695_v1 }
 0xe17   :  { %v6969_v49 = vpop.eup %6968 }
 0xe18   :  { %v2161_v52 = vmul.f32 %v6969_v49, %v6965_v46  ;;  %v2681_v46 = vld [vmem:[#allocation16 + $0x20] sm:$0xff] }
 0xe19   :  { %v6641_v30 = vpack.c.bf16 %v2682_v37, %v2681_v46  ;;  %v2821_v46 = vld [vmem:[%s8934_s9 + $0x20] sm:$0xff]  ;;  %v2823_v37 = vld [vmem:[%s8934_s9 + $0x30] sm:$0xff] }
 0xe1a   :  { %6327 = vmatmul.mubr.msk.f32.vlgmr.msra.gmra.mrb[18].mxu1 %vm888_vm3, %v2161_v52 }
 0xe1b   :  { %6335 = vmatpush3.xpose.msk.msra.mxu1 %vm1326_vm5, %v2395_v50  ;;  %6336 = vmatprep.mubr.msk.f32.mxu1 %vm7694_vm0, %v7695_v1 }
 0xe1c   :  { %6344 = vmatprep.subr.mxu1 %v7695_v1 }
 0xe1e   :  { %6337 = vmatmul.mubr.msk.f32.vlgmr.msra.gmra.mrb[20].mxu1 %vm1326_vm5, %v2393_v53 }
 0xe1f   :  { %6346 = vmatprep.mubr.msk.f32.mxu1 %vm7694_vm0, %v7695_v1 }
 0xeb8   :  { %v2234_v54 = vpop.f32.mrb[22].mxu0 }
 0xeb9   :  { %v6323_v55 = vpop.f32.mrb[23].mxu0 }
 0xee4   :  { %v2388_v56 = vpop.f32.mrb[24].mxu0 }
 0xee5   :  { %v2470_v57 = vmul.f32 0.25, %v2388_v56  ;;  %v6333_v58 = vpop.f32.mrb[25].mxu0 }
 0xee7   :  { %v2472_v59 = vsel %vm888_vm3, %v2470_v57, -inf }
 0xee8   :  { %2473 = vmax.xlane.f32.xlu0 %v2472_v59 }
 0xeed   :  { %v2310_v60 = vpop.f32.mrb[18].mxu1 }
 0xeee   :  { %v6328_v61 = vpop.f32.mrb[19].mxu1 }
 0xef1   :  { %v2466_v62 = vpop.f32.mrb[20].mxu1 }
 0xef2   :  { %v2471_v63 = vmul.f32 0.25, %v2466_v62  ;;  %v6338_v2 = vpop.f32.mrb[21].mxu1 }
 0xef4   :  { %v2475_v3 = vsel %vm888_vm3, %v2471_v63, -inf }
 0xef5   :  { %2476 = vmax.xlane.f32.xlu1 %v2475_v3 }
 0xf06   :  { %2570 = vrot.lane.b32.xlu1 %v8209_v48, %s7702_s10 }
 0xf0a   :  { %2648 = vrot.lane.b32.xlu1 %v8297_v6, %s7675_s6 }
 0xf0e   :  { %2650 = vrot.lane.b32.xlu1 %v8300_v16, %s7675_s6 }
 0xf12   :  { %2658 = vrot.lane.b32.xlu1 %v2310_v60, %s7700_s24 }
 0xf75   :  { %v2474_v4 = vpop.xlane.xlu0 %2473 }
 0xf76   :  { %v2478_v7 = vsub.f32 %v2470_v57, %v2474_v4 }
 0xf78   :  { %v2480_v8 = vmul.f32 1.442695, %v2478_v7 }
 0xf7a   :  { %6970 = vpow2.f32 %v2480_v8 }
 0xf82   :  { %v2477_v11 = vpop.xlane.xlu1 %2476 }
 0xf83   :  { %v2479_v13 = vsub.f32 %v2471_v63, %v2477_v11  ;;  %v5879_v63 = vld [vmem:[#allocation18] ss:$0 sm:$0xff] }
 0xf84   :  { %v6971_v14 = vpop.eup %6970 }
 0xf85   :  { %v2482_v17 = vmul.f32 1.442695, %v2479_v13  ;;  %v2484_v18 = vsel %vm888_vm3, %v6971_v14, 0.0 }
 0xf86   :  { %2485 = vadd.xlane.f32.xlu0 %v2484_v18  ;;  %v2571_v48 = vpop.permute.xlu1 %2570 }
 0xf87   :  { %6972 = vpow2.f32 %v2482_v17  ;;  %6345 = vmatpush3.msra.mxu1 %v2571_v48 }
 0xf8a   :  { %v2649_v50 = vpop.permute.xlu1 %2648 }
 0xf8e   :  { %v2651_v53 = vpop.permute.xlu1 %2650 }
 0xf8f   :  { %v2671_v59 = vsel %vm1326_vm5, %v8262_v32, %v2651_v53  ;;  %v2829_v53 = vld [vmem:[%s8934_s9 + $0x60] sm:$0xff] }
 0xf91   :  { %v6973_v6 = vpop.eup %6972 }
 0xf92   :  { %v2487_v19 = vsel %vm888_vm3, %v6973_v6, 0.0  ;;  %v2659_v58 = vpop.permute.xlu1 %2658 }
 0xf93   :  { %2488 = vadd.xlane.f32.xlu0 %v2487_v19  ;;  %v2673_v60 = vsel %vm687_vm2, %v2671_v59, %v2659_v58 }
 0xfa9   :  { %2494 = vrot.lane.b32.xlu0 %v8221_v51, %s7702_s10  ;;  %v2678_v51 = vld [vmem:[#allocation16 + $0x8] sm:$0xff] }
 0xfaa   :  { %v6633_v33 = vpack.c.bf16 %v2678_v51, %v2677_v29  ;;  %v2817_v29 = vld [vmem:[%s8934_s9] sm:$0xff]  ;;  %v2819_v51 = vld [vmem:[%s8934_s9 + $0x10] sm:$0xff] }
 0xfab   :  { %v6651_v31 = vpack.c.bf16 %v2819_v51, %v2817_v29 }
 0xfad   :  { %2656 = vrot.lane.b32.xlu0 %v2234_v54, %s7700_s24  ;;  %v2670_v54 = vsel %vm1326_vm5, %v8259_v27, %v2649_v50  ;;  %v1007_v27 = vrot.slane %v8176_v5, %v8202_v34  ;;  %v2832_v50 = vld [vmem:[%s8934_s9 + $0x78] sm:$0xff] }
 0xfaf   :  { %v1094_v3 = vadd.f32 %v8187_v15, %v1007_v27  ;;  %v1088_v8 = vadd.f32 %v8181_v9, %v1007_v27 }
0x1013   :  { %v2486_v16 = vpop.xlane.xlu0 %2485 }
0x1014   :  { %6974 = vrcp.f32 %v2486_v16 }
0x101e   :  { %v6975_v21 = vpop.eup %6974 }
0x101f   :  { %v2492_v24 = vmul.f32 %v6975_v21, %v6971_v14 }
0x1020   :  { %v2489_v20 = vpop.xlane.xlu0 %2488 }
0x1021   :  { %6976 = vrcp.f32 %v2489_v20 }
0x1024   :  { %v2495_v25 = vpop.permute.xlu0 %2494 }
0x1025   :  { %6340 = vmatpush3.msra.mxu0 %v2495_v25  ;;  %v2818_v25 = vld [vmem:[%s8934_s9 + $0x8] sm:$0xff] }
0x1026   :  { %6342 = vmatmul.mubr.msk.f32.vlgmr.msra.gmra.mrb[26].mxu0 %vm888_vm3, %v2492_v24  ;;  %6634 = vmatprep.subr.bf16.mxu0 %v6633_v33 }
0x1027   :  { %6636 = vmatpush3.bf16.msra.mxu0 %v6633_v33  ;;  %v2822_v33 = vld [vmem:[%s8934_s9 + $0x28] sm:$0xff] }
0x1028   :  { %6638 = vmatprep.subr.bf16.mxu0 %v6637_v36  ;;  %v2657_v52 = vpop.permute.xlu0 %2656 }
0x1029   :  { %v2672_v55 = vsel %vm687_vm2, %v2670_v54, %v2657_v52  ;;  %v2831_v54 = vld [vmem:[%s8934_s9 + $0x70] sm:$0xff] }
0x102b   :  { %v6977_v0 = vpop.eup %6976  ;;  %6640 = vmatpush3.bf16.msra.mxu0 %v6637_v36  ;;  %v6653_v36 = vpack.c.bf16 %v2824_v35, %v2822_v33  ;;  %v3185_v33 = vld [vmem:[%s8935_s19 + $0x78] sm:$0xff] }
0x102c   :  { %v2493_v26 = vmul.f32 %v6977_v0, %v6973_v6  ;;  %6642 = vmatprep.subr.bf16.mxu0 %v6641_v30  ;;  %v2820_v0 = vld [vmem:[%s8934_s9 + $0x18] sm:$0xff] }
0x102d   :  { %v3189_v35 = vld [vmem:[%s8935_s19 + $0x98] sm:$0xff] }
0x102e   :  { %6347 = vmatmul.mubr.msk.f32.vlgmr.msra.gmra.mrb[22].mxu1 %vm888_vm3, %v2493_v26  ;;  %v6649_v26 = vpack.c.bf16 %v2820_v0, %v2818_v25  ;;  %v3186_v25 = vld [vmem:[%s8935_s19 + $0x80] sm:$0xff] }
0x102f   :  { %2915 = vmatprep.mubr.f32.mxu1 %v7695_v1  ;;  %6644 = vmatpush3.bf16.msra.mxu0 %v6641_v30  ;;  %v6655_v30 = vpack.c.bf16 %v2823_v37, %v2821_v46 }
0x1030   :  { %6646 = vmatprep.subr.bf16.mxu0 %v6645_v43  ;;  %6650 = vmatprep.subr.bf16.mxu1 %v6649_v26 }
0x1031   :  { %6652 = vmatpush1.bf16.msra.mxu1 %v6651_v31  ;;  %v3182_v31 = vld [vmem:[%s8935_s19 + $0x60] sm:$0xff] }
0x1032   :  { %6654 = vmatprep.subr.bf16.mxu1 %v6653_v36  ;;  %v3192_v36 = vld [vmem:[%s8935_s19 + $0xb0] sm:$0xff]  ;;  %v6707_v46 = vpack.c.bf16 %v3185_v33, %v3182_v31 }
0x1033   :  { %6648 = vmatpush3.bf16.msra.mxu0 %v6645_v43  ;;  %v6657_v43 = vpack.c.bf16 %v2828_v42, %v2826_v38  ;;  %v6709_v37 = vpack.c.bf16 %v3192_v36, %v3189_v35  ;;  %v3191_v38 = vld [vmem:[%s8935_s19 + $0xa8] sm:$0xff]  ;;  %v3172_v42 = vld [vmem:[%s8935_s19 + $0x10] sm:$0xff]  ;;  %v3047_v35 = vld [vmem:[%s8936_s11 + $0x58] sm:$0xff] }
0x1034   :  { %v3046_v33 = vld [vmem:[%s8936_s11 + $0x50] sm:$0xff] }
0x1035   :  { %6656 = vmatpush1.bf16.msra.mxu1 %v6655_v30  ;;  %v3188_v30 = vld [vmem:[%s8935_s19 + $0x90] sm:$0xff]  ;;  %v6687_v36 = vpack.c.bf16 %v3047_v35, %v3046_v33 }
0x1036   :  { %6658 = vmatprep.subr.bf16.mxu1 %v6657_v43  ;;  %v3175_v43 = vld [vmem:[%s8935_s19 + $0x28] sm:$0xff] }
0x10f9   :  { %v2566_v45 = vpop.f32.mrb[26].mxu0 }
0x10fa   :  { %2664 = vrot.lane.b32.xlu0 %v2566_v45, %s7698_s2  ;;  %v6343_v47 = vpop.f32.mrb[27].mxu0  ;;  %v2825_v45 = vld [vmem:[%s8934_s9 + $0x40] sm:$0xff] }
0x10fb   :  { %v2827_v47 = vld [vmem:[%s8934_s9 + $0x50] sm:$0xff] }
0x1101   :  { %v2642_v39 = vpop.f32.mrb[22].mxu1 }
0x1102   :  { %2666 = vrot.lane.b32.xlu1 %v2642_v39, %s7698_s2  ;;  %v6348_v49 = vpop.f32.mrb[23].mxu1  ;;  %v6659_v39 = vpack.c.bf16 %v2827_v47, %v2825_v45  ;;  %v6711_v45 = vpack.c.bf16 %v3191_v38, %v3188_v30  ;;  %v6713_v47 = vpack.c.bf16 %v3175_v43, %v3172_v42  ;;  %v3048_v38 = vld [vmem:[%s8936_s11 + $0x60] sm:$0xff]  ;;  %v3049_v42 = vld [vmem:[%s8936_s11 + $0x68] sm:$0xff] }
0x1103   :  { %v2830_v49 = vld [vmem:[%s8934_s9 + $0x68] sm:$0xff]  ;;  %v6691_v43 = vpack.c.bf16 %v3049_v42, %v3048_v38 }
0x1104   :  { %6660 = vmatpush1.bf16.msra.mxu1 %v6659_v39  ;;  %v6661_v52 = vpack.c.bf16 %v2832_v50, %v2830_v49  ;;  %v3178_v39 = vld [vmem:[%s8935_s19 + $0x40] sm:$0xff]  ;;  %v3181_v49 = vld [vmem:[%s8935_s19 + $0x58] sm:$0xff] }
0x1105   :  { %v6717_v50 = vpack.c.bf16 %v3181_v49, %v3178_v39  ;;  %v3050_v49 = vld [vmem:[%s8936_s11 + $0x70] sm:$0xff] }
0x1106   :  { %6662 = vmatprep.subr.bf16.mxu1 %v6661_v52  ;;  %v3184_v52 = vld [vmem:[%s8935_s19 + $0x70] sm:$0xff] }
0x116c   :  { %v2665_v56 = vpop.permute.xlu0 %2664 }
0x116d   :  { %v2675_v57 = vsel %vm2674_vm6, %v2672_v55, %v2665_v56  ;;  %v6663_v55 = vpack.c.bf16 %v2831_v54, %v2829_v53  ;;  %v3171_v56 = vld [vmem:[%s8935_s19 + $0x8] sm:$0xff] }
0x116e   :  { %6365 = vmatprep.mubr.msk.f32.mxu0 %vm485_vm1, %v2675_v57  ;;  %v3174_v57 = vld [vmem:[%s8935_s19 + $0x20] sm:$0xff]  ;;  %v3187_v53 = vld [vmem:[%s8935_s19 + $0x88] sm:$0xff] }
0x116f   :  { %6664 = vmatpush1.bf16.msra.mxu1 %v6663_v55  ;;  %v6697_v58 = vpack.c.bf16 %v3174_v57, %v3171_v56  ;;  %v6721_v54 = vpack.c.bf16 %v3187_v53, %v3184_v52  ;;  %v3190_v55 = vld [vmem:[%s8935_s19 + $0xa0] sm:$0xff]  ;;  %v3193_v56 = vld [vmem:[%s8935_s19 + $0xb8] sm:$0xff]  ;;  %v2833_v53 = vld [vmem:[#allocation19] sm:$0x3] }
0x1170   :  { %v6725_v57 = vpack.c.bf16 %v3193_v56, %v3190_v55  ;;  %v2842_v55 = vrot.slane %v2833_v53, %v8202_v34 }
0x1171   :  { %6698 = vmatprep.subr.bf16.mxu1 %v6697_v58  ;;  %v3052_v58 = vld [vmem:[%s8936_s11 + $0x80] sm:$0xff] }
0x1174   :  { %v2667_v61 = vpop.permute.xlu1 %2666 }
0x1175   :  { %v2676_v62 = vsel %vm2674_vm6, %v2673_v60, %v2667_v61 }
0x1176   :  { %6366 = vmatmul.mubr.msk.f32.vlgmr.msra.gmra.mrb[28].mxu0 %vm485_vm1, %v2676_v62  ;;  %v1010_v62 = vsub.s32 2, %v8135_v28 }
0x1249   :  { %v6367_v2 = vpop.f32.mrb[28].mxu0 }
0x124a   :  { %v2770_v4 = vadd.f32 %v6367_v2, %v5879_v63  ;;  %v2764_v7 = vpop.f32.mrb[29].mxu0 }
0x124b   :  { %v2765_v11 = vadd.f32 %v5879_v63, %v2764_v7 }
0x124c   :  { %v2774_v32 = vmul.f32 %v2770_v4, %v1094_v3 }
0x124d   :  { %v2773_v13 = vmul.f32 %v2765_v11, %v1088_v8 }
0x124e   :  { %v8369_v14 = vadd.f32 %v2774_v32, %v8088_v22 }
0x124f   :  { %v8372_v17 = vadd.f32 %v2773_v13, %v8090_v23  ;;  %v3170_v13 = vld [vmem:[%s8935_s19] sm:$0xff] }
0x1250   :  { %v2780_v18 = vsel %vm485_vm1, %v8369_v14, 0.0 }
0x1251   :  { %2781 = vadd.xlane.f32.xlu1 %v2780_v18  ;;  %v2777_v15 = vsel %vm485_vm1, %v8372_v17, 0.0  ;;  %v3173_v18 = vld [vmem:[%s8935_s19 + $0x18] sm:$0xff] }
0x1252   :  { %2778 = vadd.xlane.f32.xlu0 %v2777_v15  ;;  %v3177_v15 = vld [vmem:[%s8935_s19 + $0x38] sm:$0xff] }
0x1262   :  { %2811 = vrot.lane.b32.xlu1 %v1094_v3, %s7697_s8  ;;  %v1011_v3 = vrot.slane %v8176_v5, %v1010_v62 }
0x1264   :  { %v8411_v4 = vadd.f32 %v8185_v12, %v1011_v3  ;;  %v6699_v12 = vpack.c.bf16 %v3173_v18, %v3170_v13  ;;  %v3056_v18 = vld [vmem:[%s8936_s11 + $0xa0] sm:$0xff] }
0x1266   :  { %v2803_v11 = vadd.f32 1.0, %v8411_v4 }
0x12de   :  { %v2782_v9 = vpop.xlane.xlu1 %2781 }
0x12df   :  { %v2784_v22 = vmul.f32 0.015625, %v2782_v9  ;;  %v2779_v48 = vpop.xlane.xlu0 %2778  ;;  %v3180_v9 = vld [vmem:[%s8935_s19 + $0x50] sm:$0xff] }
0x12e0   :  { %v2783_v6 = vmul.f32 0.015625, %v2779_v48 }
0x12e1   :  { %v8380_v23 = vsub.f32 %v8369_v14, %v2784_v22 }
0x12e2   :  { %v2785_v19 = vsub.f32 %v8372_v17, %v2783_v6  ;;  %v2812_v26 = vpop.permute.xlu1 %2811 }
0x12e3   :  { %v2788_v21 = vmul.f32 %v8380_v23, %v8380_v23 }
0x12e4   :  { %v2787_v16 = vmul.f32 %v2785_v19, %v2785_v19 }
0x12e5   :  { %v2792_v24 = vsel %vm485_vm1, %v2788_v21, 0.0  ;;  %v3176_v21 = vld [vmem:[%s8935_s19 + $0x30] sm:$0xff] }
0x12e6   :  { %v2789_v20 = vsel %vm485_vm1, %v2787_v16, 0.0 }
0x12e7   :  { %2790 = vadd.xlane.f32.xlu0 %v2789_v20 }
0x12eb   :  { %2793 = vadd.xlane.f32.xlu0 %v2792_v24  ;;  %v3183_v24 = vld [vmem:[%s8935_s19 + $0x68] sm:$0xff] }
0x12ec   :  { %v6705_v51 = vpack.c.bf16 %v3186_v25, %v3183_v24  ;;  %v3061_v24 = vld [vmem:[%s8936_s11 + $0xc8] sm:$0xff] }
0x1301   :  { %2809 = vrot.lane.b32.xlu0 %v1088_v8, %s7697_s8  ;;  %v8414_v8 = vadd.f32 %v8183_v10, %v1011_v3  ;;  %v6701_v10 = vpack.c.bf16 %v3180_v9, %v3177_v15  ;;  %v3055_v3 = vld [vmem:[%s8936_s11 + $0x98] sm:$0xff]  ;;  %v3057_v15 = vld [vmem:[%s8936_s11 + $0xa8] sm:$0xff] }
0x1302   :  { %v6673_v9 = vpack.c.bf16 %v3057_v15, %v3056_v18 }
0x1303   :  { %v2804_v6 = vadd.f32 1.0, %v8414_v8 }
0x1374   :  { %v2791_v59 = vpop.xlane.xlu0 %2790 }
0x1375   :  { %v2795_v60 = vmul.f32 0.015625, %v2791_v59  ;;  %v3053_v59 = vld [vmem:[%s8936_s11 + $0x88] sm:$0xff] }
0x1377   :  { %v2797_v61 = vadd.f32 1e-06, %v2795_v60  ;;  %v6665_v60 = vpack.c.bf16 %v3053_v59, %v3052_v58 }
0x1378   :  { %v2794_v27 = vpop.xlane.xlu0 %2793 }
0x1379   :  { %6978 = vrsqrt.f32 %v2797_v61  ;;  %v2796_v63 = vmul.f32 0.015625, %v2794_v27  ;;  %v3036_v61 = vld [vmem:[%s8936_s11] sm:$0xff]  ;;  %v3037_v27 = vld [vmem:[%s8936_s11 + $0x8] sm:$0xff]  ;;  %6666 = vmatprep.subr.bf16.mxu0 %v6665_v60 }
0x137b   :  { %v2798_v2 = vadd.f32 1e-06, %v2796_v63  ;;  %v6667_v63 = vpack.c.bf16 %v3037_v27, %v3036_v61 }
0x137c   :  { %v2810_v48 = vpop.permute.xlu0 %2809 }
0x137d   :  { %6980 = vrsqrt.f32 %v2798_v2  ;;  %6668 = vmatpush3.bf16.msra.mxu0 %v6667_v63  ;;  %v3054_v2 = vld [vmem:[%s8936_s11 + $0x90] sm:$0xff] }
0x1383   :  { %v6979_v7 = vpop.eup %6978 }
0x1384   :  { %v2801_v32 = vmul.f32 %v6979_v7, %v2785_v19  ;;  %v3179_v19 = vld [vmem:[%s8935_s19 + $0x48] sm:$0xff]  ;;  %v6669_v7 = vpack.c.bf16 %v3055_v3, %v3054_v2 }
0x1385   :  { %v6703_v29 = vpack.c.bf16 %v3179_v19, %v3176_v21  ;;  %v3060_v19 = vld [vmem:[%s8936_s11 + $0xc0] sm:$0xff] }
0x1386   :  { %v2805_v5 = vmul.f32 %v2803_v11, %v2801_v32  ;;  %v3038_v11 = vld [vmem:[%s8936_s11 + $0x10] sm:$0xff]  ;;  %v3039_v32 = vld [vmem:[%s8936_s11 + $0x18] sm:$0xff]  ;;  %6670 = vmatprep.subr.bf16.mxu0 %v6669_v7  ;;  %v6681_v25 = vpack.c.bf16 %v3061_v24, %v3060_v19 }
0x1387   :  { %v6981_v22 = vpop.eup %6980  ;;  %v6671_v13 = vpack.c.bf16 %v3039_v32, %v3038_v11 }
0x1388   :  { %v2815_v16 = vadd.f32 %v2810_v48, %v2805_v5  ;;  %v2802_v20 = vmul.f32 %v6981_v22, %v8380_v23  ;;  %v3040_v5 = vld [vmem:[%s8936_s11 + $0x20] sm:$0xff]  ;;  %v3041_v22 = vld [vmem:[%s8936_s11 + $0x28] sm:$0xff] }
0x1389   :  { %6672 = vmatpush3.bf16.msra.mxu0 %v6671_v13  ;;  %v6675_v48 = vpack.c.bf16 %v3041_v22, %v3040_v5 }
0x138a   :  { %5882 = vmatmul.mubr.msk.f32.vlgmr.msra.gmra.mrb[24].mxu1 %vm485_vm1, %v2815_v16  ;;  %v2806_v0 = vmul.f32 %v2804_v6, %v2802_v20  ;;  %6674 = vmatprep.subr.bf16.mxu0 %v6673_v9  ;;  %v3059_v6 = vld [vmem:[%s8936_s11 + $0xb8] sm:$0xff] }
0x138b   :  { %6700 = vmatpush1.bf16.msra.mxu1 %v6699_v12  ;;  %2921 = vmatprep.mubr.f32.mxu1 %v7695_v1  ;;  %v3058_v12 = vld [vmem:[%s8936_s11 + $0xb0] sm:$0xff]  ;;  %v3043_v20 = vld [vmem:[%s8936_s11 + $0x38] sm:$0xff] }
0x138c   :  { %6702 = vmatprep.subr.bf16.mxu1 %v6701_v10  ;;  %v2816_v23 = vadd.f32 %v2812_v26, %v2806_v0  ;;  %v6677_v16 = vpack.c.bf16 %v3059_v6, %v3058_v12  ;;  %v3042_v10 = vld [vmem:[%s8936_s11 + $0x30] sm:$0xff]  ;;  %v3044_v0 = vld [vmem:[%s8936_s11 + $0x40] sm:$0xff]  ;;  %v3045_v26 = vld [vmem:[%s8936_s11 + $0x48] sm:$0xff] }
0x138d   :  { %6676 = vmatpush3.bf16.msra.mxu0 %v6675_v48  ;;  %v6679_v21 = vpack.c.bf16 %v3043_v20, %v3042_v10  ;;  %v3194_v12 = vld [vmem:[%s8937_s15] sm:$0x7] }
0x138e   :  { %5883 = vmatmul.mubr.msk.f32.gmra.mrb[26].mxu1 %vm485_vm1, %v2816_v23  ;;  %6678 = vmatprep.subr.bf16.mxu0 %v6677_v16  ;;  %v3062_v23 = vld [vmem:[%s8936_s11 + $0xd0] sm:$0xff]  ;;  %v8517_v20 = vrot.slane %v3194_v12, %v8139_v44  ;;  %v3203_v19 = vrot.slane %v3194_v12, %v8202_v34 }
0x138f   :  { %6704 = vmatpush1.bf16.msra.mxu1 %v6703_v29  ;;  %3275 = vmatprep.mubr.f32.mxu1 %v7695_v1  ;;  %v6683_v29 = vpack.c.bf16 %v3045_v26, %v3044_v0 }
0x1390   :  { %6706 = vmatprep.subr.bf16.mxu1 %v6705_v51  ;;  %v3063_v51 = vld [vmem:[%s8936_s11 + $0xd8] sm:$0xff] }
0x1391   :  { %6680 = vmatpush3.bf16.msra.mxu0 %v6679_v21  ;;  %v6685_v31 = vpack.c.bf16 %v3063_v51, %v3062_v23 }
0x1392   :  { %6682 = vmatprep.subr.bf16.mxu0 %v6681_v25 }
0x1393   :  { %6708 = vmatpush1.bf16.msra.mxu1 %v6707_v46  ;;  %v3064_v46 = vld [vmem:[%s8936_s11 + $0xe0] sm:$0xff] }
0x1394   :  { %6710 = vmatprep.subr.bf16.mxu1 %v6709_v37  ;;  %v3065_v37 = vld [vmem:[%s8936_s11 + $0xe8] sm:$0xff] }
0x1395   :  { %6684 = vmatpush3.bf16.msra.mxu0 %v6683_v29  ;;  %v6689_v30 = vpack.c.bf16 %v3065_v37, %v3064_v46 }
0x1396   :  { %6686 = vmatprep.subr.bf16.mxu0 %v6685_v31 }
0x1397   :  { %6712 = vmatpush1.bf16.msra.mxu1 %v6711_v45  ;;  %v3066_v45 = vld [vmem:[%s8936_s11 + $0xf0] sm:$0xff] }
0x1398   :  { %6714 = vmatprep.subr.bf16.mxu1 %v6713_v47 }
0x1399   :  { %6688 = vmatpush3.bf16.msra.mxu0 %v6687_v36 }
0x139a   :  { %5885 = vmatmul.mubr.msk.f32.vlgmr.msra.gmra.mrb[28].mxu1 %vm485_vm1, %v8142_v40  ;;  %6690 = vmatprep.subr.bf16.mxu0 %v6689_v30 }
0x139b   :  { %6716 = vmatpush3.bf16.msra.mxu1 %v6713_v47  ;;  %3281 = vmatprep.mubr.f32.mxu1 %v7695_v1  ;;  %v3067_v47 = vld [vmem:[%s8936_s11 + $0xf8] sm:$0xff] }
0x139c   :  { %6718 = vmatprep.subr.bf16.mxu1 %v6717_v50  ;;  %v6693_v39 = vpack.c.bf16 %v3067_v47, %v3066_v45 }
0x139d   :  { %6692 = vmatpush3.bf16.msra.mxu0 %v6691_v43 }
0x139e   :  { %5886 = vmatmul.mubr.msk.f32.gmra.mrb[30].mxu1 %vm485_vm1, %v8149_v41  ;;  %6694 = vmatprep.subr.bf16.mxu0 %v6693_v39 }
0x139f   :  { %6720 = vmatpush3.bf16.msra.mxu1 %v6717_v50  ;;  %6384 = vmatprep.mubr.msk.f32.mxu1 %vm485_vm1, %v8142_v40  ;;  %v3051_v50 = vld [vmem:[%s8936_s11 + $0x78] sm:$0xff] }
0x13a0   :  { %6722 = vmatprep.subr.bf16.mxu1 %v6721_v54  ;;  %v6695_v52 = vpack.c.bf16 %v3051_v50, %v3050_v49 }
0x13a2   :  { %6696 = vmatpush3.bf16.msra.mxu0 %v6695_v52 }
0x13a3   :  { %6724 = vmatpush3.bf16.msra.mxu1 %v6721_v54  ;;  %v2838_v54 = vrot.slane %v2833_v53, %v8139_v44 }
0x13a4   :  { %6726 = vmatprep.subr.bf16.mxu1 %v6725_v57 }
0x13a7   :  { %6728 = vmatpush3.bf16.msra.mxu1 %v6725_v57 }
0x13a8   :  { %6387 = vmatprep.subr.mxu1 %v7695_v1 }
0x13aa   :  { %6385 = vmatmul.mubr.msk.f32.vlgmr.msra.gmra.mrb[32].mxu1 %vm485_vm1, %v8149_v41 }
0x13ab   :  { %6389 = vmatprep.mubr.msk.f32.mxu1 %vm7694_vm0, %v7695_v1 }
0x145d   :  { %v2917_v56 = vpop.f32.mrb[24].mxu1 }
0x145e   :  { %v8491_v57 = vadd.f32 %v2917_v56, %v2838_v54  ;;  %v2919_v58 = vpop.f32.mrb[25].mxu1 }
0x145f   :  { %v8493_v59 = vadd.f32 %v2919_v58, %v2842_v55 }
0x1460   :  { %v8496_v60 = vmul.f32 0.70710677, %v8491_v57 }
0x1461   :  { %v8499_v61 = vmul.f32 0.70710677, %v8493_v59  ;;  %v2923_v27 = vpop.f32.mrb[26].mxu1 }
0x1462   :  { %v2936_v63 = vand.u32 2147483647, %v8496_v60  ;;  %v8502_v2 = vadd.f32 %v2923_v27, %v2838_v54  ;;  %v2925_v3 = vpop.f32.mrb[27].mxu1  ;;  %vm3016_vm7 = vcmp.ge.f32.partialorder %v8496_v60, 0.0 }
0x1463   :  { %v2937_v7 = vand.u32 2147483647, %v8499_v61  ;;  %v8505_v11 = vadd.f32 %v2925_v3, %v2842_v55  ;;  %v3207_v3 = vrot.slane %v3194_v12, %v1010_v62  ;;  %vm3017_vm8 = vcmp.ge.f32.partialorder %v8499_v61, 0.0 }
0x1464   :  { %v2940_v32 = vmul.f32 0.3275911, %v2936_v63  ;;  %v8508_v13 = vmul.f32 0.70710677, %v8502_v2  ;;  %v2992_v25 = vsub.f32 0.0, %v2936_v63 }
0x1465   :  { %v2941_v18 = vmul.f32 0.3275911, %v2937_v7  ;;  %v8511_v15 = vmul.f32 0.70710677, %v8505_v11  ;;  %v2993_v29 = vsub.f32 0.0, %v2937_v7 }
0x1466   :  { %v2944_v9 = vadd.f32 1.0, %v2940_v32  ;;  %v2938_v5 = vand.u32 2147483647, %v8508_v13  ;;  %v2996_v33 = vmul.f32 %v2992_v25, %v2936_v63  ;;  %vm3018_vm9 = vcmp.ge.f32.partialorder %v8508_v13, 0.0  ;;  %v5884_v13 = vld [vmem:[#allocation21] ss:$0 sm:$0xff] }
0x1467   :  { %v2945_v22 = vadd.f32 1.0, %v2941_v18  ;;  %v2939_v48 = vand.u32 2147483647, %v8511_v15  ;;  %v2997_v30 = vmul.f32 %v2993_v29, %v2937_v7  ;;  %vm3019_vm10 = vcmp.ge.f32.partialorder %v8511_v15, 0.0 }
0x1468   :  { %6982 = vrcp.f32 %v2944_v9  ;;  %v2942_v6 = vmul.f32 0.3275911, %v2938_v5  ;;  %v2994_v35 = vsub.f32 0.0, %v2938_v5  ;;  %v3000_v39 = vmul.f32 1.442695, %v2996_v33 }
0x1469   :  { %6984 = vrcp.f32 %v2945_v22  ;;  %v2943_v16 = vmul.f32 0.3275911, %v2939_v48  ;;  %v2995_v38 = vsub.f32 0.0, %v2939_v48  ;;  %v3002_v54 = vmul.f32 1.442695, %v2997_v30 }
0x146a   :  { %v2946_v10 = vadd.f32 1.0, %v2942_v6  ;;  %v2998_v49 = vmul.f32 %v2994_v35, %v2938_v5 }
0x146b   :  { %v2947_v21 = vadd.f32 1.0, %v2943_v16  ;;  %v2999_v55 = vmul.f32 %v2995_v38, %v2939_v48 }
0x146c   :  { %6986 = vrcp.f32 %v2946_v10  ;;  %v3004_v32 = vmul.f32 1.442695, %v2998_v49 }
0x146d   :  { %6988 = vrcp.f32 %v2947_v21  ;;  %v3277_v24 = vpop.f32.mrb[28].mxu1  ;;  %v3006_v5 = vmul.f32 1.442695, %v2999_v55 }
0x146e   :  { %v8521_v0 = vadd.f32 %v3277_v24, %v8517_v20  ;;  %v3279_v26 = vpop.f32.mrb[29].mxu1  ;;  %6990 = vpow2.f32 %v3000_v39 }
0x146f   :  { %v8523_v23 = vadd.f32 %v3279_v26, %v3203_v19  ;;  %6992 = vpow2.f32 %v3002_v54 }
0x1470   :  { %6994 = vpow2.f32 %v3004_v32 }
0x1471   :  { %v8525_v51 = vpop.f32.mrb[30].mxu1  ;;  %6996 = vpow2.f32 %v3006_v5 }
0x1472   :  { %v6983_v31 = vpop.eup %6982  ;;  %v3285_v36 = vpop.f32.mrb[31].mxu1 }
0x1473   :  { %v6985_v46 = vpop.eup %6984  ;;  %v2956_v37 = vmul.f32 1.0614054, %v6983_v31  ;;  %v8527_v42 = vadd.f32 %v3285_v36, %v3203_v19 }
0x1474   :  { %v2957_v43 = vmul.f32 1.0614054, %v6985_v46 }
0x1475   :  { %v2960_v45 = vadd.f32 -1.4531521, %v2956_v37 }
0x1476   :  { %v6987_v47 = vpop.eup %6986  ;;  %v2961_v50 = vadd.f32 -1.4531521, %v2957_v43 }
0x1477   :  { %v6989_v52 = vpop.eup %6988  ;;  %v2964_v53 = vmul.f32 %v6983_v31, %v2960_v45  ;;  %v2958_v56 = vmul.f32 1.0614054, %v6987_v47 }
0x1478   :  { %v2965_v58 = vmul.f32 %v6985_v46, %v2961_v50  ;;  %v2959_v27 = vmul.f32 1.0614054, %v6989_v52  ;;  %v6991_v39 = vpop.eup %6990 }
0x1479   :  { %v2968_v63 = vadd.f32 1.4214138, %v2964_v53  ;;  %v2962_v7 = vadd.f32 -1.4531521, %v2958_v56  ;;  %v6993_v53 = vpop.eup %6992 }
0x147a   :  { %v2969_v18 = vadd.f32 1.4214138, %v2965_v58  ;;  %v2963_v9 = vadd.f32 -1.4531521, %v2959_v27 }
0x147b   :  { %v2972_v22 = vmul.f32 %v6983_v31, %v2968_v63  ;;  %v2966_v6 = vmul.f32 %v6987_v47, %v2962_v7 }
0x147c   :  { %v2973_v16 = vmul.f32 %v6985_v46, %v2969_v18  ;;  %v2967_v10 = vmul.f32 %v6989_v52, %v2963_v9 }
0x147d   :  { %v2976_v21 = vadd.f32 -0.28449672, %v2972_v22  ;;  %v6386_v48 = vpop.f32.mrb[32].mxu1  ;;  %v2970_v19 = vadd.f32 1.4214138, %v2966_v6 }
0x147e   :  { %v8531_v24 = vadd.f32 %v6386_v48, %v3207_v3  ;;  %v3354_v25 = vpop.f32.mrb[33].mxu1  ;;  %v2977_v28 = vadd.f32 -0.28449672, %v2973_v16  ;;  %v2971_v62 = vadd.f32 1.4214138, %v2967_v10  ;;  %v2929_v48 = vmul.f32 0.5, %v8493_v59 }
0x147f   :  { %v2980_v12 = vmul.f32 %v6983_v31, %v2976_v21  ;;  %v8533_v26 = vadd.f32 %v3354_v25, %v3207_v3  ;;  %v2974_v29 = vmul.f32 %v6987_v47, %v2970_v19  ;;  %v6995_v3 = vpop.eup %6994  ;;  %v2930_v59 = vmul.f32 0.5, %v8502_v2 }
0x1480   :  { %v2981_v33 = vmul.f32 %v6985_v46, %v2977_v28  ;;  %v2975_v35 = vmul.f32 %v6989_v52, %v2971_v62  ;;  %v6997_v18 = vpop.eup %6996 }
0x1481   :  { %v2984_v36 = vadd.f32 0.2548296, %v2980_v12  ;;  %v2978_v37 = vadd.f32 -0.28449672, %v2974_v29  ;;  %v2931_v29 = vmul.f32 0.5, %v8505_v11 }
0x1482   :  { %v2985_v30 = vadd.f32 0.2548296, %v2981_v33  ;;  %v2979_v38 = vadd.f32 -0.28449672, %v2975_v35 }
0x1483   :  { %v2988_v43 = vmul.f32 %v6983_v31, %v2984_v36  ;;  %v2982_v45 = vmul.f32 %v6987_v47, %v2978_v37 }
0x1484   :  { %v2989_v49 = vmul.f32 %v6985_v46, %v2985_v30  ;;  %v2983_v50 = vmul.f32 %v6989_v52, %v2979_v38 }
0x1485   :  { %v3008_v54 = vmul.f32 %v6991_v39, %v2988_v43  ;;  %v2986_v55 = vadd.f32 0.2548296, %v2982_v45 }
0x1486   :  { %v3009_v56 = vmul.f32 %v6993_v53, %v2989_v49  ;;  %v2987_v58 = vadd.f32 0.2548296, %v2983_v50 }
0x1487   :  { %v3012_v27 = vsub.f32 1.0, %v3008_v54  ;;  %v2990_v63 = vmul.f32 %v6987_v47, %v2986_v55 }
0x1488   :  { %v3013_v7 = vsub.f32 1.0, %v3009_v56  ;;  %v2991_v32 = vmul.f32 %v6989_v52, %v2987_v58  ;;  %v2928_v52 = vmul.f32 0.5, %v8491_v57 }
0x1489   :  { %v3020_v9 = vsub.f32 0.0, %v3012_v27  ;;  %v3010_v22 = vmul.f32 %v6995_v3, %v2990_v63 }
0x148a   :  { %v3021_v31 = vsub.f32 0.0, %v3013_v7  ;;  %v3011_v5 = vmul.f32 %v6997_v18, %v2991_v32 }
0x148b   :  { %v3024_v6 = vsel %vm3016_vm7, %v3012_v27, %v3020_v9  ;;  %v3014_v46 = vsub.f32 1.0, %v3010_v22 }
0x148c   :  { %v3028_v16 = vadd.f32 1.0, %v3024_v6  ;;  %v3025_v10 = vsel %vm3017_vm8, %v3013_v7, %v3021_v31  ;;  %v3015_v21 = vsub.f32 1.0, %v3011_v5  ;;  %v3406_v31 = vld [vmem:[#allocation22 + $0x18] sm:$0xff]  ;;  %v3403_v6 = vld [vmem:[#allocation22] sm:$0xff] }
0x148d   :  { %v3029_v47 = vadd.f32 1.0, %v3025_v10  ;;  %v3022_v19 = vsub.f32 0.0, %v3014_v46  ;;  %v3408_v10 = vld [vmem:[#allocation22 + $0x28] sm:$0xff] }
0x148e   :  { %v3023_v25 = vsub.f32 0.0, %v3015_v21  ;;  %v3032_v62 = vmul.f32 %v3028_v16, %v2928_v52 }
0x148f   :  { %v3033_v60 = vmul.f32 %v3029_v47, %v2929_v48  ;;  %v3026_v28 = vsel %vm3018_vm9, %v3014_v46, %v3022_v19  ;;  %v3405_v46 = vld [vmem:[#allocation22 + $0x10] sm:$0xff]  ;;  %v3407_v47 = vld [vmem:[#allocation22 + $0x20] sm:$0xff] }
0x1490   :  { %v3027_v12 = vsel %vm3019_vm10, %v3015_v21, %v3023_v25  ;;  %v3030_v61 = vadd.f32 1.0, %v3026_v28  ;;  %v6731_v16 = vpack.c.bf16 %v3405_v46, %v3403_v6  ;;  %v3410_v21 = vld [vmem:[#allocation22 + $0x38] sm:$0xff]  ;;  %v3409_v19 = vld [vmem:[#allocation22 + $0x30] sm:$0xff]  ;;  %v3389_v25 = vadd.f32 1.0, %v8521_v0 }
0x1491   :  { %3139 = vmatprep.mubr.f32.mxu0 %v3033_v60  ;;  %v3031_v33 = vadd.f32 1.0, %v3027_v12  ;;  %v6733_v48 = vpack.c.bf16 %v3410_v21, %v3408_v10  ;;  %v6735_v52 = vpack.c.bf16 %v3409_v19, %v3407_v47  ;;  %v3412_v60 = vld [vmem:[#allocation22 + $0x48] sm:$0xff]  ;;  %v3414_v28 = vld [vmem:[#allocation22 + $0x58] sm:$0xff]  ;;  %v3411_v12 = vld [vmem:[#allocation22 + $0x40] sm:$0xff] }
0x1492   :  { %3140 = vmatmul.mubr.f32.vlgmr.msra.gmra.mrb[30].mxu0 %v3032_v62  ;;  %v3034_v36 = vmul.f32 %v3030_v61, %v2930_v59  ;;  %v6737_v62 = vpack.c.bf16 %v3414_v28, %v3412_v60  ;;  %v3413_v61 = vld [vmem:[#allocation22 + $0x50] sm:$0xff]  ;;  %v3418_v59 = vld [vmem:[#allocation22 + $0x78] sm:$0xff] }
0x1493   :  { %v3035_v35 = vmul.f32 %v3031_v33, %v2931_v29  ;;  %v6739_v29 = vpack.c.bf16 %v3413_v61, %v3411_v12  ;;  %v3416_v33 = vld [vmem:[#allocation22 + $0x68] sm:$0xff] }
0x1495   :  { %3144 = vmatprep.mubr.f32.mxu0 %v3035_v35  ;;  %v6741_v35 = vpack.c.bf16 %v3418_v59, %v3416_v33 }
0x1496   :  { %3145 = vmatmul.mubr.f32.gmra.mrb[32].mxu0 %v3034_v36  ;;  %v3415_v36 = vld [vmem:[#allocation22 + $0x60] sm:$0xff] }
0x1497   :  { %3501 = vmatprep.mubr.f32.mxu0 %v7695_v1 }
0x1565   :  { %v6051_v57 = vpop.f32.mrb[30].mxu0 }
0x1566   :  { %v6052_v15 = vpop.f32.mrb[31].mxu0 }
0x1567   :  { %v6053_v37 = vadd.f32 %v6052_v15, %v6051_v57  ;;  %v3417_v57 = vld [vmem:[#allocation22 + $0x70] sm:$0xff] }
0x1569   :  { %v3142_v30 = vadd.f32 %v6053_v37, %v5884_v13  ;;  %v6054_v38 = vpop.f32.mrb[32].mxu0 }
0x156a   :  { %v6055_v43 = vpop.f32.mrb[33].mxu0 }
0x156b   :  { %v6056_v45 = vadd.f32 %v6055_v43, %v6054_v38  ;;  %3152 = vrot.lane.b32.xlu1 %v3142_v30, %s7697_s8 }
0x156d   :  { %v3147_v11 = vadd.f32 %v6056_v45, %v5884_v13  ;;  %v6743_v13 = vpack.c.bf16 %v3417_v57, %v3415_v36 }
0x156f   :  { %3154 = vrot.lane.b32.xlu1 %v3147_v11, %s7697_s8 }
0x15dd   :  { %v3153_v2 = vpop.permute.xlu1 %3152 }
0x15de   :  { %v3158_v39 = vmul.f32 %v3153_v2, %v8411_v4 }
0x15e0   :  { %3162 = vrot.lane.b32.xlu0 %v3158_v39, %s7697_s8 }
0x15e1   :  { %v3155_v49 = vpop.permute.xlu1 %3154 }
0x15e2   :  { %v3159_v50 = vmul.f32 %v3155_v49, %v8414_v8  ;;  %v8562_v8 = vadd.f32 %v8525_v51, %v8517_v20  ;;  %v3404_v51 = vld [vmem:[#allocation22 + $0x8] sm:$0xff] }
0x15e3   :  { %v6729_v5 = vpack.c.bf16 %v3406_v31, %v3404_v51 }
0x15e4   :  { %3164 = vrot.lane.b32.xlu1 %v3159_v50, %s7697_s8  ;;  %v3390_v27 = vadd.f32 1.0, %v8562_v8 }
0x15e5   :  { %6730 = vmatprep.subr.bf16.mxu0 %v6729_v5 }
0x15e6   :  { %6732 = vmatpush1.bf16.msra.mxu0 %v6731_v16 }
0x15e7   :  { %6734 = vmatprep.subr.bf16.mxu0 %v6733_v48 }
0x15ea   :  { %6736 = vmatpush1.bf16.msra.mxu0 %v6735_v52 }
0x15eb   :  { %6738 = vmatprep.subr.bf16.mxu0 %v6737_v62 }
0x15ee   :  { %6740 = vmatpush1.bf16.msra.mxu0 %v6739_v29 }
0x15ef   :  { %6742 = vmatprep.subr.bf16.mxu0 %v6741_v35 }
0x15f2   :  { %6744 = vmatpush1.bf16.msra.mxu0 %v6743_v13 }
0x15f3   :  { %6412 = vmatprep.subr.mxu0 %v7695_v1 }
0x1652   :  { %v3163_v53 = vpop.permute.xlu0 %3162 }
0x1653   :  { %v8551_v54 = vadd.f32 %v3163_v53, %v8372_v17 }
0x1655   :  { %v3363_v55 = vsel %vm485_vm1, %v8551_v54, 0.0 }
0x1656   :  { %3364 = vadd.xlane.f32.xlu0 %v3363_v55  ;;  %v3165_v56 = vpop.permute.xlu1 %3164 }
0x1657   :  { %v8556_v58 = vadd.f32 %v3165_v56, %v8369_v14 }
0x1659   :  { %v3366_v4 = vsel %vm485_vm1, %v8556_v58, 0.0 }
0x165a   :  { %3367 = vadd.xlane.f32.xlu1 %v3366_v4 }
0x166b   :  { %3395 = vrot.lane.b32.xlu1 %v3390_v27, %s7697_s8 }
0x16e3   :  { %v3365_v17 = vpop.xlane.xlu0 %3364 }
0x16e4   :  { %v3369_v63 = vmul.f32 0.015625, %v3365_v17  ;;  %v3419_v17 = vld [vmem:[%s8938_s16] sm:$0x3] }
0x16e6   :  { %v3371_v3 = vsub.f32 %v8551_v54, %v3369_v63  ;;  %v3424_v63 = vrot.slane %v3419_v17, %v8139_v44 }
0x16e7   :  { %v3368_v7 = vpop.xlane.xlu1 %3367 }
0x16e8   :  { %v3370_v32 = vmul.f32 0.015625, %v3368_v7  ;;  %v3373_v14 = vmul.f32 %v3371_v3, %v3371_v3 }
0x16ea   :  { %v3372_v18 = vsub.f32 %v8556_v58, %v3370_v32  ;;  %v3375_v9 = vsel %vm485_vm1, %v3373_v14, 0.0  ;;  %v3428_v32 = vrot.slane %v3419_v17, %v8202_v34 }
0x16eb   :  { %3376 = vadd.xlane.f32.xlu0 %v3375_v9  ;;  %v3396_v56 = vpop.permute.xlu1 %3395 }
0x16ec   :  { %v3374_v22 = vmul.f32 %v3372_v18, %v3372_v18 }
0x16ee   :  { %v3378_v20 = vsel %vm485_vm1, %v3374_v22, 0.0 }
0x16ef   :  { %3379 = vadd.xlane.f32.xlu0 %v3378_v20 }
0x1705   :  { %3393 = vrot.lane.b32.xlu0 %v3389_v25, %s7697_s8 }
0x1778   :  { %v3377_v15 = vpop.xlane.xlu0 %3376 }
0x1779   :  { %v3381_v37 = vmul.f32 0.015625, %v3377_v15 }
0x177b   :  { %v3383_v30 = vadd.f32 1e-06, %v3381_v37 }
0x177c   :  { %v3380_v38 = vpop.xlane.xlu0 %3379 }
0x177d   :  { %6998 = vrsqrt.f32 %v3383_v30  ;;  %v3382_v43 = vmul.f32 0.015625, %v3380_v38 }
0x177f   :  { %v3384_v45 = vadd.f32 1e-06, %v3382_v43 }
0x1780   :  { %v3394_v39 = vpop.permute.xlu0 %3393 }
0x1781   :  { %7000 = vrsqrt.f32 %v3384_v45 }
0x1787   :  { %v6999_v11 = vpop.eup %6998 }
0x1788   :  { %v3387_v2 = vmul.f32 %v6999_v11, %v3371_v3 }
0x178a   :  { %v3399_v49 = vmul.f32 %v3394_v39, %v3387_v2 }
0x178b   :  { %v7001_v50 = vpop.eup %7000 }
0x178c   :  { %v3401_v53 = vadd.f32 %v3399_v49, %v8521_v0  ;;  %v3388_v55 = vmul.f32 %v7001_v50, %v3372_v18 }
0x178e   :  { %5889 = vmatmul.mubr.msk.f32.vlgmr.msra.gmra.mrb[34].mxu0 %vm485_vm1, %v3401_v53  ;;  %v3400_v4 = vmul.f32 %v3396_v56, %v3388_v55 }
0x178f   :  { %3507 = vmatprep.mubr.f32.mxu0 %v7695_v1 }
0x1790   :  { %v3402_v27 = vadd.f32 %v3400_v4, %v8562_v8 }
0x1792   :  { %5890 = vmatmul.mubr.msk.f32.gmra.mrb[36].mxu0 %vm485_vm1, %v3402_v27 }
0x1793   :  { %6414 = vmatprep.mubr.msk.f32.mxu0 %vm7694_vm0, %v7695_v1 }
0x1861   :  { %v3503_v3 = vpop.f32.mrb[34].mxu0 }
0x1862   :  { %v8582_v7 = vadd.f32 %v3503_v3, %v3424_v63  ;;  %v3505_v0 = vpop.f32.mrb[35].mxu0 }
0x1863   :  { %v8601_v51 = vadd.f32 %v3505_v0, %v3428_v32 }
0x1864   :  { %3515 = vrot.lane.b32.xlu1 %v8582_v7, %s7697_s8 }
0x1865   :  { %v3509_v14 = vpop.f32.mrb[36].mxu0 }
0x1866   :  { %v8587_v18 = vadd.f32 %v3509_v14, %v3424_v63  ;;  %v3511_v8 = vpop.f32.mrb[37].mxu0 }
0x1867   :  { %v8589_v9 = vadd.f32 %v3511_v8, %v3428_v32 }
0x1868   :  { %3592 = vrot.lane.b32.xlu1 %v8587_v18, %s7697_s8 }
0x18d6   :  { %v3516_v22 = vpop.permute.xlu1 %3515 }
0x18d7   :  { %6388 = vmatpush3.xpose.msk.msra.mxu1 %vm1326_vm5, %v3516_v22 }
0x18d8   :  { %6392 = vmatprep.subr.mxu1 %v7695_v1 }
0x18da   :  { %6390 = vmatmul.mubr.msk.f32.vlgmr.msra.gmra.mrb[34].mxu1 %vm1326_vm5, %v8582_v7  ;;  %v3593_v20 = vpop.permute.xlu1 %3592 }
0x18db   :  { %6393 = vmatpush3.xpose.msk.msra.mxu1 %vm1326_vm5, %v3593_v20  ;;  %6394 = vmatprep.mubr.msk.f32.mxu1 %vm7694_vm0, %v7695_v1 }
0x18dc   :  { %6397 = vmatprep.subr.mxu1 %v7695_v1 }
0x18de   :  { %6395 = vmatmul.mubr.msk.f32.vlgmr.msra.gmra.mrb[36].mxu1 %vm1326_vm5, %v8587_v18 }
0x18df   :  { %6398 = vmatpush3.msra.mxu1 %v8601_v51  ;;  %6399 = vmatprep.mubr.msk.f32.mxu1 %vm7694_vm0, %v7695_v1 }
0x18e0   :  { %6402 = vmatprep.subr.mxu1 %v7695_v1 }
0x19ad   :  { %v3587_v31 = vpop.f32.mrb[34].mxu1 }
0x19ae   :  { %v3668_v5 = vmul.f32 0.25, %v3587_v31  ;;  %v6391_v6 = vpop.f32.mrb[35].mxu1 }
0x19b0   :  { %v3670_v46 = vsel %vm888_vm3, %v3668_v5, -inf }
0x19b1   :  { %3671 = vmax.xlane.f32.xlu0 %v3670_v46  ;;  %v3664_v16 = vpop.f32.mrb[36].mxu1 }
0x19b2   :  { %v3669_v10 = vmul.f32 0.25, %v3664_v16  ;;  %v6396_v21 = vpop.f32.mrb[37].mxu1 }
0x19b4   :  { %v3673_v48 = vsel %vm888_vm3, %v3669_v10, -inf }
0x19b5   :  { %3674 = vmax.xlane.f32.xlu1 %v3673_v48 }
0x19c6   :  { %3918 = vrot.lane.b32.xlu1 %v8587_v18, %s7698_s2 }
0x19ca   :  { %3838 = vrot.lane.b32.xlu1 %v8582_v7, %s7699_s4 }
0x19ce   :  { %3916 = vrot.lane.b32.xlu1 %v8587_v18, %s7699_s4 }
0x1a3e   :  { %v3672_v47 = vpop.xlane.xlu0 %3671 }
0x1a3f   :  { %v3676_v19 = vsub.f32 %v3668_v5, %v3672_v47 }
0x1a41   :  { %v3678_v52 = vmul.f32 1.442695, %v3676_v19 }
0x1a42   :  { %v3675_v25 = vpop.xlane.xlu1 %3674 }
0x1a43   :  { %7002 = vpow2.f32 %v3678_v52  ;;  %v3677_v60 = vsub.f32 %v3669_v10, %v3675_v25 }
0x1a45   :  { %v3680_v28 = vmul.f32 1.442695, %v3677_v60 }
0x1a46   :  { %v3919_v62 = vpop.permute.xlu1 %3918 }
0x1a47   :  { %7004 = vpow2.f32 %v3680_v28  ;;  %6413 = vmatpush3.xpose.msk.msra.mxu0 %vm1326_vm5, %v3919_v62 }
0x1a48   :  { %6422 = vmatprep.subr.mxu0 %v7695_v1 }
0x1a4a   :  { %v3839_v12 = vpop.permute.xlu1 %3838 }
0x1a4d   :  { %v7003_v61 = vpop.eup %7002 }
0x1a4e   :  { %v3917_v29 = vpop.permute.xlu1 %3916  ;;  %v3682_v33 = vsel %vm888_vm3, %v7003_v61, 0.0 }
0x1a4f   :  { %3683 = vadd.xlane.f32.xlu0 %v3682_v33  ;;  %6415 = vmatmul.mubr.msk.f32.vlgmr.msra.gmra.mrb[38].mxu0 %vm1326_vm5, %v3917_v29 }
0x1a50   :  { %6424 = vmatprep.mubr.msk.f32.mxu0 %vm7694_vm0, %v7695_v1 }
0x1a51   :  { %v7005_v59 = vpop.eup %7004 }
0x1a52   :  { %v3685_v35 = vsel %vm888_vm3, %v7005_v59, 0.0 }
0x1a53   :  { %3686 = vadd.xlane.f32.xlu0 %v3685_v35 }
0x1a69   :  { %3840 = vrot.lane.b32.xlu0 %v8582_v7, %s7698_s2 }
0x1adc   :  { %v3684_v36 = vpop.xlane.xlu0 %3683 }
0x1add   :  { %7006 = vrcp.f32 %v3684_v36 }
0x1ae0   :  { %v3687_v57 = vpop.xlane.xlu0 %3686 }
0x1ae1   :  { %7008 = vrcp.f32 %v3687_v57 }
0x1ae4   :  { %v3841_v38 = vpop.permute.xlu0 %3840 }
0x1ae7   :  { %v7007_v13 = vpop.eup %7006 }
0x1ae8   :  { %v3690_v15 = vmul.f32 %v7007_v13, %v7003_v61 }
0x1aea   :  { %6400 = vmatmul.mubr.msk.f32.vlgmr.msra.gmra.mrb[38].mxu1 %vm888_vm3, %v3690_v15 }
0x1aeb   :  { %v7009_v37 = vpop.eup %7008  ;;  %6403 = vmatpush3.msra.mxu1 %v8589_v9  ;;  %6404 = vmatprep.mubr.msk.f32.mxu1 %vm7694_vm0, %v7695_v1 }
0x1aec   :  { %v3691_v30 = vmul.f32 %v7009_v37, %v7005_v59  ;;  %6407 = vmatprep.subr.mxu1 %v7695_v1 }
0x1aee   :  { %6405 = vmatmul.mubr.msk.f32.vlgmr.msra.gmra.mrb[40].mxu1 %vm888_vm3, %v3691_v30 }
0x1aef   :  { %6409 = vmatprep.mubr.msk.f32.mxu1 %vm7694_vm0, %v7695_v1 }
0x1af2   :  { %6408 = vmatpush3.xpose.msk.msra.mxu1 %vm1326_vm5, %v3841_v38 }
0x1af3   :  { %6417 = vmatprep.subr.mxu1 %v7695_v1 }
0x1af5   :  { %6410 = vmatmul.mubr.msk.f32.vlgmr.msra.gmra.mrb[42].mxu1 %vm1326_vm5, %v3839_v12 }
0x1af6   :  { %6419 = vmatprep.mubr.msk.f32.mxu1 %vm7694_vm0, %v7695_v1 }
0x1b22   :  { %v3990_v43 = vpop.f32.mrb[38].mxu0 }
0x1b23   :  { %v3995_v45 = vmul.f32 0.25, %v3990_v43  ;;  %v6416_v11 = vpop.f32.mrb[39].mxu0 }
0x1b25   :  { %v3999_v2 = vsel %vm888_vm3, %v3995_v45, -inf }
0x1b26   :  { %4000 = vmax.xlane.f32.xlu1 %v3999_v2 }
0x1b37   :  { %4096 = vrot.lane.b32.xlu1 %v8589_v9, %s7699_s4 }
0x1b3b   :  { %4174 = vrot.lane.b32.xlu1 %v8582_v7, %s7700_s24 }
0x1b3f   :  { %4252 = vrot.lane.b32.xlu1 %v8587_v18, %s7700_s24 }
0x1b43   :  { %4250 = vrot.lane.b32.xlu1 %v8587_v18, %s7701_s7 }
0x1bb3   :  { %v4001_v39 = vpop.xlane.xlu1 %4000 }
0x1bb4   :  { %v4003_v50 = vsub.f32 %v3995_v45, %v4001_v39 }
0x1bb6   :  { %v4006_v55 = vmul.f32 1.442695, %v4003_v50 }
0x1bb7   :  { %v4097_v49 = vpop.permute.xlu1 %4096 }
0x1bb8   :  { %6423 = vmatpush3.msra.mxu0 %v4097_v49  ;;  %7010 = vpow2.f32 %v4006_v55 }
0x1bb9   :  { %6432 = vmatprep.subr.mxu0 %v7695_v1 }
0x1bbb   :  { %v4175_v6 = vpop.permute.xlu1 %4174 }
0x1bbd   :  { %v8649_v53 = vpop.f32.mrb[38].mxu1 }
0x1bbe   :  { %v6401_v56 = vpop.f32.mrb[39].mxu1 }
0x1bbf   :  { %v4253_v10 = vpop.permute.xlu1 %4252 }
0x1bc1   :  { %v8651_v4 = vpop.f32.mrb[40].mxu1 }
0x1bc2   :  { %v6406_v27 = vpop.f32.mrb[41].mxu1  ;;  %v7011_v32 = vpop.eup %7010 }
0x1bc3   :  { %v4011_v14 = vsel %vm888_vm3, %v7011_v32, 0.0  ;;  %v4251_v47 = vpop.permute.xlu1 %4250 }
0x1bc8   :  { %v3912_v17 = vpop.f32.mrb[42].mxu1 }
0x1bc9   :  { %v3994_v63 = vmul.f32 0.25, %v3912_v17  ;;  %v6411_v3 = vpop.f32.mrb[43].mxu1 }
0x1bcb   :  { %v3996_v0 = vsel %vm888_vm3, %v3994_v63, -inf }
0x1bcc   :  { %3997 = vmax.xlane.f32.xlu0 %v3996_v0 }
0x1bd0   :  { %4012 = vadd.xlane.f32.xlu0 %v4011_v14 }
0x1be6   :  { %4019 = vrot.lane.b32.xlu0 %v8601_v51, %s7699_s4 }
0x1c59   :  { %v3998_v8 = vpop.xlane.xlu0 %3997 }
0x1c5a   :  { %v4002_v22 = vsub.f32 %v3994_v63, %v3998_v8 }
0x1c5c   :  { %v4004_v20 = vmul.f32 1.442695, %v4002_v22 }
0x1c5d   :  { %v4013_v31 = vpop.xlane.xlu0 %4012 }
0x1c5e   :  { %7012 = vpow2.f32 %v4004_v20 }
0x1c5f   :  { %7014 = vrcp.f32 %v4013_v31 }
0x1c61   :  { %v4020_v5 = vpop.permute.xlu0 %4019 }
0x1c62   :  { %6418 = vmatpush3.msra.mxu1 %v4020_v5 }
0x1c63   :  { %6427 = vmatprep.subr.mxu1 %v7695_v1 }
0x1c68   :  { %v7013_v46 = vpop.eup %7012 }
0x1c69   :  { %v7015_v16 = vpop.eup %7014  ;;  %v4008_v21 = vsel %vm888_vm3, %v7013_v46, 0.0 }
0x1c6a   :  { %v4017_v48 = vmul.f32 %v7015_v16, %v7011_v32  ;;  %4009 = vadd.xlane.f32.xlu0 %v4008_v21 }
0x1c6c   :  { %6425 = vmatmul.mubr.msk.f32.vlgmr.msra.gmra.mrb[40].mxu0 %vm888_vm3, %v4017_v48 }
0x1c6d   :  { %6433 = vmatpush3.xpose.msk.msra.mxu0 %vm1326_vm5, %v4253_v10  ;;  %6434 = vmatprep.mubr.msk.f32.mxu0 %vm7694_vm0, %v7695_v1 }
0x1c6e   :  { %6442 = vmatprep.subr.mxu0 %v7695_v1 }
0x1c70   :  { %6435 = vmatmul.mubr.msk.f32.vlgmr.msra.gmra.mrb[42].mxu0 %vm1326_vm5, %v4251_v47 }
0x1c71   :  { %6444 = vmatprep.mubr.msk.f32.mxu0 %vm7694_vm0, %v7695_v1 }
0x1c80   :  { %4172 = vrot.lane.b32.xlu0 %v8582_v7, %s7701_s7 }
0x1cf7   :  { %v4010_v19 = vpop.xlane.xlu0 %4009 }
0x1cf8   :  { %7016 = vrcp.f32 %v4010_v19 }
0x1cfb   :  { %v4173_v60 = vpop.permute.xlu0 %4172 }
0x1d02   :  { %v7017_v52 = vpop.eup %7016 }
0x1d03   :  { %v4016_v25 = vmul.f32 %v7017_v52, %v7013_v46 }
0x1d05   :  { %6420 = vmatmul.mubr.msk.f32.vlgmr.msra.gmra.mrb[44].mxu1 %vm888_vm3, %v4016_v25 }
0x1d06   :  { %6428 = vmatpush3.xpose.msk.msra.mxu1 %vm1326_vm5, %v4175_v6  ;;  %6429 = vmatprep.mubr.msk.f32.mxu1 %vm7694_vm0, %v7695_v1 }
0x1d07   :  { %6437 = vmatprep.subr.mxu1 %v7695_v1 }
0x1d09   :  { %6430 = vmatmul.mubr.msk.f32.vlgmr.msra.gmra.mrb[46].mxu1 %vm1326_vm5, %v4173_v60 }
0x1d0a   :  { %6439 = vmatprep.mubr.msk.f32.mxu1 %vm7694_vm0, %v7695_v1 }
0x1d3f   :  { %v8677_v28 = vpop.f32.mrb[40].mxu0 }
0x1d40   :  { %v6426_v62 = vpop.f32.mrb[41].mxu0 }
0x1d43   :  { %v4324_v12 = vpop.f32.mrb[42].mxu0 }
0x1d44   :  { %v4329_v61 = vmul.f32 0.25, %v4324_v12  ;;  %v6436_v29 = vpop.f32.mrb[43].mxu0 }
0x1d46   :  { %v4333_v33 = vsel %vm888_vm3, %v4329_v61, -inf }
0x1d47   :  { %4334 = vmax.xlane.f32.xlu1 %v4333_v33 }
0x1d58   :  { %4428 = vrot.lane.b32.xlu1 %v8589_v9, %s7701_s7 }
0x1d5c   :  { %4506 = vrot.lane.b32.xlu1 %v8582_v7, %s7675_s6 }
0x1d60   :  { %4584 = vrot.lane.b32.xlu1 %v8587_v18, %s7675_s6 }
0x1d64   :  { %4582 = vrot.lane.b32.xlu1 %v8587_v18, %s7702_s10 }
0x1dd4   :  { %v4335_v59 = vpop.xlane.xlu1 %4334 }
0x1dd5   :  { %v4337_v35 = vsub.f32 %v4329_v61, %v4335_v59 }
0x1dd7   :  { %v4340_v36 = vmul.f32 1.442695, %v4337_v35 }
0x1dd8   :  { %v4429_v57 = vpop.permute.xlu1 %4428  ;;  %v4091_v13 = vpop.f32.mrb[44].mxu1 }
0x1dd9   :  { %7018 = vpow2.f32 %v4340_v36  ;;  %6443 = vmatpush3.msra.mxu0 %v4429_v57  ;;  %v6421_v15 = vpop.f32.mrb[45].mxu1 }
0x1dda   :  { %6452 = vmatprep.subr.mxu0 %v7695_v1 }
0x1ddc   :  { %v4246_v37 = vpop.f32.mrb[46].mxu1  ;;  %v4507_v55 = vpop.permute.xlu1 %4506 }
0x1ddd   :  { %v4328_v30 = vmul.f32 0.25, %v4246_v37  ;;  %v6431_v38 = vpop.f32.mrb[47].mxu1 }
0x1ddf   :  { %v4330_v43 = vsel %vm888_vm3, %v4328_v30, -inf }
0x1de0   :  { %4331 = vmax.xlane.f32.xlu0 %v4330_v43  ;;  %v4585_v17 = vpop.permute.xlu1 %4584 }
0x1de3   :  { %v7019_v45 = vpop.eup %7018 }
0x1de4   :  { %v4345_v11 = vsel %vm888_vm3, %v7019_v45, 0.0  ;;  %v4583_v0 = vpop.permute.xlu1 %4582 }
0x1de5   :  { %4346 = vadd.xlane.f32.xlu0 %v4345_v11  ;;  %v4867_v11 = vld [vmem:[#allocation24 + $0x8] sm:$0xff] }
0x1dfb   :  { %4352 = vrot.lane.b32.xlu0 %v8601_v51, %s7701_s7 }
0x1e6d   :  { %v4332_v18 = vpop.xlane.xlu0 %4331 }
0x1e6e   :  { %v4336_v2 = vsub.f32 %v4328_v30, %v4332_v18  ;;  %v4868_v18 = vld [vmem:[#allocation24 + $0x10] sm:$0xff] }
0x1e70   :  { %v4338_v39 = vmul.f32 1.442695, %v4336_v2 }
0x1e72   :  { %7020 = vpow2.f32 %v4338_v39  ;;  %v4347_v49 = vpop.xlane.xlu0 %4346  ;;  %v4869_v39 = vld [vmem:[#allocation24 + $0x18] sm:$0xff] }
0x1e73   :  { %7022 = vrcp.f32 %v4347_v49  ;;  %v4870_v49 = vld [vmem:[#allocation24 + $0x20] sm:$0xff] }
0x1e76   :  { %v4353_v50 = vpop.permute.xlu0 %4352 }
0x1e77   :  { %6438 = vmatpush3.msra.mxu1 %v4353_v50  ;;  %v4871_v50 = vld [vmem:[#allocation24 + $0x28] sm:$0xff] }
0x1e78   :  { %6447 = vmatprep.subr.mxu1 %v7695_v1 }
0x1e7c   :  { %v7021_v56 = vpop.eup %7020 }
0x1e7d   :  { %v7023_v27 = vpop.eup %7022  ;;  %v4342_v63 = vsel %vm888_vm3, %v7021_v56, 0.0 }
0x1e7e   :  { %v4351_v3 = vmul.f32 %v7023_v27, %v7019_v45  ;;  %4343 = vadd.xlane.f32.xlu0 %v4342_v63  ;;  %v4866_v45 = vld [vmem:[#allocation24] sm:$0xff]  ;;  %v4873_v27 = vld [vmem:[#allocation24 + $0x38] sm:$0xff] }
0x1e7f   :  { %v6745_v2 = vpack.c.bf16 %v4867_v11, %v4866_v45  ;;  %v5010_v45 = vld [vmem:[#allocation25 + $0x20] sm:$0xff]  ;;  %v5012_v11 = vld [vmem:[#allocation25 + $0x30] sm:$0xff] }
0x1e80   :  { %6445 = vmatmul.mubr.msk.f32.vlgmr.msra.gmra.mrb[44].mxu0 %vm888_vm3, %v4351_v3 }
0x1e81   :  { %6453 = vmatpush3.xpose.msk.msra.mxu0 %vm1326_vm5, %v4585_v17  ;;  %6454 = vmatprep.mubr.msk.f32.mxu0 %vm7694_vm0, %v7695_v1 }
0x1e82   :  { %6462 = vmatprep.subr.mxu0 %v7695_v1 }
0x1e84   :  { %6455 = vmatmul.mubr.msk.f32.vlgmr.msra.gmra.mrb[46].mxu0 %vm1326_vm5, %v4583_v0 }
0x1e85   :  { %6464 = vmatprep.mubr.msk.f32.mxu0 %vm7694_vm0, %v7695_v1 }
0x1e94   :  { %4504 = vrot.lane.b32.xlu0 %v8582_v7, %s7702_s10 }
0x1f0b   :  { %v4344_v32 = vpop.xlane.xlu0 %4343 }
0x1f0c   :  { %7024 = vrcp.f32 %v4344_v32 }
0x1f0f   :  { %v4505_v22 = vpop.permute.xlu0 %4504 }
0x1f16   :  { %v7025_v14 = vpop.eup %7024 }
0x1f17   :  { %v4350_v8 = vmul.f32 %v7025_v14, %v7021_v56  ;;  %v4872_v56 = vld [vmem:[#allocation24 + $0x30] sm:$0xff] }
0x1f18   :  { %v6757_v17 = vpack.c.bf16 %v4873_v27, %v4872_v56  ;;  %v5019_v56 = vld [vmem:[#allocation25 + $0x68] sm:$0xff]  ;;  %v5021_v27 = vld [vmem:[#allocation25 + $0x78] sm:$0xff] }
0x1f19   :  { %6440 = vmatmul.mubr.msk.f32.vlgmr.msra.gmra.mrb[48].mxu1 %vm888_vm3, %v4350_v8 }
0x1f1a   :  { %6448 = vmatpush3.xpose.msk.msra.mxu1 %vm1326_vm5, %v4507_v55  ;;  %6449 = vmatprep.mubr.msk.f32.mxu1 %vm7694_vm0, %v7695_v1  ;;  %v6753_v55 = vpack.c.bf16 %v4871_v50, %v4870_v49  ;;  %v5014_v49 = vld [vmem:[#allocation25 + $0x40] sm:$0xff]  ;;  %v5016_v50 = vld [vmem:[#allocation25 + $0x50] sm:$0xff] }
0x1f1b   :  { %6457 = vmatprep.subr.mxu1 %v7695_v1 }
0x1f1d   :  { %6450 = vmatmul.mubr.msk.f32.vlgmr.msra.gmra.mrb[50].mxu1 %vm1326_vm5, %v4505_v22 }
0x1f1e   :  { %6459 = vmatprep.mubr.msk.f32.mxu1 %vm7694_vm0, %v7695_v1 }
0x1f53   :  { %v4500_v7 = vpop.f32.mrb[44].mxu0 }
0x1f54   :  { %v6446_v20 = vpop.f32.mrb[45].mxu0 }
0x1f57   :  { %v4656_v31 = vpop.f32.mrb[46].mxu0 }
0x1f58   :  { %v4661_v5 = vmul.f32 0.25, %v4656_v31  ;;  %v6456_v6 = vpop.f32.mrb[47].mxu0 }
0x1f5a   :  { %v4665_v46 = vsel %vm888_vm3, %v4661_v5, -inf }
0x1f5b   :  { %4666 = vmax.xlane.f32.xlu1 %v4665_v46 }
0x1f6c   :  { %4760 = vrot.lane.b32.xlu1 %v8589_v9, %s7702_s10 }
0x1f70   :  { %4838 = vrot.lane.b32.xlu1 %v4091_v13, %s7675_s6 }
0x1f74   :  { %4840 = vrot.lane.b32.xlu1 %v8677_v28, %s7675_s6  ;;  %s8939_s6 = sld [smem:[#allocation69_spill]] }
0x1f78   :  { %4848 = vrot.lane.b32.xlu1 %v4500_v7, %s7700_s24 }
0x1fe8   :  { %v4667_v16 = vpop.xlane.xlu1 %4666 }
0x1fe9   :  { %v4669_v10 = vsub.f32 %v4661_v5, %v4667_v16 }
0x1feb   :  { %v4672_v21 = vmul.f32 1.442695, %v4669_v10  ;;  %v5915_v10 = vld [vmem:[%s8939_s6] ss:$0 sm:$0xff] }
0x1fec   :  { %v4761_v48 = vpop.permute.xlu1 %4760  ;;  %v4424_v47 = vpop.f32.mrb[48].mxu1 }
0x1fed   :  { %7026 = vpow2.f32 %v4672_v21  ;;  %6463 = vmatpush3.msra.mxu0 %v4761_v48  ;;  %v6441_v19 = vpop.f32.mrb[49].mxu1 }
0x1ff0   :  { %v4578_v52 = vpop.f32.mrb[50].mxu1  ;;  %v4839_v0 = vpop.permute.xlu1 %4838 }
0x1ff1   :  { %v4660_v25 = vmul.f32 0.25, %v4578_v52  ;;  %v6451_v60 = vpop.f32.mrb[51].mxu1  ;;  %v4860_v22 = vsel %vm1326_vm5, %v8649_v53, %v4839_v0 }
0x1ff3   :  { %v4662_v9 = vsel %vm888_vm3, %v4660_v25, -inf }
0x1ff4   :  { %4663 = vmax.xlane.f32.xlu0 %v4662_v9  ;;  %v4841_v32 = vpop.permute.xlu1 %4840 }
0x1ff5   :  { %v4861_v20 = vsel %vm1326_vm5, %v8651_v4, %v4841_v32  ;;  %v5359_v32 = vld [vmem:[#allocation27] sm:$0xff] }
0x1ff7   :  { %v7027_v62 = vpop.eup %7026 }
0x1ff8   :  { %v4677_v12 = vsel %vm888_vm3, %v7027_v62, 0.0  ;;  %v4849_v14 = vpop.permute.xlu1 %4848 }
0x1ff9   :  { %4678 = vadd.xlane.f32.xlu0 %v4677_v12  ;;  %v4863_v6 = vsel %vm687_vm2, %v4861_v20, %v4849_v14  ;;  %v5360_v14 = vld [vmem:[#allocation27 + $0x8] sm:$0xff] }
0x2081   :  { %v4664_v28 = vpop.xlane.xlu0 %4663 }
0x2082   :  { %v4668_v61 = vsub.f32 %v4660_v25, %v4664_v28 }
0x2084   :  { %v4670_v29 = vmul.f32 1.442695, %v4668_v61 }
0x2086   :  { %7028 = vpow2.f32 %v4670_v29  ;;  %v4679_v33 = vpop.xlane.xlu0 %4678 }
0x2087   :  { %7030 = vrcp.f32 %v4679_v33 }
0x2090   :  { %v7029_v59 = vpop.eup %7028 }
0x2091   :  { %v7031_v35 = vpop.eup %7030  ;;  %v4674_v36 = vsel %vm888_vm3, %v7029_v59, 0.0 }
0x2092   :  { %v4683_v57 = vmul.f32 %v7031_v35, %v7027_v62  ;;  %4675 = vadd.xlane.f32.xlu0 %v4674_v36  ;;  %v5009_v36 = vld [vmem:[#allocation25 + $0x18] sm:$0xff] }
0x2094   :  { %6465 = vmatmul.mubr.msk.f32.vlgmr.msra.gmra.mrb[48].mxu0 %vm888_vm3, %v4683_v57 }
0x2095   :  { %5104 = vmatprep.mubr.f32.mxu0 %v7695_v1 }
0x20a8   :  { %4684 = vrot.lane.b32.xlu0 %v8601_v51, %s7702_s10  ;;  %v6749_v51 = vpack.c.bf16 %v4869_v39, %v4868_v18  ;;  %v6767_v18 = vpack.c.bf16 %v5012_v11, %v5010_v45  ;;  %v5017_v39 = vld [vmem:[#allocation25 + $0x58] sm:$0xff] }
0x20a9   :  { %v5246_v45 = vld [vmem:[%s8940_s14 + $0xa8] sm:$0xff] }
0x20ac   :  { %4846 = vrot.lane.b32.xlu0 %v4424_v47, %s7700_s24 }
0x211f   :  { %v4676_v13 = vpop.xlane.xlu0 %4675 }
0x2120   :  { %7032 = vrcp.f32 %v4676_v13  ;;  %v5006_v13 = vld [vmem:[#allocation25] sm:$0xff] }
0x2123   :  { %v4685_v15 = vpop.permute.xlu0 %4684 }
0x2124   :  { %6458 = vmatpush3.msra.mxu1 %v4685_v15  ;;  %v5008_v15 = vld [vmem:[#allocation25 + $0x10] sm:$0xff] }
0x2125   :  { %6746 = vmatprep.subr.bf16.mxu1 %v6745_v2 }
0x2127   :  { %v4847_v8 = vpop.permute.xlu0 %4846 }
0x2128   :  { %v4862_v31 = vsel %vm687_vm2, %v4860_v22, %v4847_v8  ;;  %v6809_v8 = vpack.c.bf16 %v5360_v14, %v5359_v32  ;;  %v5234_v32 = vld [vmem:[%s8940_s14 + $0x48] sm:$0xff] }
0x212a   :  { %v7033_v37 = vpop.eup %7032 }
0x212b   :  { %v4682_v30 = vmul.f32 %v7033_v37, %v7029_v59  ;;  %v6763_v37 = vpack.c.bf16 %v5008_v15, %v5006_v13  ;;  %v5243_v13 = vld [vmem:[%s8940_s14 + $0x90] sm:$0xff]  ;;  %v5244_v15 = vld [vmem:[%s8940_s14 + $0x98] sm:$0xff] }
0x212d   :  { %6460 = vmatmul.mubr.msk.f32.vlgmr.msra.gmra.mrb[52].mxu1 %vm888_vm3, %v4682_v30  ;;  %v5011_v30 = vld [vmem:[#allocation25 + $0x28] sm:$0xff] }
0x212e   :  { %6748 = vmatpush3.bf16.msra.mxu1 %v6745_v2  ;;  %v5015_v2 = vld [vmem:[#allocation25 + $0x48] sm:$0xff] }
0x212f   :  { %6750 = vmatprep.subr.bf16.mxu1 %v6749_v51 }
0x2132   :  { %6752 = vmatpush3.bf16.msra.mxu1 %v6749_v51  ;;  %v6769_v51 = vpack.c.bf16 %v5017_v39, %v5015_v2  ;;  %v5230_v2 = vld [vmem:[%s8940_s14 + $0x28] sm:$0xff] }
0x2133   :  { %6754 = vmatprep.subr.bf16.mxu1 %v6753_v55 }
0x2136   :  { %6756 = vmatpush3.bf16.msra.mxu1 %v6753_v55  ;;  %v6771_v55 = vpack.c.bf16 %v5016_v50, %v5014_v49  ;;  %v5248_v49 = vld [vmem:[%s8940_s14 + $0xb8] sm:$0xff] }
0x2137   :  { %6758 = vmatprep.subr.bf16.mxu1 %v6757_v17 }
0x213a   :  { %6760 = vmatpush3.bf16.msra.mxu1 %v6757_v17  ;;  %v6773_v17 = vpack.c.bf16 %v5021_v27, %v5019_v56  ;;  %v5232_v56 = vld [vmem:[%s8940_s14 + $0x38] sm:$0xff] }
0x2167   :  { %v4832_v38 = vpop.f32.mrb[48].mxu0 }
0x2168   :  { %4856 = vrot.lane.b32.xlu1 %v4832_v38, %s7698_s2  ;;  %v6466_v43 = vpop.f32.mrb[49].mxu0  ;;  %v5013_v38 = vld [vmem:[#allocation25 + $0x38] sm:$0xff] }
0x2169   :  { %v6765_v43 = vpack.c.bf16 %v5013_v38, %v5011_v30  ;;  %v5227_v30 = vld [vmem:[%s8940_s14 + $0x10] sm:$0xff] }
0x21da   :  { %v4857_v7 = vpop.permute.xlu1 %4856 }
0x21db   :  { %v4865_v16 = vsel %vm2674_vm6, %v4863_v6, %v4857_v7 }
0x2200   :  { %v4756_v63 = vpop.f32.mrb[52].mxu1 }
0x2201   :  { %4854 = vrot.lane.b32.xlu0 %v4756_v63, %s7698_s2  ;;  %v6461_v3 = vpop.f32.mrb[53].mxu1  ;;  %v5018_v63 = vld [vmem:[#allocation25 + $0x60] sm:$0xff] }
0x2202   :  { %v5020_v3 = vld [vmem:[#allocation25 + $0x70] sm:$0xff] }
0x2203   :  { %v6775_v0 = vpack.c.bf16 %v5020_v3, %v5018_v63  ;;  %v5250_v63 = vld [vmem:[%s8940_s14 + $0xc8] sm:$0xff] }
0x2273   :  { %v4855_v5 = vpop.permute.xlu0 %4854 }
0x2274   :  { %v4864_v46 = vsel %vm2674_vm6, %v4862_v31, %v4855_v5 }
0x2275   :  { %6483 = vmatprep.mubr.msk.f32.mxu1 %vm485_vm1, %v4864_v46  ;;  %v4992_v46 = vadd.f32 1.0, %v8533_v26 }
0x2276   :  { %6484 = vmatmul.mubr.msk.f32.vlgmr.msra.gmra.mrb[54].mxu1 %vm485_vm1, %v4865_v16 }
0x2349   :  { %v6485_v21 = vpop.f32.mrb[54].mxu1 }
0x234a   :  { %v4959_v53 = vadd.f32 %v6485_v21, %v5915_v10  ;;  %v4953_v48 = vpop.f32.mrb[55].mxu1  ;;  %v5362_v21 = vld [vmem:[#allocation27 + $0x18] sm:$0xff] }
0x234b   :  { %v4954_v47 = vadd.f32 %v5915_v10, %v4953_v48  ;;  %v5361_v10 = vld [vmem:[#allocation27 + $0x10] sm:$0xff] }
0x234c   :  { %v4963_v4 = vmul.f32 %v4959_v53, %v8527_v42 }
0x234d   :  { %v4962_v19 = vmul.f32 %v4954_v47, %v8523_v23 }
0x234e   :  { %v8745_v52 = vadd.f32 %v4963_v4, %v8556_v58  ;;  %v4993_v4 = vadd.f32 1.0, %v8531_v24 }
0x234f   :  { %v8748_v25 = vadd.f32 %v4962_v19, %v8551_v54 }
0x2350   :  { %v4969_v60 = vsel %vm485_vm1, %v8745_v52, 0.0 }
0x2351   :  { %4970 = vadd.xlane.f32.xlu1 %v4969_v60  ;;  %v4966_v9 = vsel %vm485_vm1, %v8748_v25, 0.0  ;;  %v6813_v60 = vpack.c.bf16 %v5362_v21, %v5361_v10  ;;  %v5238_v10 = vld [vmem:[%s8940_s14 + $0x68] sm:$0xff] }
0x2352   :  { %4967 = vadd.xlane.f32.xlu0 %v4966_v9 }
0x2362   :  { %5000 = vrot.lane.b32.xlu1 %v8527_v42, %s7697_s8  ;;  %v5007_v42 = vld [vmem:[#allocation25 + $0x8] sm:$0xff] }
0x2363   :  { %v6761_v57 = vpack.c.bf16 %v5009_v36, %v5007_v42  ;;  %v5225_v36 = vld [vmem:[%s8940_s14] sm:$0xff] }
0x2365   :  { %6762 = vmatprep.subr.bf16.mxu0 %v6761_v57  ;;  %v5226_v57 = vld [vmem:[%s8940_s14 + $0x8] sm:$0xff] }
0x2366   :  { %6764 = vmatpush1.bf16.msra.mxu0 %v6763_v37  ;;  %v6781_v37 = vpack.c.bf16 %v5244_v15, %v5243_v13 }
0x2367   :  { %6766 = vmatprep.subr.bf16.mxu0 %v6765_v43  ;;  %v5245_v43 = vld [vmem:[%s8940_s14 + $0xa0] sm:$0xff] }
0x2368   :  { %v6785_v11 = vpack.c.bf16 %v5246_v45, %v5245_v43 }
0x236a   :  { %6768 = vmatpush1.bf16.msra.mxu0 %v6767_v18  ;;  %v5229_v18 = vld [vmem:[%s8940_s14 + $0x20] sm:$0xff] }
0x236b   :  { %6770 = vmatprep.subr.bf16.mxu0 %v6769_v51  ;;  %v6787_v39 = vpack.c.bf16 %v5230_v2, %v5229_v18  ;;  %v5247_v51 = vld [vmem:[%s8940_s14 + $0xb0] sm:$0xff] }
0x236c   :  { %v6789_v50 = vpack.c.bf16 %v5248_v49, %v5247_v51  ;;  %v8835_v18 = vld [vmem:[#allocation28] ss:$0 sm:$0xff] }
0x236e   :  { %6772 = vmatpush1.bf16.msra.mxu0 %v6771_v55  ;;  %v5231_v55 = vld [vmem:[%s8940_s14 + $0x30] sm:$0xff] }
0x236f   :  { %6774 = vmatprep.subr.bf16.mxu0 %v6773_v17  ;;  %v6791_v27 = vpack.c.bf16 %v5232_v56, %v5231_v55  ;;  %v5249_v17 = vld [vmem:[%s8940_s14 + $0xc0] sm:$0xff] }
0x2370   :  { %v6793_v3 = vpack.c.bf16 %v5250_v63, %v5249_v17 }
0x2372   :  { %6776 = vmatpush1.bf16.msra.mxu0 %v6775_v0  ;;  %v5233_v0 = vld [vmem:[%s8940_s14 + $0x40] sm:$0xff] }
0x2373   :  { %6810 = vmatprep.subr.bf16.mxu0 %v6809_v8  ;;  %v6795_v14 = vpack.c.bf16 %v5234_v32, %v5233_v0 }
0x23de   :  { %v4971_v62 = vpop.xlane.xlu1 %4970 }
0x23df   :  { %v4973_v12 = vmul.f32 0.015625, %v4971_v62  ;;  %v4968_v28 = vpop.xlane.xlu0 %4967  ;;  %v5363_v62 = vld [vmem:[#allocation27 + $0x20] sm:$0xff] }
0x23e0   :  { %v4972_v61 = vmul.f32 0.015625, %v4968_v28 }
0x23e1   :  { %v8757_v58 = vsub.f32 %v8745_v52, %v4973_v12  ;;  %v5364_v12 = vld [vmem:[#allocation27 + $0x28] sm:$0xff] }
0x23e2   :  { %v4974_v54 = vsub.f32 %v8748_v25, %v4972_v61  ;;  %v5001_v61 = vpop.permute.xlu1 %5000 }
0x23e3   :  { %v4977_v59 = vmul.f32 %v8757_v58, %v8757_v58 }
0x23e4   :  { %v4976_v29 = vmul.f32 %v4974_v54, %v4974_v54 }
0x23e5   :  { %v4981_v35 = vsel %vm485_vm1, %v4977_v59, 0.0  ;;  %v5366_v59 = vld [vmem:[#allocation27 + $0x38] sm:$0xff] }
0x23e6   :  { %v4978_v33 = vsel %vm485_vm1, %v4976_v29, 0.0  ;;  %v6817_v29 = vpack.c.bf16 %v5364_v12, %v5363_v62 }
0x23e7   :  { %4979 = vadd.xlane.f32.xlu0 %v4978_v33  ;;  %v5365_v33 = vld [vmem:[#allocation27 + $0x30] sm:$0xff] }
0x23eb   :  { %4982 = vadd.xlane.f32.xlu0 %v4981_v35  ;;  %v5242_v35 = vld [vmem:[%s8940_s14 + $0x88] sm:$0xff] }
0x2401   :  { %4998 = vrot.lane.b32.xlu0 %v8523_v23, %s7697_s8 }
0x2474   :  { %v4980_v22 = vpop.xlane.xlu0 %4979 }
0x2475   :  { %v4984_v23 = vmul.f32 0.015625, %v4980_v22  ;;  %v5252_v22 = vld [vmem:[%s8940_s14 + $0xd8] sm:$0xff] }
0x2477   :  { %v4986_v7 = vadd.f32 1e-06, %v4984_v23 }
0x2478   :  { %v4983_v20 = vpop.xlane.xlu0 %4982 }
0x2479   :  { %7034 = vrsqrt.f32 %v4986_v7  ;;  %v4985_v31 = vmul.f32 0.015625, %v4983_v20  ;;  %v5235_v7 = vld [vmem:[%s8940_s14 + $0x50] sm:$0xff]  ;;  %v5236_v20 = vld [vmem:[%s8940_s14 + $0x58] sm:$0xff] }
0x247b   :  { %v4987_v5 = vadd.f32 1e-06, %v4985_v31  ;;  %v6799_v31 = vpack.c.bf16 %v5236_v20, %v5235_v7 }
0x247c   :  { %v4999_v47 = vpop.permute.xlu0 %4998 }
0x247d   :  { %7036 = vrsqrt.f32 %v4987_v5  ;;  %v5253_v5 = vld [vmem:[%s8940_s14 + $0xe0] sm:$0xff] }
0x2483   :  { %v7035_v6 = vpop.eup %7034 }
0x2484   :  { %v4990_v16 = vmul.f32 %v7035_v6, %v4974_v54  ;;  %v5254_v6 = vld [vmem:[%s8940_s14 + $0xe8] sm:$0xff] }
0x2486   :  { %v4994_v53 = vmul.f32 %v4992_v46, %v4990_v16  ;;  %v6801_v46 = vpack.c.bf16 %v5254_v6, %v5253_v5  ;;  %v5237_v16 = vld [vmem:[%s8940_s14 + $0x60] sm:$0xff] }
0x2487   :  { %v7037_v48 = vpop.eup %7036  ;;  %v6803_v21 = vpack.c.bf16 %v5238_v10, %v5237_v16 }
0x2488   :  { %v5004_v19 = vadd.f32 %v4999_v47, %v4994_v53  ;;  %v4991_v9 = vmul.f32 %v7037_v48, %v8757_v58  ;;  %v6821_v58 = vpack.c.bf16 %v5366_v59, %v5365_v33  ;;  %v5255_v53 = vld [vmem:[%s8940_s14 + $0xf0] sm:$0xff]  ;;  %v5256_v48 = vld [vmem:[%s8940_s14 + $0xf8] sm:$0xff] }
0x2489   :  { %v6805_v47 = vpack.c.bf16 %v5256_v48, %v5255_v53 }
0x248a   :  { %5918 = vmatmul.mubr.msk.f32.vlgmr.msra.gmra.mrb[50].mxu0 %vm485_vm1, %v5004_v19  ;;  %v4995_v28 = vmul.f32 %v4993_v4, %v4991_v9  ;;  %v5239_v4 = vld [vmem:[%s8940_s14 + $0x70] sm:$0xff]  ;;  %v5240_v19 = vld [vmem:[%s8940_s14 + $0x78] sm:$0xff]  ;;  %v5022_v9 = vld [vmem:[%s8941_s18] sm:$0x3] }
0x248b   :  { %6812 = vmatpush3.bf16.msra.mxu0 %v6809_v8  ;;  %5110 = vmatprep.mubr.f32.mxu0 %v7695_v1  ;;  %v5241_v1 = vld [vmem:[%s8940_s14 + $0x80] sm:$0xff]  ;;  %v5251_v8 = vld [vmem:[%s8940_s14 + $0xd0] sm:$0xff]  ;;  %v5027_v62 = vrot.slane %v5022_v9, %v8139_v44  ;;  %v5031_v12 = vrot.slane %v5022_v9, %v8202_v34 }
0x248c   :  { %6814 = vmatprep.subr.bf16.mxu0 %v6813_v60  ;;  %v5005_v54 = vadd.f32 %v5001_v61, %v4995_v28  ;;  %v6777_v42 = vpack.c.bf16 %v5242_v35, %v5241_v1  ;;  %v6797_v23 = vpack.c.bf16 %v5252_v22, %v5251_v8 }
0x248e   :  { %5919 = vmatmul.mubr.msk.f32.gmra.mrb[52].mxu0 %vm485_vm1, %v5005_v54  ;;  %6778 = vmatprep.subr.bf16.mxu1 %v6777_v42 }
0x248f   :  { %6816 = vmatpush3.bf16.msra.mxu0 %v6813_v60  ;;  %6502 = vmatprep.mubr.msk.f32.mxu0 %vm485_vm1, %v8142_v40  ;;  %v6779_v40 = vpack.c.bf16 %v5226_v57, %v5225_v36  ;;  %v6807_v60 = vpack.c.bf16 %v5240_v19, %v5239_v4 }
0x2490   :  { %6818 = vmatprep.subr.bf16.mxu0 %v6817_v29 }
0x2491   :  { %6780 = vmatpush3.bf16.msra.mxu1 %v6779_v40 }
0x2492   :  { %6782 = vmatprep.subr.bf16.mxu1 %v6781_v37 }
0x2493   :  { %6820 = vmatpush3.bf16.msra.mxu0 %v6817_v29 }
0x2494   :  { %6822 = vmatprep.subr.bf16.mxu0 %v6821_v58 }
0x2497   :  { %6824 = vmatpush3.bf16.msra.mxu0 %v6821_v58 }
0x249a   :  { %6503 = vmatmul.mubr.msk.f32.vlgmr.msra.gmra.mrb[54].mxu0 %vm485_vm1, %v8149_v41  ;;  %v5228_v41 = vld [vmem:[%s8940_s14 + $0x18] sm:$0xff] }
0x249b   :  { %v6783_v38 = vpack.c.bf16 %v5228_v41, %v5227_v30 }
0x249d   :  { %6784 = vmatpush3.bf16.msra.mxu1 %v6783_v38 }
0x249e   :  { %6786 = vmatprep.subr.bf16.mxu1 %v6785_v11 }
0x24a1   :  { %6788 = vmatpush3.bf16.msra.mxu1 %v6787_v39 }
0x24a2   :  { %6790 = vmatprep.subr.bf16.mxu1 %v6789_v50 }
0x24a5   :  { %6792 = vmatpush3.bf16.msra.mxu1 %v6791_v27 }
0x24a6   :  { %6794 = vmatprep.subr.bf16.mxu1 %v6793_v3 }
0x24a9   :  { %6796 = vmatpush3.bf16.msra.mxu1 %v6795_v14 }
0x24aa   :  { %6798 = vmatprep.subr.bf16.mxu1 %v6797_v23 }
0x24ad   :  { %6800 = vmatpush3.bf16.msra.mxu1 %v6799_v31 }
0x24ae   :  { %6802 = vmatprep.subr.bf16.mxu1 %v6801_v46 }
0x24b1   :  { %6804 = vmatpush3.bf16.msra.mxu1 %v6803_v21 }
0x24b2   :  { %6806 = vmatprep.subr.bf16.mxu1 %v6805_v47 }
0x24b5   :  { %6808 = vmatpush3.bf16.msra.mxu1 %v6807_v60 }
0x255d   :  { %v5106_v28 = vpop.f32.mrb[50].mxu0 }
0x255e   :  { %v8811_v61 = vadd.f32 %v5106_v28, %v5027_v62  ;;  %v5108_v54 = vpop.f32.mrb[51].mxu0 }
0x255f   :  { %v8813_v29 = vadd.f32 %v5108_v54, %v5031_v12 }
0x2560   :  { %v8816_v33 = vmul.f32 0.70710677, %v8811_v61 }
0x2561   :  { %v8819_v59 = vmul.f32 0.70710677, %v8813_v29  ;;  %v5112_v58 = vpop.f32.mrb[52].mxu0 }
0x2562   :  { %v5125_v1 = vand.u32 2147483647, %v8816_v33  ;;  %v8822_v35 = vadd.f32 %v5112_v58, %v5027_v62  ;;  %v5114_v44 = vpop.f32.mrb[53].mxu0  ;;  %vm5205_vm11 = vcmp.ge.f32.partialorder %v8816_v33, 0.0 }
0x2563   :  { %v5126_v34 = vand.u32 2147483647, %v8819_v59  ;;  %v8825_v42 = vadd.f32 %v5114_v44, %v5031_v12  ;;  %vm5206_vm12 = vcmp.ge.f32.partialorder %v8819_v59, 0.0 }
0x2564   :  { %v5129_v36 = vmul.f32 0.3275911, %v5125_v1  ;;  %v8828_v57 = vmul.f32 0.70710677, %v8822_v35  ;;  %v5181_v39 = vsub.f32 0.0, %v5125_v1 }
0x2565   :  { %v5130_v40 = vmul.f32 0.3275911, %v5126_v34  ;;  %v8831_v13 = vmul.f32 0.70710677, %v8825_v42  ;;  %v5182_v49 = vsub.f32 0.0, %v5126_v34 }
0x2566   :  { %v5133_v15 = vadd.f32 1.0, %v5129_v36  ;;  %v5127_v37 = vand.u32 2147483647, %v8828_v57  ;;  %v5185_v56 = vmul.f32 %v5181_v39, %v5125_v1  ;;  %vm5207_vm13 = vcmp.ge.f32.partialorder %v8828_v57, 0.0 }
0x2567   :  { %v5134_v30 = vadd.f32 1.0, %v5130_v40  ;;  %v5128_v41 = vand.u32 2147483647, %v8831_v13  ;;  %v5186_v3 = vmul.f32 %v5182_v49, %v5126_v34  ;;  %vm5208_vm14 = vcmp.ge.f32.partialorder %v8831_v13, 0.0 }
0x2568   :  { %7038 = vrcp.f32 %v5133_v15  ;;  %v5131_v38 = vmul.f32 0.3275911, %v5127_v37  ;;  %v5183_v27 = vsub.f32 0.0, %v5127_v37  ;;  %v5189_v22 = vmul.f32 1.442695, %v5185_v56 }
0x2569   :  { %7040 = vrcp.f32 %v5134_v30  ;;  %v5132_v43 = vmul.f32 0.3275911, %v5128_v41  ;;  %v5184_v0 = vsub.f32 0.0, %v5128_v41  ;;  %v5191_v5 = vmul.f32 1.442695, %v5186_v3 }
0x256a   :  { %v5135_v45 = vadd.f32 1.0, %v5131_v38  ;;  %v5187_v23 = vmul.f32 %v5183_v27, %v5127_v37 }
0x256b   :  { %v5136_v11 = vadd.f32 1.0, %v5132_v43  ;;  %v5188_v6 = vmul.f32 %v5184_v0, %v5128_v41 }
0x256c   :  { %7042 = vrcp.f32 %v5135_v45  ;;  %v5193_v48 = vmul.f32 1.442695, %v5187_v23 }
0x256d   :  { %7044 = vrcp.f32 %v5136_v11  ;;  %v8837_v2 = vpop.f32.mrb[54].mxu0  ;;  %v5195_v60 = vmul.f32 1.442695, %v5188_v6 }
0x256e   :  { %v5440_v51 = vpop.f32.mrb[55].mxu0  ;;  %7046 = vpow2.f32 %v5189_v22 }
0x256f   :  { %v8840_v50 = vadd.f32 %v8835_v18, %v5440_v51  ;;  %7048 = vpow2.f32 %v5191_v5 }
0x2570   :  { %7050 = vpow2.f32 %v5193_v48 }
0x2571   :  { %7052 = vpow2.f32 %v5195_v60  ;;  %v5120_v60 = vmul.f32 0.5, %v8825_v42 }
0x2572   :  { %v7039_v55 = vpop.eup %7038 }
0x2573   :  { %v7041_v17 = vpop.eup %7040  ;;  %v5145_v63 = vmul.f32 1.0614054, %v7039_v55 }
0x2574   :  { %v5146_v32 = vmul.f32 1.0614054, %v7041_v17 }
0x2575   :  { %v5149_v14 = vadd.f32 -1.4531521, %v5145_v63 }
0x2576   :  { %v7043_v8 = vpop.eup %7042  ;;  %v5150_v7 = vadd.f32 -1.4531521, %v5146_v32 }
0x2577   :  { %v7045_v20 = vpop.eup %7044  ;;  %v5153_v31 = vmul.f32 %v7039_v55, %v5149_v14  ;;  %v5147_v46 = vmul.f32 1.0614054, %v7043_v8 }
0x2578   :  { %v5154_v16 = vmul.f32 %v7041_v17, %v5150_v7  ;;  %v5148_v10 = vmul.f32 1.0614054, %v7045_v20  ;;  %v7047_v45 = vpop.eup %7046 }
0x2579   :  { %v5157_v21 = vadd.f32 1.4214138, %v5153_v31  ;;  %v5151_v53 = vadd.f32 -1.4531521, %v5147_v46  ;;  %v7049_v51 = vpop.eup %7048 }
0x257a   :  { %v5158_v47 = vadd.f32 1.4214138, %v5154_v16  ;;  %v5152_v4 = vadd.f32 -1.4531521, %v5148_v10  ;;  %v7051_v32 = vpop.eup %7050 }
0x257b   :  { %v5161_v19 = vmul.f32 %v7039_v55, %v5157_v21  ;;  %v5155_v9 = vmul.f32 %v7043_v8, %v5151_v53  ;;  %v7053_v23 = vpop.eup %7052  ;;  %v5118_v21 = vmul.f32 0.5, %v8813_v29  ;;  %v5119_v29 = vmul.f32 0.5, %v8822_v35 }
0x257c   :  { %v5162_v62 = vmul.f32 %v7041_v17, %v5158_v47  ;;  %v5156_v12 = vmul.f32 %v7045_v20, %v5152_v4 }
0x257d   :  { %v5165_v28 = vadd.f32 -0.28449672, %v5161_v19  ;;  %v5159_v54 = vadd.f32 1.4214138, %v5155_v9 }
0x257e   :  { %v5166_v58 = vadd.f32 -0.28449672, %v5162_v62  ;;  %v5160_v1 = vadd.f32 1.4214138, %v5156_v12  ;;  %v5920_v12 = vld [vmem:[%s8942_s12] ss:$0 sm:$0xff] }
0x257f   :  { %v5169_v44 = vmul.f32 %v7039_v55, %v5165_v28  ;;  %v5163_v34 = vmul.f32 %v7043_v8, %v5159_v54 }
0x2580   :  { %v5170_v36 = vmul.f32 %v7041_v17, %v5166_v58  ;;  %v5164_v40 = vmul.f32 %v7045_v20, %v5160_v1 }
0x2581   :  { %v5173_v15 = vadd.f32 0.2548296, %v5169_v44  ;;  %v5167_v37 = vadd.f32 -0.28449672, %v5163_v34 }
0x2582   :  { %v5174_v30 = vadd.f32 0.2548296, %v5170_v36  ;;  %v5168_v41 = vadd.f32 -0.28449672, %v5164_v40 }
0x2583   :  { %v5177_v38 = vmul.f32 %v7039_v55, %v5173_v15  ;;  %v5171_v43 = vmul.f32 %v7043_v8, %v5167_v37 }
0x2584   :  { %v5178_v11 = vmul.f32 %v7041_v17, %v5174_v30  ;;  %v5172_v39 = vmul.f32 %v7045_v20, %v5168_v41 }
0x2585   :  { %v5197_v49 = vmul.f32 %v7047_v45, %v5177_v38  ;;  %v5175_v56 = vadd.f32 0.2548296, %v5171_v43 }
0x2586   :  { %v5198_v27 = vmul.f32 %v7049_v51, %v5178_v11  ;;  %v5176_v63 = vadd.f32 0.2548296, %v5172_v39 }
0x2587   :  { %v5201_v3 = vsub.f32 1.0, %v5197_v49  ;;  %v5179_v0 = vmul.f32 %v7043_v8, %v5175_v56 }
0x2588   :  { %v5202_v14 = vsub.f32 1.0, %v5198_v27  ;;  %v5180_v22 = vmul.f32 %v7045_v20, %v5176_v63  ;;  %v5117_v20 = vmul.f32 0.5, %v8811_v61 }
0x2589   :  { %v5209_v7 = vsub.f32 0.0, %v5201_v3  ;;  %v5199_v31 = vmul.f32 %v7051_v32, %v5179_v0  ;;  %v5490_v0 = vld [vmem:[#allocation30 + $0x8] sm:$0xff]  ;;  %v5491_v32 = vld [vmem:[#allocation30 + $0x10] sm:$0xff] }
0x258a   :  { %v5210_v55 = vsub.f32 0.0, %v5202_v14  ;;  %v5200_v5 = vmul.f32 %v7053_v23, %v5180_v22  ;;  %v5493_v23 = vld [vmem:[#allocation30 + $0x20] sm:$0xff] }
0x258b   :  { %v5213_v6 = vsel %vm5205_vm11, %v5201_v3, %v5209_v7  ;;  %v5203_v17 = vsub.f32 1.0, %v5199_v31  ;;  %v5489_v3 = vld [vmem:[#allocation30] sm:$0xff]  ;;  %v5494_v7 = vld [vmem:[#allocation30 + $0x28] sm:$0xff] }
0x258c   :  { %v5217_v46 = vadd.f32 1.0, %v5213_v6  ;;  %v5214_v16 = vsel %vm5206_vm12, %v5202_v14, %v5210_v55  ;;  %v5204_v10 = vsub.f32 1.0, %v5200_v5  ;;  %v5492_v14 = vld [vmem:[#allocation30 + $0x18] sm:$0xff]  ;;  %v6833_v31 = vpack.c.bf16 %v5494_v7, %v5493_v23  ;;  %v5495_v55 = vld [vmem:[#allocation30 + $0x30] sm:$0xff] }
0x258d   :  { %v5218_v8 = vadd.f32 1.0, %v5214_v16  ;;  %v5211_v53 = vsub.f32 0.0, %v5203_v17  ;;  %v6829_v22 = vpack.c.bf16 %v5492_v14, %v5491_v32  ;;  %v5496_v5 = vld [vmem:[#allocation30 + $0x38] sm:$0xff] }
0x258e   :  { %v5212_v48 = vsub.f32 0.0, %v5204_v10  ;;  %v5221_v4 = vmul.f32 %v5217_v46, %v5117_v20  ;;  %v6837_v6 = vpack.c.bf16 %v5496_v5, %v5495_v55 }
0x258f   :  { %v5222_v33 = vmul.f32 %v5218_v8, %v5118_v21  ;;  %v5215_v47 = vsel %vm5207_vm13, %v5203_v17, %v5211_v53 }
0x2590   :  { %v5216_v59 = vsel %vm5208_vm14, %v5204_v10, %v5212_v48  ;;  %v5219_v19 = vadd.f32 1.0, %v5215_v47 }
0x2591   :  { %5328 = vmatprep.mubr.f32.mxu1 %v5222_v33  ;;  %v5220_v9 = vadd.f32 1.0, %v5216_v59 }
0x2592   :  { %5329 = vmatmul.mubr.f32.vlgmr.msra.gmra.mrb[56].mxu1 %v5221_v4  ;;  %v5223_v61 = vmul.f32 %v5219_v19, %v5119_v29  ;;  %v5924_v29 = vld [vmem:[#allocation31] ss:$0 sm:$0xff] }
0x2593   :  { %v5224_v62 = vmul.f32 %v5220_v9, %v5120_v60 }
0x2595   :  { %5333 = vmatprep.mubr.f32.mxu1 %v5224_v62 }
0x2596   :  { %5334 = vmatmul.mubr.f32.gmra.mrb[58].mxu1 %v5223_v61 }
0x2665   :  { %v6141_v57 = vpop.f32.mrb[56].mxu1 }
0x2666   :  { %v6142_v13 = vpop.f32.mrb[57].mxu1 }
0x2667   :  { %v6143_v28 = vadd.f32 %v6142_v13, %v6141_v57 }
0x2669   :  { %v5331_v54 = vadd.f32 %v6143_v28, %v5920_v12  ;;  %v6144_v58 = vpop.f32.mrb[58].mxu1 }
0x266a   :  { %v6145_v1 = vpop.f32.mrb[59].mxu1 }
0x266b   :  { %v6146_v44 = vadd.f32 %v6145_v1, %v6144_v58  ;;  %5341 = vrot.lane.b32.xlu1 %v5331_v54, %s7697_s8 }
0x266d   :  { %v5336_v42 = vadd.f32 %v6146_v44, %v5920_v12 }
0x266f   :  { %5343 = vrot.lane.b32.xlu1 %v5336_v42, %s7697_s8 }
0x26dd   :  { %v5342_v34 = vpop.permute.xlu1 %5341 }
0x26de   :  { %v5347_v35 = vmul.f32 %v5342_v34, %v8533_v26  ;;  %v5446_v26 = vadd.f32 %v8837_v2, %v8835_v18  ;;  %v6825_v18 = vpack.c.bf16 %v5490_v0, %v5489_v3  ;;  %v5475_v2 = vadd.f32 1.0, %v8840_v50 }
0x26e0   :  { %5351 = vrot.lane.b32.xlu0 %v5347_v35, %s7697_s8  ;;  %v5476_v45 = vadd.f32 1.0, %v5446_v26  ;;  %6826 = vmatprep.subr.bf16.mxu0 %v6825_v18 }
0x26e1   :  { %v5344_v36 = vpop.permute.xlu1 %5343  ;;  %6828 = vmatpush3.bf16.msra.mxu0 %v6825_v18 }
0x26e2   :  { %v5348_v40 = vmul.f32 %v5344_v36, %v8531_v24  ;;  %6830 = vmatprep.subr.bf16.mxu0 %v6829_v22 }
0x26e4   :  { %5353 = vrot.lane.b32.xlu1 %v5348_v40, %s7697_s8 }
0x26e5   :  { %6832 = vmatpush3.bf16.msra.mxu0 %v6829_v22 }
0x26e6   :  { %6834 = vmatprep.subr.bf16.mxu0 %v6833_v31 }
0x26e9   :  { %6836 = vmatpush3.bf16.msra.mxu0 %v6833_v31 }
0x26ea   :  { %6838 = vmatprep.subr.bf16.mxu0 %v6837_v6 }
0x26ed   :  { %6840 = vmatpush3.bf16.msra.mxu0 %v6837_v6 }
0x2752   :  { %v5352_v15 = vpop.permute.xlu0 %5351 }
0x2753   :  { %v5357_v37 = vadd.f32 %v5352_v15, %v8748_v25 }
0x2755   :  { %v5449_v30 = vsel %vm485_vm1, %v5357_v37, 0.0 }
0x2756   :  { %5450 = vadd.xlane.f32.xlu0 %v5449_v30  ;;  %v5354_v41 = vpop.permute.xlu1 %5353 }
0x2757   :  { %v5358_v38 = vadd.f32 %v5354_v41, %v8745_v52 }
0x2759   :  { %v5452_v43 = vsel %vm485_vm1, %v5358_v38, 0.0 }
0x275a   :  { %5453 = vadd.xlane.f32.xlu1 %v5452_v43 }
0x276b   :  { %5481 = vrot.lane.b32.xlu1 %v5476_v45, %s7697_s8 }
0x27e3   :  { %v5451_v24 = vpop.xlane.xlu0 %5450 }
0x27e4   :  { %v5455_v11 = vmul.f32 0.015625, %v5451_v24 }
0x27e6   :  { %v5457_v39 = vsub.f32 %v5357_v37, %v5455_v11 }
0x27e7   :  { %v5454_v51 = vpop.xlane.xlu1 %5453 }
0x27e8   :  { %v5456_v25 = vmul.f32 0.015625, %v5454_v51  ;;  %v5459_v49 = vmul.f32 %v5457_v39, %v5457_v39 }
0x27ea   :  { %v5458_v56 = vsub.f32 %v5358_v38, %v5456_v25  ;;  %v5461_v27 = vsel %vm485_vm1, %v5459_v49, 0.0 }
0x27eb   :  { %5462 = vadd.xlane.f32.xlu0 %v5461_v27  ;;  %v5482_v19 = vpop.permute.xlu1 %5481 }
0x27ec   :  { %v5460_v52 = vmul.f32 %v5458_v56, %v5458_v56 }
0x27ee   :  { %v5464_v63 = vsel %vm485_vm1, %v5460_v52, 0.0 }
0x27ef   :  { %5465 = vadd.xlane.f32.xlu0 %v5464_v63 }
0x2805   :  { %5479 = vrot.lane.b32.xlu0 %v5475_v2, %s7697_s8 }
0x2878   :  { %v5463_v17 = vpop.xlane.xlu0 %5462 }
0x2879   :  { %v5467_v46 = vmul.f32 0.015625, %v5463_v17 }
0x287b   :  { %v5469_v16 = vadd.f32 1e-06, %v5467_v46 }
0x287c   :  { %v5466_v10 = vpop.xlane.xlu0 %5465 }
0x287d   :  { %7054 = vrsqrt.f32 %v5469_v16  ;;  %v5468_v21 = vmul.f32 0.015625, %v5466_v10 }
0x287f   :  { %v5470_v8 = vadd.f32 1e-06, %v5468_v21 }
0x2880   :  { %v5480_v48 = vpop.permute.xlu0 %5479 }
0x2881   :  { %7056 = vrsqrt.f32 %v5470_v8 }
0x2887   :  { %v7055_v53 = vpop.eup %7054 }
0x2888   :  { %v5473_v20 = vmul.f32 %v7055_v53, %v5457_v39 }
0x288a   :  { %v5485_v33 = vmul.f32 %v5480_v48, %v5473_v20 }
0x288b   :  { %v7057_v47 = vpop.eup %7056 }
0x288c   :  { %v5474_v4 = vmul.f32 %v7057_v47, %v5458_v56  ;;  %v5487_v59 = vadd.f32 %v5485_v33, %v8840_v50 }
0x288e   :  { %6521 = vmatprep.mubr.msk.f32.mxu0 %vm485_vm1, %v5487_v59  ;;  %v5486_v60 = vmul.f32 %v5482_v19, %v5474_v4 }
0x2890   :  { %v5488_v9 = vadd.f32 %v5486_v60, %v5446_v26 }
0x2892   :  { %6522 = vmatmul.mubr.msk.f32.vlgmr.msra.gmra.mrb[56].mxu0 %vm485_vm1, %v5488_v9 }
0x2965   :  { %v6523_v62 = vpop.f32.mrb[56].mxu0 }
0x2966   :  { %v5582_v61 = vadd.f32 %v6523_v62, %v5924_v29  ;;  %v5576_v57 = vpop.f32.mrb[57].mxu0 }
0x2967   :  { %v5577_v12 = vadd.f32 %v5924_v29, %v5576_v57  ;;  %v5683_v57 = vld [vmem:[#allocation36] sm:$0xff] }
0x2968   :  { %v5588_v13 = vmul.f32 0.70710677, %v5582_v61  ;;  %v5586_v17 = vmul.f32 0.5, %v5582_v61 }
0x2969   :  { %v5587_v28 = vmul.f32 0.70710677, %v5577_v12  ;;  %v5585_v10 = vmul.f32 0.5, %v5577_v12  ;;  %v5684_v12 = vld [vmem:[#allocation36 + $0x8] sm:$0xff] }
0x296a   :  { %v5590_v54 = vand.u32 2147483647, %v5588_v13  ;;  %vm5630_vm15 = vcmp.ge.f32.partialorder %v5588_v13, 0.0  ;;  %v6841_v13 = vpack.c.bf16 %v5684_v12, %v5683_v57 }
0x296b   :  { %v5589_v58 = vand.u32 2147483647, %v5587_v28  ;;  %vm5629_vm0 = vcmp.ge.f32.partialorder %v5587_v28, 0.0  ;;  %v5685_v28 = vld [vmem:[#allocation36 + $0x10] sm:$0xff] }
0x296c   :  { %v5592_v1 = vmul.f32 0.3275911, %v5590_v54  ;;  %v5618_v34 = vsub.f32 0.0, %v5590_v54  ;;  %6842 = vmatprep.subr.bf16.mxu1 %v6841_v13 }
0x296d   :  { %v5591_v44 = vmul.f32 0.3275911, %v5589_v58  ;;  %v5617_v35 = vsub.f32 0.0, %v5589_v58  ;;  %6844 = vmatpush3.bf16.msra.mxu1 %v6841_v13 }
0x296e   :  { %v5594_v42 = vadd.f32 1.0, %v5592_v1  ;;  %v5620_v40 = vmul.f32 %v5618_v34, %v5590_v54  ;;  %v5686_v54 = vld [vmem:[#allocation36 + $0x18] sm:$0xff]  ;;  %v5687_v1 = vld [vmem:[#allocation36 + $0x20] sm:$0xff] }
0x296f   :  { %v5593_v50 = vadd.f32 1.0, %v5591_v44  ;;  %v5619_v37 = vmul.f32 %v5617_v35, %v5589_v58  ;;  %v6845_v58 = vpack.c.bf16 %v5686_v54, %v5685_v28  ;;  %v5688_v44 = vld [vmem:[#allocation36 + $0x28] sm:$0xff]  ;;  %v5690_v34 = vld [vmem:[#allocation36 + $0x38] sm:$0xff] }
0x2970   :  { %7058 = vrcp.f32 %v5594_v42  ;;  %v5623_v43 = vmul.f32 1.442695, %v5620_v40  ;;  %v6849_v42 = vpack.c.bf16 %v5688_v44, %v5687_v1 }
0x2971   :  { %7060 = vrcp.f32 %v5593_v50  ;;  %v5621_v45 = vmul.f32 1.442695, %v5619_v37  ;;  %6846 = vmatprep.subr.bf16.mxu1 %v6845_v58  ;;  %v5689_v50 = vld [vmem:[#allocation36 + $0x30] sm:$0xff] }
0x2972   :  { %7062 = vpow2.f32 %v5623_v43  ;;  %6848 = vmatpush3.bf16.msra.mxu1 %v6845_v58  ;;  %v6853_v35 = vpack.c.bf16 %v5690_v34, %v5689_v50  ;;  %v5927_v43 = vld [vmem:[#allocation33] ss:$0 sm:$0xff] }
0x2973   :  { %7064 = vpow2.f32 %v5621_v45  ;;  %6850 = vmatprep.subr.bf16.mxu1 %v6849_v42 }
0x2976   :  { %6852 = vmatpush3.bf16.msra.mxu1 %v6849_v42 }
0x2977   :  { %6854 = vmatprep.subr.bf16.mxu1 %v6853_v35 }
0x297a   :  { %v7059_v36 = vpop.eup %7058  ;;  %6856 = vmatpush3.bf16.msra.mxu1 %v6853_v35 }
0x297b   :  { %v7061_v15 = vpop.eup %7060  ;;  %v5600_v30 = vmul.f32 1.0614054, %v7059_v36 }
0x297c   :  { %v5599_v41 = vmul.f32 1.0614054, %v7061_v15  ;;  %v7063_v2 = vpop.eup %7062 }
0x297d   :  { %v5602_v38 = vadd.f32 -1.4531521, %v5600_v30  ;;  %v7065_v14 = vpop.eup %7064 }
0x297e   :  { %v5601_v26 = vadd.f32 -1.4531521, %v5599_v41 }
0x297f   :  { %v5604_v24 = vmul.f32 %v7059_v36, %v5602_v38 }
0x2980   :  { %v5603_v11 = vmul.f32 %v7061_v15, %v5601_v26 }
0x2981   :  { %v5606_v39 = vadd.f32 1.4214138, %v5604_v24 }
0x2982   :  { %v5605_v51 = vadd.f32 1.4214138, %v5603_v11 }
0x2983   :  { %v5608_v25 = vmul.f32 %v7059_v36, %v5606_v39  ;;  %v5928_v39 = vld [vmem:[#allocation34] ss:$0 sm:$0xff] }
0x2984   :  { %v5607_v49 = vmul.f32 %v7061_v15, %v5605_v51 }
0x2985   :  { %v5610_v56 = vadd.f32 -0.28449672, %v5608_v25 }
0x2986   :  { %v5609_v27 = vadd.f32 -0.28449672, %v5607_v49 }
0x2987   :  { %v5612_v52 = vmul.f32 %v7059_v36, %v5610_v56  ;;  %v5929_v56 = vld [vmem:[#allocation37] ss:$0 sm:$0xff] }
0x2988   :  { %v5611_v63 = vmul.f32 %v7061_v15, %v5609_v27 }
0x2989   :  { %v5614_v3 = vadd.f32 0.2548296, %v5612_v52 }
0x298a   :  { %v5613_v0 = vadd.f32 0.2548296, %v5611_v63 }
0x298b   :  { %v5616_v18 = vmul.f32 %v7059_v36, %v5614_v3 }
0x298c   :  { %v5615_v32 = vmul.f32 %v7061_v15, %v5613_v0 }
0x298d   :  { %v5626_v22 = vmul.f32 %v7063_v2, %v5616_v18 }
0x298e   :  { %v5625_v23 = vmul.f32 %v7065_v14, %v5615_v32 }
0x298f   :  { %v5628_v7 = vsub.f32 1.0, %v5626_v22 }
0x2990   :  { %v5627_v31 = vsub.f32 1.0, %v5625_v23 }
0x2991   :  { %v5632_v55 = vsub.f32 0.0, %v5628_v7 }
0x2992   :  { %v5631_v5 = vsub.f32 0.0, %v5627_v31 }
0x2993   :  { %v5634_v6 = vsel %vm5630_vm15, %v5628_v7, %v5632_v55 }
0x2994   :  { %v5636_v46 = vadd.f32 1.0, %v5634_v6  ;;  %v5633_v16 = vsel %vm5629_vm0, %v5627_v31, %v5631_v5 }
0x2995   :  { %v5635_v21 = vadd.f32 1.0, %v5633_v16 }
0x2996   :  { %v5638_v8 = vmul.f32 %v5636_v46, %v5586_v17 }
0x2997   :  { %v5637_v53 = vmul.f32 %v5635_v21, %v5585_v10 }
0x2998   :  { %v5642_v20 = vsel %vm485_vm1, %v5638_v8, 0.0 }
0x2999   :  { %5643 = vadd.xlane.f32.xlu0 %v5642_v20  ;;  %v5639_v48 = vsel %vm485_vm1, %v5637_v53, 0.0 }
0x299a   :  { %5640 = vadd.xlane.f32.xlu1 %v5639_v48 }
0x2a26   :  { %v5644_v33 = vpop.xlane.xlu0 %5643 }
0x2a27   :  { %v5646_v47 = vmul.f32 0.015625, %v5644_v33  ;;  %v5641_v4 = vpop.xlane.xlu1 %5640 }
0x2a28   :  { %v5645_v59 = vmul.f32 0.015625, %v5641_v4 }
0x2a29   :  { %v5648_v19 = vsub.f32 %v5638_v8, %v5646_v47 }
0x2a2a   :  { %v5647_v60 = vsub.f32 %v5637_v53, %v5645_v59 }
0x2a2b   :  { %v5650_v9 = vmul.f32 %v5648_v19, %v5648_v19 }
0x2a2c   :  { %v5649_v29 = vmul.f32 %v5647_v60, %v5647_v60 }
0x2a2d   :  { %v5654_v62 = vsel %vm485_vm1, %v5650_v9, 0.0 }
0x2a2e   :  { %5655 = vadd.xlane.f32.xlu1 %v5654_v62  ;;  %v5651_v61 = vsel %vm485_vm1, %v5649_v29, 0.0 }
0x2a2f   :  { %5652 = vadd.xlane.f32.xlu0 %v5651_v61 }
0x2abb   :  { %v5656_v36 = vpop.xlane.xlu1 %5655 }
0x2abc   :  { %v5658_v40 = vmul.f32 0.015625, %v5656_v36  ;;  %v5653_v15 = vpop.xlane.xlu0 %5652 }
0x2abd   :  { %v5657_v37 = vmul.f32 0.015625, %v5653_v15 }
0x2abe   :  { %v5660_v30 = vadd.f32 1e-05, %v5658_v40 }
0x2abf   :  { %v5659_v41 = vadd.f32 1e-05, %v5657_v37 }
0x2ac0   :  { %7066 = vrsqrt.f32 %v5660_v30 }
0x2ac1   :  { %7068 = vrsqrt.f32 %v5659_v41 }
0x2aca   :  { %v7067_v38 = vpop.eup %7066 }
0x2acb   :  { %v7069_v26 = vpop.eup %7068  ;;  %v5664_v45 = vmul.f32 %v7067_v38, %v5648_v19 }
0x2acc   :  { %v5663_v24 = vmul.f32 %v7069_v26, %v5647_v60 }
0x2acd   :  { %v5673_v11 = vmul.f32 %v5927_v43, %v5664_v45 }
0x2ace   :  { %v5672_v51 = vmul.f32 %v5927_v43, %v5663_v24 }
0x2acf   :  { %v5682_v49 = vadd.f32 %v5928_v39, %v5673_v11 }
0x2ad0   :  { %v5681_v25 = vadd.f32 %v5928_v39, %v5672_v51 }
0x2ad2   :  { %6540 = vmatprep.mubr.msk.f32.mxu1 %vm485_vm1, %v5681_v25 }
0x2ad3   :  { %6541 = vmatmul.mubr.msk.f32.vlgmr.msra.gmra.mrb[60].mxu1 %vm485_vm1, %v5682_v49 }
0x2ba6   :  { %v6542_v27 = vpop.f32.mrb[60].mxu1 }
0x2ba7   :  { %v5776_v52 = vadd.f32 %v6542_v27, %v5929_v56  ;;  %v5770_v63 = vpop.f32.mrb[61].mxu1 }
0x2ba8   :  { %v5771_v3 = vadd.f32 %v5929_v56, %v5770_v63 }
0x2ba9   :  { %5780 = vst [vmem:[%s7916_s13 + $0x8] sm:$0xff] %v5776_v52 }
0x2baa   :  { %5779 = vst [vmem:[%s7916_s13] sm:$0xff] %v5771_v3 }
0x2bab   :  { %5785 = vsyncpa [#allocation3], 1 }
0x2bac   :  { %5786 = vsyncpa [#allocation5], 1 }
0x2bad   :  { %5787 = vsyncpa [#allocation8], 1 }
0x2bae   :  { %5788 = vsyncpa [#allocation11], 1 }
0x2baf   :  { %5789 = vsyncpa [#allocation14], 1 }
0x2bb0   :  { %5790 = vsyncpa [#allocation17], 1 }
0x2bb1   :  { %5791 = vsyncpa [#allocation20], 1 }
0x2bb2   :  { %5792 = vsyncpa [#allocation23], 1 }
0x2bb3   :  { %5793 = vsyncpa [#allocation26], 1 }
0x2bb4   :  { %5794 = vsyncpa [#allocation29], 1 }
0x2bb5   :  { %5795 = vsyncpa [#allocation32], 1 }
0x2bb6   :  { %5796 = vsyncpa [#allocation35], 1 }
0x2bb7   :  { %5797 = vsyncpa [#allocation38], 1 }

</bundles_post_ra>
